<compile_context>
chip_gen: v5e
topology: v5e:2x2
jax: 0.10.0
libtpu: 0.0.40
codegen_flags: <defaults>
</compile_context>

<pallas_src>
import functools

import jax
import jax.numpy as jnp
from jax.experimental import pallas as pl
from jax.experimental.pallas import tpu as pltpu


def _round_up(x, m):
    return (x + m - 1) // m * m


def _pad_gate_cols(w, H, Hp):
    """(K, 4H) -> (K, 4Hp): gate g moved to columns [g*Hp, g*Hp+H), rest zero."""
    if Hp == H:
        return w
    K = w.shape[0]
    out = jnp.zeros((K, 4 * Hp), w.dtype)
    for g in range(4):
        out = out.at[:, g * Hp:g * Hp + H].set(w[:, g * H:(g + 1) * H])
    return out


def _pad_rows(w, Kp):
    """(K, N) -> (Kp, N), zero-padded along rows."""
    K = w.shape[0]
    if Kp == K:
        return w
    return jnp.zeros((Kp, w.shape[1]), w.dtype).at[:K, :].set(w)


def _make_icu_lstm_kernel(num_layers: int, seq_len: int, hp: int):
    """Builds a Pallas kernel closed over static num_layers / T / padded H."""
    T, Hp = seq_len, hp

    def kernel(*refs):
        # refs layout: x_ref, (wih_l, whh_l, b_l) * num_layers, wfc, bfc, out_ref
        x_ref = refs[0]
        idx = 1
        layers = []
        for _ in range(num_layers):
            layers.append((refs[idx], refs[idx + 1], refs[idx + 2]))
            idx += 3
        wfc_ref, bfc_ref = refs[idx], refs[idx + 1]
        out_ref = refs[idx + 2]

        Bt = x_ref.shape[1]           # batch tile (multiple of 8)
        F0 = x_ref.shape[2]

        # Time-major rows: row t*Bt + b  ==  (timestep t, batch-row b).
        layer_in = x_ref[...].reshape(T * Bt, F0)

        h = None
        for li, (wih_ref, whh_ref, b_ref) in enumerate(layers):
            wih = wih_ref[...]        # (F_in, 4Hp)
            whh = whh_ref[...]        # (Hp,   4Hp)
            b = b_ref[...]            # (1,    4Hp)  == bias_ih + bias_hh

            # Hoisted input projection + bias: one big MXU matmul per layer.
            zin = jnp.dot(layer_in, wih,
                          preferred_element_type=jnp.float32) + b  # (T*Bt, 4Hp)

            h = jnp.zeros((Bt, Hp), jnp.float32)
            c = jnp.zeros((Bt, Hp), jnp.float32)
            keep_seq = li < num_layers - 1
            hs = []

            # Short static trip count -> full unroll (LLO visibility).
            # TODO(synk): for large T switch to lax.fori_loop with a VMEM carry
            # to bound code size / vreg live ranges.
            for t in range(T):
                z = zin[t * Bt:(t + 1) * Bt, :] + jnp.dot(
                    h, whh, preferred_element_type=jnp.float32)  # (Bt, 4Hp)

                # 128-lane-aligned gate slices (gate order [i, f, g, o]).
                i_g = jax.nn.sigmoid(z[:, 0 * Hp:1 * Hp])
                f_g = jax.nn.sigmoid(z[:, 1 * Hp:2 * Hp])
                g_g = jnp.tanh(z[:, 2 * Hp:3 * Hp])
                o_g = jax.nn.sigmoid(z[:, 3 * Hp:4 * Hp])

                c = f_g * c + i_g * g_g
                h = o_g * jnp.tanh(c)
                if keep_seq:
                    hs.append(h)

            if keep_seq:
                # (T*Bt, Hp), time-major; pure register/vreg concat, no scratch.
                layer_in = jnp.concatenate(hs, axis=0)

        # fc on last timestep's hidden state of the last layer.
        out_ref[...] = (jnp.dot(h, wfc_ref[...],
                                preferred_element_type=jnp.float32)
                        + bfc_ref[...])

    return kernel


def icu_lstm_forward(x, params, *, hidden_size, num_layers, output_size):
    """x: (B, T, F) float32.  params: dict from init_params()."""
    B, T, F = x.shape
    H = hidden_size
    Hp = _round_up(H, 128)      # lane-aligned per-gate width
    Bt = 8                      # one sublane tile per grid program
    Bp = _round_up(B, Bt)

    # Pad batch to the sublane quantum and go time-major (T, Bp, F).
    xp = jnp.zeros((Bp, T, F), jnp.float32).at[:B].set(x)
    xp = jnp.transpose(xp, (1, 0, 2))

    flat_inputs = [xp]
    in_specs = [pl.BlockSpec((T, Bt, F), lambda i: (0, i, 0))]
    for l in range(num_layers):
        wih = _pad_gate_cols(params[f"wih{l}"], H, Hp)
        if l > 0:
            wih = _pad_rows(wih, Hp)            # previous layer's h is Hp wide
        whh = _pad_rows(_pad_gate_cols(params[f"whh{l}"], H, Hp), Hp)
        b = _pad_gate_cols(params[f"b{l}"], H, Hp)
        flat_inputs += [wih, whh, b]
        in_specs += [pl.BlockSpec(wih.shape, lambda i: (0, 0)),
                     pl.BlockSpec(whh.shape, lambda i: (0, 0)),
                     pl.BlockSpec(b.shape, lambda i: (0, 0))]
    wfc = _pad_rows(params["wfc"], Hp)
    bfc = params["bfc"]
    flat_inputs += [wfc, bfc]
    in_specs += [pl.BlockSpec(wfc.shape, lambda i: (0, 0)),
                 pl.BlockSpec(bfc.shape, lambda i: (0, 0))]

    kernel = _make_icu_lstm_kernel(num_layers, T, Hp)

    # NOTE(scaling): at production H, keep only the current layer's weights
    # resident (grid axis over layers or double-buffered pltpu.make_async_copy)
    # instead of all-weights VMEM residency; at these shapes everything fits.
    out = pl.pallas_call(
        kernel,
        out_shape=jax.ShapeDtypeStruct((Bp, output_size), jnp.float32),
        grid=(Bp // Bt,),
        in_specs=in_specs,
        out_specs=pl.BlockSpec((Bt, output_size), lambda i: (i, 0)),
        compiler_params=pltpu.CompilerParams(
            dimension_semantics=("parallel",),   # batch tiles -> v7x megacore
            vmem_limit_bytes=64 * 1024 * 1024),
    )(*flat_inputs)
    return out[:B]


def init_params(key, input_size, hidden_size, num_layers, output_size):
    """Deterministic init matching PyTorch shapes (uniform(-1/sqrt(H), 1/sqrt(H)))."""
    H = hidden_size
    bound = 1.0 / jnp.sqrt(jnp.float32(H))
    params = {}
    for l in range(num_layers):
        f_in = input_size if l == 0 else H
        key, k1, k2, k3, k4 = jax.random.split(key, 5)
        # PyTorch weight_ih_l{l} is (4H, f_in); store transposed (f_in, 4H).
        params[f"wih{l}"] = jax.random.uniform(k1, (f_in, 4 * H), jnp.float32,
                                               -bound, bound)
        params[f"whh{l}"] = jax.random.uniform(k2, (H, 4 * H), jnp.float32,
                                               -bound, bound)
        b_ih = jax.random.uniform(k3, (4 * H,), jnp.float32, -bound, bound)
        b_hh = jax.random.uniform(k4, (4 * H,), jnp.float32, -bound, bound)
        params[f"b{l}"] = (b_ih + b_hh).reshape(1, 4 * H)
    key, k5, k6 = jax.random.split(key, 3)
    fc_bound = 1.0 / jnp.sqrt(jnp.float32(H))
    # PyTorch fc.weight is (O, H); store transposed (H, O).
    params["wfc"] = jax.random.uniform(k5, (H, output_size), jnp.float32,
                                       -fc_bound, fc_bound)
    params["bfc"] = jax.random.uniform(k6, (output_size,), jnp.float32,
                                       -fc_bound, fc_bound).reshape(1, output_size)
    return params


def icu_lstm_reference(x, params, *, hidden_size, num_layers, output_size):
    """Pure-JAX reference with identical semantics, for verification."""
    B, T, _ = x.shape
    H = hidden_size
    inp = x
    h = None
    for l in range(num_layers):
        wih, whh, b = params[f"wih{l}"], params[f"whh{l}"], params[f"b{l}"]
        h = jnp.zeros((B, H), jnp.float32)
        c = jnp.zeros((B, H), jnp.float32)
        outs = []
        for t in range(T):
            z = inp[:, t, :] @ wih + h @ whh + b
            i_g = jax.nn.sigmoid(z[:, 0 * H:1 * H])
            f_g = jax.nn.sigmoid(z[:, 1 * H:2 * H])
            g_g = jnp.tanh(z[:, 2 * H:3 * H])
            o_g = jax.nn.sigmoid(z[:, 3 * H:4 * H])
            c = f_g * c + i_g * g_g
            h = o_g * jnp.tanh(c)
            outs.append(h)
        inp = jnp.stack(outs, axis=1)
    return h @ params["wfc"] + params["bfc"]


if __name__ == "__main__":
    # Small shapes consistent with the module's forward.
    B, T = 4, 8
    INPUT_SIZE, HIDDEN_SIZE, NUM_LAYERS, OUTPUT_SIZE = 16, 32, 2, 4

    key = jax.random.PRNGKey(0)
    key, xkey = jax.random.split(key)
    x = jax.random.normal(xkey, (B, T, INPUT_SIZE), jnp.float32)
    params = init_params(key, INPUT_SIZE, HIDDEN_SIZE, NUM_LAYERS, OUTPUT_SIZE)

    fwd = functools.partial(icu_lstm_forward, hidden_size=HIDDEN_SIZE,
                            num_layers=NUM_LAYERS, output_size=OUTPUT_SIZE)
    out = jax.jit(fwd)(x, params)
    out = jax.block_until_ready(out)

    ref = icu_lstm_reference(x, params, hidden_size=HIDDEN_SIZE,
                             num_layers=NUM_LAYERS, output_size=OUTPUT_SIZE)
    assert out.shape == (B, OUTPUT_SIZE)
    assert jnp.allclose(out, ref, atol=1e-5, rtol=1e-5), "mismatch vs reference"

    print("KERNEL_OK")
</pallas_src>

<mosaic_0001>
module attributes {stable_mosaic.version = 11 : i64} {
  func.func @kernel(%arg0: i32, %arg1: memref<8x8x16xf32, #tpu.memory_space<vmem>>, %arg2: memref<16x512xf32, #tpu.memory_space<vmem>>, %arg3: memref<128x512xf32, #tpu.memory_space<vmem>>, %arg4: memref<1x512xf32, #tpu.memory_space<vmem>>, %arg5: memref<128x512xf32, #tpu.memory_space<vmem>>, %arg6: memref<128x512xf32, #tpu.memory_space<vmem>>, %arg7: memref<1x512xf32, #tpu.memory_space<vmem>>, %arg8: memref<128x4xf32, #tpu.memory_space<vmem>>, %arg9: memref<1x4xf32, #tpu.memory_space<vmem>>, %arg10: memref<8x4xf32, #tpu.memory_space<vmem>>) attributes {dimension_semantics = [#tpu.dimension_semantics<parallel>], iteration_bounds = array<i64: 1>, scalar_prefetch = 0 : i64, scratch_operands = 0 : i64, tpu.core_type = #tpu.core_type<tc>, window_params = [{transform_indices = @transform_0, window_bounds = array<i64: 8, 8, 16>}, {pipeline_mode = #tpu.pipeline_mode<synchronous>, transform_indices = @transform_1, window_bounds = array<i64: 16, 512>}, {pipeline_mode = #tpu.pipeline_mode<synchronous>, transform_indices = @transform_2, window_bounds = array<i64: 128, 512>}, {pipeline_mode = #tpu.pipeline_mode<synchronous>, transform_indices = @transform_3, window_bounds = array<i64: 1, 512>}, {pipeline_mode = #tpu.pipeline_mode<synchronous>, transform_indices = @transform_4, window_bounds = array<i64: 128, 512>}, {pipeline_mode = #tpu.pipeline_mode<synchronous>, transform_indices = @transform_5, window_bounds = array<i64: 128, 512>}, {pipeline_mode = #tpu.pipeline_mode<synchronous>, transform_indices = @transform_6, window_bounds = array<i64: 1, 512>}, {pipeline_mode = #tpu.pipeline_mode<synchronous>, transform_indices = @transform_7, window_bounds = array<i64: 128, 4>}, {pipeline_mode = #tpu.pipeline_mode<synchronous>, transform_indices = @transform_8, window_bounds = array<i64: 1, 4>}, {transform_indices = @transform_9, window_bounds = array<i64: 8, 4>}]} {
    %c0 = arith.constant 0 : index
    %c0_0 = arith.constant 0 : index
    %c0_1 = arith.constant 0 : index
    %0 = vector.load %arg1[%c0, %c0_0, %c0_1] : memref<8x8x16xf32, #tpu.memory_space<vmem>>, vector<8x8x16xf32>
    %1 = vector.shape_cast %0 : vector<8x8x16xf32> to vector<64x16xf32>
    %c0_2 = arith.constant 0 : index
    %c0_3 = arith.constant 0 : index
    %2 = vector.load %arg2[%c0_2, %c0_3] : memref<16x512xf32, #tpu.memory_space<vmem>>, vector<16x512xf32>
    %c0_4 = arith.constant 0 : index
    %c0_5 = arith.constant 0 : index
    %3 = vector.load %arg3[%c0_4, %c0_5] : memref<128x512xf32, #tpu.memory_space<vmem>>, vector<128x512xf32>
    %c0_6 = arith.constant 0 : index
    %c0_7 = arith.constant 0 : index
    %4 = vector.load %arg4[%c0_6, %c0_7] : memref<1x512xf32, #tpu.memory_space<vmem>>, vector<1x512xf32>
    %cst = arith.constant dense<0.000000e+00> : vector<64x512xf32>
    %5 = tpu.matmul %1, %2, %cst {dimension_numbers = #tpu.dot_dimension_numbers<[1], [0], [0], [1], [0, 0, 1, 1], [], []>} : vector<64x16xf32>, vector<16x512xf32>, vector<64x512xf32> -> vector<64x512xf32>
    %6 = vector.broadcast %4 : vector<1x512xf32> to vector<64x512xf32>
    %7 = arith.addf %5, %6 : vector<64x512xf32>
    %cst_8 = arith.constant 0.000000e+00 : f32
    %8 = vector.broadcast %cst_8 : f32 to vector<8x128xf32>
    %cst_9 = arith.constant 0.000000e+00 : f32
    %9 = vector.broadcast %cst_9 : f32 to vector<8x128xf32>
    %10 = vector.extract_strided_slice %7 {offsets = [0, 0], sizes = [8, 512], strides = [1, 1]} : vector<64x512xf32> to vector<8x512xf32>
    %cst_10 = arith.constant dense<0.000000e+00> : vector<8x512xf32>
    %11 = tpu.matmul %8, %3, %cst_10 {dimension_numbers = #tpu.dot_dimension_numbers<[1], [0], [0], [1], [0, 0, 1, 1], [], []>} : vector<8x128xf32>, vector<128x512xf32>, vector<8x512xf32> -> vector<8x512xf32>
    %12 = arith.addf %10, %11 : vector<8x512xf32>
    %13 = vector.extract_strided_slice %12 {offsets = [0, 0], sizes = [8, 128], strides = [1, 1]} : vector<8x512xf32> to vector<8x128xf32>
    %14 = arith.negf %13 : vector<8x128xf32>
    %15 = math.exp %14 : vector<8x128xf32>
    %cst_11 = arith.constant 1.000000e+00 : f32
    %16 = vector.broadcast %cst_11 : f32 to vector<8x128xf32>
    %17 = arith.addf %16, %15 : vector<8x128xf32>
    %18 = arith.divf %16, %17 : vector<8x128xf32>
    %19 = vector.extract_strided_slice %12 {offsets = [0, 128], sizes = [8, 128], strides = [1, 1]} : vector<8x512xf32> to vector<8x128xf32>
    %20 = arith.negf %19 : vector<8x128xf32>
    %21 = math.exp %20 : vector<8x128xf32>
    %cst_12 = arith.constant 1.000000e+00 : f32
    %22 = vector.broadcast %cst_12 : f32 to vector<8x128xf32>
    %23 = arith.addf %22, %21 : vector<8x128xf32>
    %24 = arith.divf %22, %23 : vector<8x128xf32>
    %25 = vector.extract_strided_slice %12 {offsets = [0, 256], sizes = [8, 128], strides = [1, 1]} : vector<8x512xf32> to vector<8x128xf32>
    %26 = math.tanh %25 : vector<8x128xf32>
    %27 = vector.extract_strided_slice %12 {offsets = [0, 384], sizes = [8, 128], strides = [1, 1]} : vector<8x512xf32> to vector<8x128xf32>
    %28 = arith.negf %27 : vector<8x128xf32>
    %29 = math.exp %28 : vector<8x128xf32>
    %cst_13 = arith.constant 1.000000e+00 : f32
    %30 = vector.broadcast %cst_13 : f32 to vector<8x128xf32>
    %31 = arith.addf %30, %29 : vector<8x128xf32>
    %32 = arith.divf %30, %31 : vector<8x128xf32>
    %33 = arith.mulf %24, %9 : vector<8x128xf32>
    %34 = arith.mulf %18, %26 : vector<8x128xf32>
    %35 = arith.addf %33, %34 : vector<8x128xf32>
    %36 = math.tanh %35 : vector<8x128xf32>
    %37 = arith.mulf %32, %36 : vector<8x128xf32>
    %38 = vector.extract_strided_slice %7 {offsets = [8, 0], sizes = [8, 512], strides = [1, 1]} : vector<64x512xf32> to vector<8x512xf32>
    %cst_14 = arith.constant dense<0.000000e+00> : vector<8x512xf32>
    %39 = tpu.matmul %37, %3, %cst_14 {dimension_numbers = #tpu.dot_dimension_numbers<[1], [0], [0], [1], [0, 0, 1, 1], [], []>} : vector<8x128xf32>, vector<128x512xf32>, vector<8x512xf32> -> vector<8x512xf32>
    %40 = arith.addf %38, %39 : vector<8x512xf32>
    %41 = vector.extract_strided_slice %40 {offsets = [0, 0], sizes = [8, 128], strides = [1, 1]} : vector<8x512xf32> to vector<8x128xf32>
    %42 = arith.negf %41 : vector<8x128xf32>
    %43 = math.exp %42 : vector<8x128xf32>
    %cst_15 = arith.constant 1.000000e+00 : f32
    %44 = vector.broadcast %cst_15 : f32 to vector<8x128xf32>
    %45 = arith.addf %44, %43 : vector<8x128xf32>
    %46 = arith.divf %44, %45 : vector<8x128xf32>
    %47 = vector.extract_strided_slice %40 {offsets = [0, 128], sizes = [8, 128], strides = [1, 1]} : vector<8x512xf32> to vector<8x128xf32>
    %48 = arith.negf %47 : vector<8x128xf32>
    %49 = math.exp %48 : vector<8x128xf32>
    %cst_16 = arith.constant 1.000000e+00 : f32
    %50 = vector.broadcast %cst_16 : f32 to vector<8x128xf32>
    %51 = arith.addf %50, %49 : vector<8x128xf32>
    %52 = arith.divf %50, %51 : vector<8x128xf32>
    %53 = vector.extract_strided_slice %40 {offsets = [0, 256], sizes = [8, 128], strides = [1, 1]} : vector<8x512xf32> to vector<8x128xf32>
    %54 = math.tanh %53 : vector<8x128xf32>
    %55 = vector.extract_strided_slice %40 {offsets = [0, 384], sizes = [8, 128], strides = [1, 1]} : vector<8x512xf32> to vector<8x128xf32>
    %56 = arith.negf %55 : vector<8x128xf32>
    %57 = math.exp %56 : vector<8x128xf32>
    %cst_17 = arith.constant 1.000000e+00 : f32
    %58 = vector.broadcast %cst_17 : f32 to vector<8x128xf32>
    %59 = arith.addf %58, %57 : vector<8x128xf32>
    %60 = arith.divf %58, %59 : vector<8x128xf32>
    %61 = arith.mulf %52, %35 : vector<8x128xf32>
    %62 = arith.mulf %46, %54 : vector<8x128xf32>
    %63 = arith.addf %61, %62 : vector<8x128xf32>
    %64 = math.tanh %63 : vector<8x128xf32>
    %65 = arith.mulf %60, %64 : vector<8x128xf32>
    %66 = vector.extract_strided_slice %7 {offsets = [16, 0], sizes = [8, 512], strides = [1, 1]} : vector<64x512xf32> to vector<8x512xf32>
    %cst_18 = arith.constant dense<0.000000e+00> : vector<8x512xf32>
    %67 = tpu.matmul %65, %3, %cst_18 {dimension_numbers = #tpu.dot_dimension_numbers<[1], [0], [0], [1], [0, 0, 1, 1], [], []>} : vector<8x128xf32>, vector<128x512xf32>, vector<8x512xf32> -> vector<8x512xf32>
    %68 = arith.addf %66, %67 : vector<8x512xf32>
    %69 = vector.extract_strided_slice %68 {offsets = [0, 0], sizes = [8, 128], strides = [1, 1]} : vector<8x512xf32> to vector<8x128xf32>
    %70 = arith.negf %69 : vector<8x128xf32>
    %71 = math.exp %70 : vector<8x128xf32>
    %cst_19 = arith.constant 1.000000e+00 : f32
    %72 = vector.broadcast %cst_19 : f32 to vector<8x128xf32>
    %73 = arith.addf %72, %71 : vector<8x128xf32>
    %74 = arith.divf %72, %73 : vector<8x128xf32>
    %75 = vector.extract_strided_slice %68 {offsets = [0, 128], sizes = [8, 128], strides = [1, 1]} : vector<8x512xf32> to vector<8x128xf32>
    %76 = arith.negf %75 : vector<8x128xf32>
    %77 = math.exp %76 : vector<8x128xf32>
    %cst_20 = arith.constant 1.000000e+00 : f32
    %78 = vector.broadcast %cst_20 : f32 to vector<8x128xf32>
    %79 = arith.addf %78, %77 : vector<8x128xf32>
    %80 = arith.divf %78, %79 : vector<8x128xf32>
    %81 = vector.extract_strided_slice %68 {offsets = [0, 256], sizes = [8, 128], strides = [1, 1]} : vector<8x512xf32> to vector<8x128xf32>
    %82 = math.tanh %81 : vector<8x128xf32>
    %83 = vector.extract_strided_slice %68 {offsets = [0, 384], sizes = [8, 128], strides = [1, 1]} : vector<8x512xf32> to vector<8x128xf32>
    %84 = arith.negf %83 : vector<8x128xf32>
    %85 = math.exp %84 : vector<8x128xf32>
    %cst_21 = arith.constant 1.000000e+00 : f32
    %86 = vector.broadcast %cst_21 : f32 to vector<8x128xf32>
    %87 = arith.addf %86, %85 : vector<8x128xf32>
    %88 = arith.divf %86, %87 : vector<8x128xf32>
    %89 = arith.mulf %80, %63 : vector<8x128xf32>
    %90 = arith.mulf %74, %82 : vector<8x128xf32>
    %91 = arith.addf %89, %90 : vector<8x128xf32>
    %92 = math.tanh %91 : vector<8x128xf32>
    %93 = arith.mulf %88, %92 : vector<8x128xf32>
    %94 = vector.extract_strided_slice %7 {offsets = [24, 0], sizes = [8, 512], strides = [1, 1]} : vector<64x512xf32> to vector<8x512xf32>
    %cst_22 = arith.constant dense<0.000000e+00> : vector<8x512xf32>
    %95 = tpu.matmul %93, %3, %cst_22 {dimension_numbers = #tpu.dot_dimension_numbers<[1], [0], [0], [1], [0, 0, 1, 1], [], []>} : vector<8x128xf32>, vector<128x512xf32>, vector<8x512xf32> -> vector<8x512xf32>
    %96 = arith.addf %94, %95 : vector<8x512xf32>
    %97 = vector.extract_strided_slice %96 {offsets = [0, 0], sizes = [8, 128], strides = [1, 1]} : vector<8x512xf32> to vector<8x128xf32>
    %98 = arith.negf %97 : vector<8x128xf32>
    %99 = math.exp %98 : vector<8x128xf32>
    %cst_23 = arith.constant 1.000000e+00 : f32
    %100 = vector.broadcast %cst_23 : f32 to vector<8x128xf32>
    %101 = arith.addf %100, %99 : vector<8x128xf32>
    %102 = arith.divf %100, %101 : vector<8x128xf32>
    %103 = vector.extract_strided_slice %96 {offsets = [0, 128], sizes = [8, 128], strides = [1, 1]} : vector<8x512xf32> to vector<8x128xf32>
    %104 = arith.negf %103 : vector<8x128xf32>
    %105 = math.exp %104 : vector<8x128xf32>
    %cst_24 = arith.constant 1.000000e+00 : f32
    %106 = vector.broadcast %cst_24 : f32 to vector<8x128xf32>
    %107 = arith.addf %106, %105 : vector<8x128xf32>
    %108 = arith.divf %106, %107 : vector<8x128xf32>
    %109 = vector.extract_strided_slice %96 {offsets = [0, 256], sizes = [8, 128], strides = [1, 1]} : vector<8x512xf32> to vector<8x128xf32>
    %110 = math.tanh %109 : vector<8x128xf32>
    %111 = vector.extract_strided_slice %96 {offsets = [0, 384], sizes = [8, 128], strides = [1, 1]} : vector<8x512xf32> to vector<8x128xf32>
    %112 = arith.negf %111 : vector<8x128xf32>
    %113 = math.exp %112 : vector<8x128xf32>
    %cst_25 = arith.constant 1.000000e+00 : f32
    %114 = vector.broadcast %cst_25 : f32 to vector<8x128xf32>
    %115 = arith.addf %114, %113 : vector<8x128xf32>
    %116 = arith.divf %114, %115 : vector<8x128xf32>
    %117 = arith.mulf %108, %91 : vector<8x128xf32>
    %118 = arith.mulf %102, %110 : vector<8x128xf32>
    %119 = arith.addf %117, %118 : vector<8x128xf32>
    %120 = math.tanh %119 : vector<8x128xf32>
    %121 = arith.mulf %116, %120 : vector<8x128xf32>
    %122 = vector.extract_strided_slice %7 {offsets = [32, 0], sizes = [8, 512], strides = [1, 1]} : vector<64x512xf32> to vector<8x512xf32>
    %cst_26 = arith.constant dense<0.000000e+00> : vector<8x512xf32>
    %123 = tpu.matmul %121, %3, %cst_26 {dimension_numbers = #tpu.dot_dimension_numbers<[1], [0], [0], [1], [0, 0, 1, 1], [], []>} : vector<8x128xf32>, vector<128x512xf32>, vector<8x512xf32> -> vector<8x512xf32>
    %124 = arith.addf %122, %123 : vector<8x512xf32>
    %125 = vector.extract_strided_slice %124 {offsets = [0, 0], sizes = [8, 128], strides = [1, 1]} : vector<8x512xf32> to vector<8x128xf32>
    %126 = arith.negf %125 : vector<8x128xf32>
    %127 = math.exp %126 : vector<8x128xf32>
    %cst_27 = arith.constant 1.000000e+00 : f32
    %128 = vector.broadcast %cst_27 : f32 to vector<8x128xf32>
    %129 = arith.addf %128, %127 : vector<8x128xf32>
    %130 = arith.divf %128, %129 : vector<8x128xf32>
    %131 = vector.extract_strided_slice %124 {offsets = [0, 128], sizes = [8, 128], strides = [1, 1]} : vector<8x512xf32> to vector<8x128xf32>
    %132 = arith.negf %131 : vector<8x128xf32>
    %133 = math.exp %132 : vector<8x128xf32>
    %cst_28 = arith.constant 1.000000e+00 : f32
    %134 = vector.broadcast %cst_28 : f32 to vector<8x128xf32>
    %135 = arith.addf %134, %133 : vector<8x128xf32>
    %136 = arith.divf %134, %135 : vector<8x128xf32>
    %137 = vector.extract_strided_slice %124 {offsets = [0, 256], sizes = [8, 128], strides = [1, 1]} : vector<8x512xf32> to vector<8x128xf32>
    %138 = math.tanh %137 : vector<8x128xf32>
    %139 = vector.extract_strided_slice %124 {offsets = [0, 384], sizes = [8, 128], strides = [1, 1]} : vector<8x512xf32> to vector<8x128xf32>
    %140 = arith.negf %139 : vector<8x128xf32>
    %141 = math.exp %140 : vector<8x128xf32>
    %cst_29 = arith.constant 1.000000e+00 : f32
    %142 = vector.broadcast %cst_29 : f32 to vector<8x128xf32>
    %143 = arith.addf %142, %141 : vector<8x128xf32>
    %144 = arith.divf %142, %143 : vector<8x128xf32>
    %145 = arith.mulf %136, %119 : vector<8x128xf32>
    %146 = arith.mulf %130, %138 : vector<8x128xf32>
    %147 = arith.addf %145, %146 : vector<8x128xf32>
    %148 = math.tanh %147 : vector<8x128xf32>
    %149 = arith.mulf %144, %148 : vector<8x128xf32>
    %150 = vector.extract_strided_slice %7 {offsets = [40, 0], sizes = [8, 512], strides = [1, 1]} : vector<64x512xf32> to vector<8x512xf32>
    %cst_30 = arith.constant dense<0.000000e+00> : vector<8x512xf32>
    %151 = tpu.matmul %149, %3, %cst_30 {dimension_numbers = #tpu.dot_dimension_numbers<[1], [0], [0], [1], [0, 0, 1, 1], [], []>} : vector<8x128xf32>, vector<128x512xf32>, vector<8x512xf32> -> vector<8x512xf32>
    %152 = arith.addf %150, %151 : vector<8x512xf32>
    %153 = vector.extract_strided_slice %152 {offsets = [0, 0], sizes = [8, 128], strides = [1, 1]} : vector<8x512xf32> to vector<8x128xf32>
    %154 = arith.negf %153 : vector<8x128xf32>
    %155 = math.exp %154 : vector<8x128xf32>
    %cst_31 = arith.constant 1.000000e+00 : f32
    %156 = vector.broadcast %cst_31 : f32 to vector<8x128xf32>
    %157 = arith.addf %156, %155 : vector<8x128xf32>
    %158 = arith.divf %156, %157 : vector<8x128xf32>
    %159 = vector.extract_strided_slice %152 {offsets = [0, 128], sizes = [8, 128], strides = [1, 1]} : vector<8x512xf32> to vector<8x128xf32>
    %160 = arith.negf %159 : vector<8x128xf32>
    %161 = math.exp %160 : vector<8x128xf32>
    %cst_32 = arith.constant 1.000000e+00 : f32
    %162 = vector.broadcast %cst_32 : f32 to vector<8x128xf32>
    %163 = arith.addf %162, %161 : vector<8x128xf32>
    %164 = arith.divf %162, %163 : vector<8x128xf32>
    %165 = vector.extract_strided_slice %152 {offsets = [0, 256], sizes = [8, 128], strides = [1, 1]} : vector<8x512xf32> to vector<8x128xf32>
    %166 = math.tanh %165 : vector<8x128xf32>
    %167 = vector.extract_strided_slice %152 {offsets = [0, 384], sizes = [8, 128], strides = [1, 1]} : vector<8x512xf32> to vector<8x128xf32>
    %168 = arith.negf %167 : vector<8x128xf32>
    %169 = math.exp %168 : vector<8x128xf32>
    %cst_33 = arith.constant 1.000000e+00 : f32
    %170 = vector.broadcast %cst_33 : f32 to vector<8x128xf32>
    %171 = arith.addf %170, %169 : vector<8x128xf32>
    %172 = arith.divf %170, %171 : vector<8x128xf32>
    %173 = arith.mulf %164, %147 : vector<8x128xf32>
    %174 = arith.mulf %158, %166 : vector<8x128xf32>
    %175 = arith.addf %173, %174 : vector<8x128xf32>
    %176 = math.tanh %175 : vector<8x128xf32>
    %177 = arith.mulf %172, %176 : vector<8x128xf32>
    %178 = vector.extract_strided_slice %7 {offsets = [48, 0], sizes = [8, 512], strides = [1, 1]} : vector<64x512xf32> to vector<8x512xf32>
    %cst_34 = arith.constant dense<0.000000e+00> : vector<8x512xf32>
    %179 = tpu.matmul %177, %3, %cst_34 {dimension_numbers = #tpu.dot_dimension_numbers<[1], [0], [0], [1], [0, 0, 1, 1], [], []>} : vector<8x128xf32>, vector<128x512xf32>, vector<8x512xf32> -> vector<8x512xf32>
    %180 = arith.addf %178, %179 : vector<8x512xf32>
    %181 = vector.extract_strided_slice %180 {offsets = [0, 0], sizes = [8, 128], strides = [1, 1]} : vector<8x512xf32> to vector<8x128xf32>
    %182 = arith.negf %181 : vector<8x128xf32>
    %183 = math.exp %182 : vector<8x128xf32>
    %cst_35 = arith.constant 1.000000e+00 : f32
    %184 = vector.broadcast %cst_35 : f32 to vector<8x128xf32>
    %185 = arith.addf %184, %183 : vector<8x128xf32>
    %186 = arith.divf %184, %185 : vector<8x128xf32>
    %187 = vector.extract_strided_slice %180 {offsets = [0, 128], sizes = [8, 128], strides = [1, 1]} : vector<8x512xf32> to vector<8x128xf32>
    %188 = arith.negf %187 : vector<8x128xf32>
    %189 = math.exp %188 : vector<8x128xf32>
    %cst_36 = arith.constant 1.000000e+00 : f32
    %190 = vector.broadcast %cst_36 : f32 to vector<8x128xf32>
    %191 = arith.addf %190, %189 : vector<8x128xf32>
    %192 = arith.divf %190, %191 : vector<8x128xf32>
    %193 = vector.extract_strided_slice %180 {offsets = [0, 256], sizes = [8, 128], strides = [1, 1]} : vector<8x512xf32> to vector<8x128xf32>
    %194 = math.tanh %193 : vector<8x128xf32>
    %195 = vector.extract_strided_slice %180 {offsets = [0, 384], sizes = [8, 128], strides = [1, 1]} : vector<8x512xf32> to vector<8x128xf32>
    %196 = arith.negf %195 : vector<8x128xf32>
    %197 = math.exp %196 : vector<8x128xf32>
    %cst_37 = arith.constant 1.000000e+00 : f32
    %198 = vector.broadcast %cst_37 : f32 to vector<8x128xf32>
    %199 = arith.addf %198, %197 : vector<8x128xf32>
    %200 = arith.divf %198, %199 : vector<8x128xf32>
    %201 = arith.mulf %192, %175 : vector<8x128xf32>
    %202 = arith.mulf %186, %194 : vector<8x128xf32>
    %203 = arith.addf %201, %202 : vector<8x128xf32>
    %204 = math.tanh %203 : vector<8x128xf32>
    %205 = arith.mulf %200, %204 : vector<8x128xf32>
    %206 = vector.extract_strided_slice %7 {offsets = [56, 0], sizes = [8, 512], strides = [1, 1]} : vector<64x512xf32> to vector<8x512xf32>
    %cst_38 = arith.constant dense<0.000000e+00> : vector<8x512xf32>
    %207 = tpu.matmul %205, %3, %cst_38 {dimension_numbers = #tpu.dot_dimension_numbers<[1], [0], [0], [1], [0, 0, 1, 1], [], []>} : vector<8x128xf32>, vector<128x512xf32>, vector<8x512xf32> -> vector<8x512xf32>
    %208 = arith.addf %206, %207 : vector<8x512xf32>
    %209 = vector.extract_strided_slice %208 {offsets = [0, 0], sizes = [8, 128], strides = [1, 1]} : vector<8x512xf32> to vector<8x128xf32>
    %210 = arith.negf %209 : vector<8x128xf32>
    %211 = math.exp %210 : vector<8x128xf32>
    %cst_39 = arith.constant 1.000000e+00 : f32
    %212 = vector.broadcast %cst_39 : f32 to vector<8x128xf32>
    %213 = arith.addf %212, %211 : vector<8x128xf32>
    %214 = arith.divf %212, %213 : vector<8x128xf32>
    %215 = vector.extract_strided_slice %208 {offsets = [0, 128], sizes = [8, 128], strides = [1, 1]} : vector<8x512xf32> to vector<8x128xf32>
    %216 = arith.negf %215 : vector<8x128xf32>
    %217 = math.exp %216 : vector<8x128xf32>
    %cst_40 = arith.constant 1.000000e+00 : f32
    %218 = vector.broadcast %cst_40 : f32 to vector<8x128xf32>
    %219 = arith.addf %218, %217 : vector<8x128xf32>
    %220 = arith.divf %218, %219 : vector<8x128xf32>
    %221 = vector.extract_strided_slice %208 {offsets = [0, 256], sizes = [8, 128], strides = [1, 1]} : vector<8x512xf32> to vector<8x128xf32>
    %222 = math.tanh %221 : vector<8x128xf32>
    %223 = vector.extract_strided_slice %208 {offsets = [0, 384], sizes = [8, 128], strides = [1, 1]} : vector<8x512xf32> to vector<8x128xf32>
    %224 = arith.negf %223 : vector<8x128xf32>
    %225 = math.exp %224 : vector<8x128xf32>
    %cst_41 = arith.constant 1.000000e+00 : f32
    %226 = vector.broadcast %cst_41 : f32 to vector<8x128xf32>
    %227 = arith.addf %226, %225 : vector<8x128xf32>
    %228 = arith.divf %226, %227 : vector<8x128xf32>
    %229 = arith.mulf %220, %203 : vector<8x128xf32>
    %230 = arith.mulf %214, %222 : vector<8x128xf32>
    %231 = arith.addf %229, %230 : vector<8x128xf32>
    %232 = math.tanh %231 : vector<8x128xf32>
    %233 = arith.mulf %228, %232 : vector<8x128xf32>
    %234 = tpu.concatenate %37, %65, %93, %121, %149, %177, %205, %233 in 0 : vector<8x128xf32>, vector<8x128xf32>, vector<8x128xf32>, vector<8x128xf32>, vector<8x128xf32>, vector<8x128xf32>, vector<8x128xf32>, vector<8x128xf32> -> vector<64x128xf32>
    %c0_42 = arith.constant 0 : index
    %c0_43 = arith.constant 0 : index
    %235 = vector.load %arg5[%c0_42, %c0_43] : memref<128x512xf32, #tpu.memory_space<vmem>>, vector<128x512xf32>
    %c0_44 = arith.constant 0 : index
    %c0_45 = arith.constant 0 : index
    %236 = vector.load %arg6[%c0_44, %c0_45] : memref<128x512xf32, #tpu.memory_space<vmem>>, vector<128x512xf32>
    %c0_46 = arith.constant 0 : index
    %c0_47 = arith.constant 0 : index
    %237 = vector.load %arg7[%c0_46, %c0_47] : memref<1x512xf32, #tpu.memory_space<vmem>>, vector<1x512xf32>
    %cst_48 = arith.constant dense<0.000000e+00> : vector<64x512xf32>
    %238 = tpu.matmul %234, %235, %cst_48 {dimension_numbers = #tpu.dot_dimension_numbers<[1], [0], [0], [1], [0, 0, 1, 1], [], []>} : vector<64x128xf32>, vector<128x512xf32>, vector<64x512xf32> -> vector<64x512xf32>
    %239 = vector.broadcast %237 : vector<1x512xf32> to vector<64x512xf32>
    %240 = arith.addf %238, %239 : vector<64x512xf32>
    %cst_49 = arith.constant 0.000000e+00 : f32
    %241 = vector.broadcast %cst_49 : f32 to vector<8x128xf32>
    %cst_50 = arith.constant 0.000000e+00 : f32
    %242 = vector.broadcast %cst_50 : f32 to vector<8x128xf32>
    %243 = vector.extract_strided_slice %240 {offsets = [0, 0], sizes = [8, 512], strides = [1, 1]} : vector<64x512xf32> to vector<8x512xf32>
    %cst_51 = arith.constant dense<0.000000e+00> : vector<8x512xf32>
    %244 = tpu.matmul %241, %236, %cst_51 {dimension_numbers = #tpu.dot_dimension_numbers<[1], [0], [0], [1], [0, 0, 1, 1], [], []>} : vector<8x128xf32>, vector<128x512xf32>, vector<8x512xf32> -> vector<8x512xf32>
    %245 = arith.addf %243, %244 : vector<8x512xf32>
    %246 = vector.extract_strided_slice %245 {offsets = [0, 0], sizes = [8, 128], strides = [1, 1]} : vector<8x512xf32> to vector<8x128xf32>
    %247 = arith.negf %246 : vector<8x128xf32>
    %248 = math.exp %247 : vector<8x128xf32>
    %cst_52 = arith.constant 1.000000e+00 : f32
    %249 = vector.broadcast %cst_52 : f32 to vector<8x128xf32>
    %250 = arith.addf %249, %248 : vector<8x128xf32>
    %251 = arith.divf %249, %250 : vector<8x128xf32>
    %252 = vector.extract_strided_slice %245 {offsets = [0, 128], sizes = [8, 128], strides = [1, 1]} : vector<8x512xf32> to vector<8x128xf32>
    %253 = arith.negf %252 : vector<8x128xf32>
    %254 = math.exp %253 : vector<8x128xf32>
    %cst_53 = arith.constant 1.000000e+00 : f32
    %255 = vector.broadcast %cst_53 : f32 to vector<8x128xf32>
    %256 = arith.addf %255, %254 : vector<8x128xf32>
    %257 = arith.divf %255, %256 : vector<8x128xf32>
    %258 = vector.extract_strided_slice %245 {offsets = [0, 256], sizes = [8, 128], strides = [1, 1]} : vector<8x512xf32> to vector<8x128xf32>
    %259 = math.tanh %258 : vector<8x128xf32>
    %260 = vector.extract_strided_slice %245 {offsets = [0, 384], sizes = [8, 128], strides = [1, 1]} : vector<8x512xf32> to vector<8x128xf32>
    %261 = arith.negf %260 : vector<8x128xf32>
    %262 = math.exp %261 : vector<8x128xf32>
    %cst_54 = arith.constant 1.000000e+00 : f32
    %263 = vector.broadcast %cst_54 : f32 to vector<8x128xf32>
    %264 = arith.addf %263, %262 : vector<8x128xf32>
    %265 = arith.divf %263, %264 : vector<8x128xf32>
    %266 = arith.mulf %257, %242 : vector<8x128xf32>
    %267 = arith.mulf %251, %259 : vector<8x128xf32>
    %268 = arith.addf %266, %267 : vector<8x128xf32>
    %269 = math.tanh %268 : vector<8x128xf32>
    %270 = arith.mulf %265, %269 : vector<8x128xf32>
    %271 = vector.extract_strided_slice %240 {offsets = [8, 0], sizes = [8, 512], strides = [1, 1]} : vector<64x512xf32> to vector<8x512xf32>
    %cst_55 = arith.constant dense<0.000000e+00> : vector<8x512xf32>
    %272 = tpu.matmul %270, %236, %cst_55 {dimension_numbers = #tpu.dot_dimension_numbers<[1], [0], [0], [1], [0, 0, 1, 1], [], []>} : vector<8x128xf32>, vector<128x512xf32>, vector<8x512xf32> -> vector<8x512xf32>
    %273 = arith.addf %271, %272 : vector<8x512xf32>
    %274 = vector.extract_strided_slice %273 {offsets = [0, 0], sizes = [8, 128], strides = [1, 1]} : vector<8x512xf32> to vector<8x128xf32>
    %275 = arith.negf %274 : vector<8x128xf32>
    %276 = math.exp %275 : vector<8x128xf32>
    %cst_56 = arith.constant 1.000000e+00 : f32
    %277 = vector.broadcast %cst_56 : f32 to vector<8x128xf32>
    %278 = arith.addf %277, %276 : vector<8x128xf32>
    %279 = arith.divf %277, %278 : vector<8x128xf32>
    %280 = vector.extract_strided_slice %273 {offsets = [0, 128], sizes = [8, 128], strides = [1, 1]} : vector<8x512xf32> to vector<8x128xf32>
    %281 = arith.negf %280 : vector<8x128xf32>
    %282 = math.exp %281 : vector<8x128xf32>
    %cst_57 = arith.constant 1.000000e+00 : f32
    %283 = vector.broadcast %cst_57 : f32 to vector<8x128xf32>
    %284 = arith.addf %283, %282 : vector<8x128xf32>
    %285 = arith.divf %283, %284 : vector<8x128xf32>
    %286 = vector.extract_strided_slice %273 {offsets = [0, 256], sizes = [8, 128], strides = [1, 1]} : vector<8x512xf32> to vector<8x128xf32>
    %287 = math.tanh %286 : vector<8x128xf32>
    %288 = vector.extract_strided_slice %273 {offsets = [0, 384], sizes = [8, 128], strides = [1, 1]} : vector<8x512xf32> to vector<8x128xf32>
    %289 = arith.negf %288 : vector<8x128xf32>
    %290 = math.exp %289 : vector<8x128xf32>
    %cst_58 = arith.constant 1.000000e+00 : f32
    %291 = vector.broadcast %cst_58 : f32 to vector<8x128xf32>
    %292 = arith.addf %291, %290 : vector<8x128xf32>
    %293 = arith.divf %291, %292 : vector<8x128xf32>
    %294 = arith.mulf %285, %268 : vector<8x128xf32>
    %295 = arith.mulf %279, %287 : vector<8x128xf32>
    %296 = arith.addf %294, %295 : vector<8x128xf32>
    %297 = math.tanh %296 : vector<8x128xf32>
    %298 = arith.mulf %293, %297 : vector<8x128xf32>
    %299 = vector.extract_strided_slice %240 {offsets = [16, 0], sizes = [8, 512], strides = [1, 1]} : vector<64x512xf32> to vector<8x512xf32>
    %cst_59 = arith.constant dense<0.000000e+00> : vector<8x512xf32>
    %300 = tpu.matmul %298, %236, %cst_59 {dimension_numbers = #tpu.dot_dimension_numbers<[1], [0], [0], [1], [0, 0, 1, 1], [], []>} : vector<8x128xf32>, vector<128x512xf32>, vector<8x512xf32> -> vector<8x512xf32>
    %301 = arith.addf %299, %300 : vector<8x512xf32>
    %302 = vector.extract_strided_slice %301 {offsets = [0, 0], sizes = [8, 128], strides = [1, 1]} : vector<8x512xf32> to vector<8x128xf32>
    %303 = arith.negf %302 : vector<8x128xf32>
    %304 = math.exp %303 : vector<8x128xf32>
    %cst_60 = arith.constant 1.000000e+00 : f32
    %305 = vector.broadcast %cst_60 : f32 to vector<8x128xf32>
    %306 = arith.addf %305, %304 : vector<8x128xf32>
    %307 = arith.divf %305, %306 : vector<8x128xf32>
    %308 = vector.extract_strided_slice %301 {offsets = [0, 128], sizes = [8, 128], strides = [1, 1]} : vector<8x512xf32> to vector<8x128xf32>
    %309 = arith.negf %308 : vector<8x128xf32>
    %310 = math.exp %309 : vector<8x128xf32>
    %cst_61 = arith.constant 1.000000e+00 : f32
    %311 = vector.broadcast %cst_61 : f32 to vector<8x128xf32>
    %312 = arith.addf %311, %310 : vector<8x128xf32>
    %313 = arith.divf %311, %312 : vector<8x128xf32>
    %314 = vector.extract_strided_slice %301 {offsets = [0, 256], sizes = [8, 128], strides = [1, 1]} : vector<8x512xf32> to vector<8x128xf32>
    %315 = math.tanh %314 : vector<8x128xf32>
    %316 = vector.extract_strided_slice %301 {offsets = [0, 384], sizes = [8, 128], strides = [1, 1]} : vector<8x512xf32> to vector<8x128xf32>
    %317 = arith.negf %316 : vector<8x128xf32>
    %318 = math.exp %317 : vector<8x128xf32>
    %cst_62 = arith.constant 1.000000e+00 : f32
    %319 = vector.broadcast %cst_62 : f32 to vector<8x128xf32>
    %320 = arith.addf %319, %318 : vector<8x128xf32>
    %321 = arith.divf %319, %320 : vector<8x128xf32>
    %322 = arith.mulf %313, %296 : vector<8x128xf32>
    %323 = arith.mulf %307, %315 : vector<8x128xf32>
    %324 = arith.addf %322, %323 : vector<8x128xf32>
    %325 = math.tanh %324 : vector<8x128xf32>
    %326 = arith.mulf %321, %325 : vector<8x128xf32>
    %327 = vector.extract_strided_slice %240 {offsets = [24, 0], sizes = [8, 512], strides = [1, 1]} : vector<64x512xf32> to vector<8x512xf32>
    %cst_63 = arith.constant dense<0.000000e+00> : vector<8x512xf32>
    %328 = tpu.matmul %326, %236, %cst_63 {dimension_numbers = #tpu.dot_dimension_numbers<[1], [0], [0], [1], [0, 0, 1, 1], [], []>} : vector<8x128xf32>, vector<128x512xf32>, vector<8x512xf32> -> vector<8x512xf32>
    %329 = arith.addf %327, %328 : vector<8x512xf32>
    %330 = vector.extract_strided_slice %329 {offsets = [0, 0], sizes = [8, 128], strides = [1, 1]} : vector<8x512xf32> to vector<8x128xf32>
    %331 = arith.negf %330 : vector<8x128xf32>
    %332 = math.exp %331 : vector<8x128xf32>
    %cst_64 = arith.constant 1.000000e+00 : f32
    %333 = vector.broadcast %cst_64 : f32 to vector<8x128xf32>
    %334 = arith.addf %333, %332 : vector<8x128xf32>
    %335 = arith.divf %333, %334 : vector<8x128xf32>
    %336 = vector.extract_strided_slice %329 {offsets = [0, 128], sizes = [8, 128], strides = [1, 1]} : vector<8x512xf32> to vector<8x128xf32>
    %337 = arith.negf %336 : vector<8x128xf32>
    %338 = math.exp %337 : vector<8x128xf32>
    %cst_65 = arith.constant 1.000000e+00 : f32
    %339 = vector.broadcast %cst_65 : f32 to vector<8x128xf32>
    %340 = arith.addf %339, %338 : vector<8x128xf32>
    %341 = arith.divf %339, %340 : vector<8x128xf32>
    %342 = vector.extract_strided_slice %329 {offsets = [0, 256], sizes = [8, 128], strides = [1, 1]} : vector<8x512xf32> to vector<8x128xf32>
    %343 = math.tanh %342 : vector<8x128xf32>
    %344 = vector.extract_strided_slice %329 {offsets = [0, 384], sizes = [8, 128], strides = [1, 1]} : vector<8x512xf32> to vector<8x128xf32>
    %345 = arith.negf %344 : vector<8x128xf32>
    %346 = math.exp %345 : vector<8x128xf32>
    %cst_66 = arith.constant 1.000000e+00 : f32
    %347 = vector.broadcast %cst_66 : f32 to vector<8x128xf32>
    %348 = arith.addf %347, %346 : vector<8x128xf32>
    %349 = arith.divf %347, %348 : vector<8x128xf32>
    %350 = arith.mulf %341, %324 : vector<8x128xf32>
    %351 = arith.mulf %335, %343 : vector<8x128xf32>
    %352 = arith.addf %350, %351 : vector<8x128xf32>
    %353 = math.tanh %352 : vector<8x128xf32>
    %354 = arith.mulf %349, %353 : vector<8x128xf32>
    %355 = vector.extract_strided_slice %240 {offsets = [32, 0], sizes = [8, 512], strides = [1, 1]} : vector<64x512xf32> to vector<8x512xf32>
    %cst_67 = arith.constant dense<0.000000e+00> : vector<8x512xf32>
    %356 = tpu.matmul %354, %236, %cst_67 {dimension_numbers = #tpu.dot_dimension_numbers<[1], [0], [0], [1], [0, 0, 1, 1], [], []>} : vector<8x128xf32>, vector<128x512xf32>, vector<8x512xf32> -> vector<8x512xf32>
    %357 = arith.addf %355, %356 : vector<8x512xf32>
    %358 = vector.extract_strided_slice %357 {offsets = [0, 0], sizes = [8, 128], strides = [1, 1]} : vector<8x512xf32> to vector<8x128xf32>
    %359 = arith.negf %358 : vector<8x128xf32>
    %360 = math.exp %359 : vector<8x128xf32>
    %cst_68 = arith.constant 1.000000e+00 : f32
    %361 = vector.broadcast %cst_68 : f32 to vector<8x128xf32>
    %362 = arith.addf %361, %360 : vector<8x128xf32>
    %363 = arith.divf %361, %362 : vector<8x128xf32>
    %364 = vector.extract_strided_slice %357 {offsets = [0, 128], sizes = [8, 128], strides = [1, 1]} : vector<8x512xf32> to vector<8x128xf32>
    %365 = arith.negf %364 : vector<8x128xf32>
    %366 = math.exp %365 : vector<8x128xf32>
    %cst_69 = arith.constant 1.000000e+00 : f32
    %367 = vector.broadcast %cst_69 : f32 to vector<8x128xf32>
    %368 = arith.addf %367, %366 : vector<8x128xf32>
    %369 = arith.divf %367, %368 : vector<8x128xf32>
    %370 = vector.extract_strided_slice %357 {offsets = [0, 256], sizes = [8, 128], strides = [1, 1]} : vector<8x512xf32> to vector<8x128xf32>
    %371 = math.tanh %370 : vector<8x128xf32>
    %372 = vector.extract_strided_slice %357 {offsets = [0, 384], sizes = [8, 128], strides = [1, 1]} : vector<8x512xf32> to vector<8x128xf32>
    %373 = arith.negf %372 : vector<8x128xf32>
    %374 = math.exp %373 : vector<8x128xf32>
    %cst_70 = arith.constant 1.000000e+00 : f32
    %375 = vector.broadcast %cst_70 : f32 to vector<8x128xf32>
    %376 = arith.addf %375, %374 : vector<8x128xf32>
    %377 = arith.divf %375, %376 : vector<8x128xf32>
    %378 = arith.mulf %369, %352 : vector<8x128xf32>
    %379 = arith.mulf %363, %371 : vector<8x128xf32>
    %380 = arith.addf %378, %379 : vector<8x128xf32>
    %381 = math.tanh %380 : vector<8x128xf32>
    %382 = arith.mulf %377, %381 : vector<8x128xf32>
    %383 = vector.extract_strided_slice %240 {offsets = [40, 0], sizes = [8, 512], strides = [1, 1]} : vector<64x512xf32> to vector<8x512xf32>
    %cst_71 = arith.constant dense<0.000000e+00> : vector<8x512xf32>
    %384 = tpu.matmul %382, %236, %cst_71 {dimension_numbers = #tpu.dot_dimension_numbers<[1], [0], [0], [1], [0, 0, 1, 1], [], []>} : vector<8x128xf32>, vector<128x512xf32>, vector<8x512xf32> -> vector<8x512xf32>
    %385 = arith.addf %383, %384 : vector<8x512xf32>
    %386 = vector.extract_strided_slice %385 {offsets = [0, 0], sizes = [8, 128], strides = [1, 1]} : vector<8x512xf32> to vector<8x128xf32>
    %387 = arith.negf %386 : vector<8x128xf32>
    %388 = math.exp %387 : vector<8x128xf32>
    %cst_72 = arith.constant 1.000000e+00 : f32
    %389 = vector.broadcast %cst_72 : f32 to vector<8x128xf32>
    %390 = arith.addf %389, %388 : vector<8x128xf32>
    %391 = arith.divf %389, %390 : vector<8x128xf32>
    %392 = vector.extract_strided_slice %385 {offsets = [0, 128], sizes = [8, 128], strides = [1, 1]} : vector<8x512xf32> to vector<8x128xf32>
    %393 = arith.negf %392 : vector<8x128xf32>
    %394 = math.exp %393 : vector<8x128xf32>
    %cst_73 = arith.constant 1.000000e+00 : f32
    %395 = vector.broadcast %cst_73 : f32 to vector<8x128xf32>
    %396 = arith.addf %395, %394 : vector<8x128xf32>
    %397 = arith.divf %395, %396 : vector<8x128xf32>
    %398 = vector.extract_strided_slice %385 {offsets = [0, 256], sizes = [8, 128], strides = [1, 1]} : vector<8x512xf32> to vector<8x128xf32>
    %399 = math.tanh %398 : vector<8x128xf32>
    %400 = vector.extract_strided_slice %385 {offsets = [0, 384], sizes = [8, 128], strides = [1, 1]} : vector<8x512xf32> to vector<8x128xf32>
    %401 = arith.negf %400 : vector<8x128xf32>
    %402 = math.exp %401 : vector<8x128xf32>
    %cst_74 = arith.constant 1.000000e+00 : f32
    %403 = vector.broadcast %cst_74 : f32 to vector<8x128xf32>
    %404 = arith.addf %403, %402 : vector<8x128xf32>
    %405 = arith.divf %403, %404 : vector<8x128xf32>
    %406 = arith.mulf %397, %380 : vector<8x128xf32>
    %407 = arith.mulf %391, %399 : vector<8x128xf32>
    %408 = arith.addf %406, %407 : vector<8x128xf32>
    %409 = math.tanh %408 : vector<8x128xf32>
    %410 = arith.mulf %405, %409 : vector<8x128xf32>
    %411 = vector.extract_strided_slice %240 {offsets = [48, 0], sizes = [8, 512], strides = [1, 1]} : vector<64x512xf32> to vector<8x512xf32>
    %cst_75 = arith.constant dense<0.000000e+00> : vector<8x512xf32>
    %412 = tpu.matmul %410, %236, %cst_75 {dimension_numbers = #tpu.dot_dimension_numbers<[1], [0], [0], [1], [0, 0, 1, 1], [], []>} : vector<8x128xf32>, vector<128x512xf32>, vector<8x512xf32> -> vector<8x512xf32>
    %413 = arith.addf %411, %412 : vector<8x512xf32>
    %414 = vector.extract_strided_slice %413 {offsets = [0, 0], sizes = [8, 128], strides = [1, 1]} : vector<8x512xf32> to vector<8x128xf32>
    %415 = arith.negf %414 : vector<8x128xf32>
    %416 = math.exp %415 : vector<8x128xf32>
    %cst_76 = arith.constant 1.000000e+00 : f32
    %417 = vector.broadcast %cst_76 : f32 to vector<8x128xf32>
    %418 = arith.addf %417, %416 : vector<8x128xf32>
    %419 = arith.divf %417, %418 : vector<8x128xf32>
    %420 = vector.extract_strided_slice %413 {offsets = [0, 128], sizes = [8, 128], strides = [1, 1]} : vector<8x512xf32> to vector<8x128xf32>
    %421 = arith.negf %420 : vector<8x128xf32>
    %422 = math.exp %421 : vector<8x128xf32>
    %cst_77 = arith.constant 1.000000e+00 : f32
    %423 = vector.broadcast %cst_77 : f32 to vector<8x128xf32>
    %424 = arith.addf %423, %422 : vector<8x128xf32>
    %425 = arith.divf %423, %424 : vector<8x128xf32>
    %426 = vector.extract_strided_slice %413 {offsets = [0, 256], sizes = [8, 128], strides = [1, 1]} : vector<8x512xf32> to vector<8x128xf32>
    %427 = math.tanh %426 : vector<8x128xf32>
    %428 = vector.extract_strided_slice %413 {offsets = [0, 384], sizes = [8, 128], strides = [1, 1]} : vector<8x512xf32> to vector<8x128xf32>
    %429 = arith.negf %428 : vector<8x128xf32>
    %430 = math.exp %429 : vector<8x128xf32>
    %cst_78 = arith.constant 1.000000e+00 : f32
    %431 = vector.broadcast %cst_78 : f32 to vector<8x128xf32>
    %432 = arith.addf %431, %430 : vector<8x128xf32>
    %433 = arith.divf %431, %432 : vector<8x128xf32>
    %434 = arith.mulf %425, %408 : vector<8x128xf32>
    %435 = arith.mulf %419, %427 : vector<8x128xf32>
    %436 = arith.addf %434, %435 : vector<8x128xf32>
    %437 = math.tanh %436 : vector<8x128xf32>
    %438 = arith.mulf %433, %437 : vector<8x128xf32>
    %439 = vector.extract_strided_slice %240 {offsets = [56, 0], sizes = [8, 512], strides = [1, 1]} : vector<64x512xf32> to vector<8x512xf32>
    %cst_79 = arith.constant dense<0.000000e+00> : vector<8x512xf32>
    %440 = tpu.matmul %438, %236, %cst_79 {dimension_numbers = #tpu.dot_dimension_numbers<[1], [0], [0], [1], [0, 0, 1, 1], [], []>} : vector<8x128xf32>, vector<128x512xf32>, vector<8x512xf32> -> vector<8x512xf32>
    %441 = arith.addf %439, %440 : vector<8x512xf32>
    %442 = vector.extract_strided_slice %441 {offsets = [0, 0], sizes = [8, 128], strides = [1, 1]} : vector<8x512xf32> to vector<8x128xf32>
    %443 = arith.negf %442 : vector<8x128xf32>
    %444 = math.exp %443 : vector<8x128xf32>
    %cst_80 = arith.constant 1.000000e+00 : f32
    %445 = vector.broadcast %cst_80 : f32 to vector<8x128xf32>
    %446 = arith.addf %445, %444 : vector<8x128xf32>
    %447 = arith.divf %445, %446 : vector<8x128xf32>
    %448 = vector.extract_strided_slice %441 {offsets = [0, 128], sizes = [8, 128], strides = [1, 1]} : vector<8x512xf32> to vector<8x128xf32>
    %449 = arith.negf %448 : vector<8x128xf32>
    %450 = math.exp %449 : vector<8x128xf32>
    %cst_81 = arith.constant 1.000000e+00 : f32
    %451 = vector.broadcast %cst_81 : f32 to vector<8x128xf32>
    %452 = arith.addf %451, %450 : vector<8x128xf32>
    %453 = arith.divf %451, %452 : vector<8x128xf32>
    %454 = vector.extract_strided_slice %441 {offsets = [0, 256], sizes = [8, 128], strides = [1, 1]} : vector<8x512xf32> to vector<8x128xf32>
    %455 = math.tanh %454 : vector<8x128xf32>
    %456 = vector.extract_strided_slice %441 {offsets = [0, 384], sizes = [8, 128], strides = [1, 1]} : vector<8x512xf32> to vector<8x128xf32>
    %457 = arith.negf %456 : vector<8x128xf32>
    %458 = math.exp %457 : vector<8x128xf32>
    %cst_82 = arith.constant 1.000000e+00 : f32
    %459 = vector.broadcast %cst_82 : f32 to vector<8x128xf32>
    %460 = arith.addf %459, %458 : vector<8x128xf32>
    %461 = arith.divf %459, %460 : vector<8x128xf32>
    %462 = arith.mulf %453, %436 : vector<8x128xf32>
    %463 = arith.mulf %447, %455 : vector<8x128xf32>
    %464 = arith.addf %462, %463 : vector<8x128xf32>
    %465 = math.tanh %464 : vector<8x128xf32>
    %466 = arith.mulf %461, %465 : vector<8x128xf32>
    %c0_83 = arith.constant 0 : index
    %c0_84 = arith.constant 0 : index
    %467 = vector.load %arg8[%c0_83, %c0_84] : memref<128x4xf32, #tpu.memory_space<vmem>>, vector<128x4xf32>
    %cst_85 = arith.constant dense<0.000000e+00> : vector<8x4xf32>
    %468 = tpu.matmul %466, %467, %cst_85 {dimension_numbers = #tpu.dot_dimension_numbers<[1], [0], [0], [1], [0, 0, 1, 1], [], []>} : vector<8x128xf32>, vector<128x4xf32>, vector<8x4xf32> -> vector<8x4xf32>
    %c0_86 = arith.constant 0 : index
    %c0_87 = arith.constant 0 : index
    %469 = vector.load %arg9[%c0_86, %c0_87] : memref<1x4xf32, #tpu.memory_space<vmem>>, vector<1x4xf32>
    %470 = vector.broadcast %469 : vector<1x4xf32> to vector<8x4xf32>
    %471 = arith.addf %468, %470 : vector<8x4xf32>
    %c0_88 = arith.constant 0 : index
    %c0_89 = arith.constant 0 : index
    %472 = vector.load %arg10[%c0_88, %c0_89] : memref<8x4xf32, #tpu.memory_space<vmem>>, vector<8x4xf32>
    tpu.vector_store %arg10[%c0_88, %c0_89], %471 {strides = array<i32>} : memref<8x4xf32, #tpu.memory_space<vmem>>, vector<8x4xf32>,
    return
  }
  func.func @transform_0(%arg0: i32) -> (i32, i32, i32) {
    %c0_i32 = arith.constant 0 : i32
    %c0_i32_0 = arith.constant 0 : i32
    %c0_i32_1 = arith.constant 0 : i32
    return %c0_i32, %arg0, %c0_i32_0 : i32, i32, i32
  }
  func.func @transform_1(%arg0: i32) -> (i32, i32) {
    %c0_i32 = arith.constant 0 : i32
    %c0_i32_0 = arith.constant 0 : i32
    %c0_i32_1 = arith.constant 0 : i32
    return %c0_i32, %c0_i32_0 : i32, i32
  }
  func.func @transform_2(%arg0: i32) -> (i32, i32) {
    %c0_i32 = arith.constant 0 : i32
    %c0_i32_0 = arith.constant 0 : i32
    %c0_i32_1 = arith.constant 0 : i32
    return %c0_i32, %c0_i32_0 : i32, i32
  }
  func.func @transform_3(%arg0: i32) -> (i32, i32) {
    %c0_i32 = arith.constant 0 : i32
    %c0_i32_0 = arith.constant 0 : i32
    %c0_i32_1 = arith.constant 0 : i32
    return %c0_i32, %c0_i32_0 : i32, i32
  }
  func.func @transform_4(%arg0: i32) -> (i32, i32) {
    %c0_i32 = arith.constant 0 : i32
    %c0_i32_0 = arith.constant 0 : i32
    %c0_i32_1 = arith.constant 0 : i32
    return %c0_i32, %c0_i32_0 : i32, i32
  }
  func.func @transform_5(%arg0: i32) -> (i32, i32) {
    %c0_i32 = arith.constant 0 : i32
    %c0_i32_0 = arith.constant 0 : i32
    %c0_i32_1 = arith.constant 0 : i32
    return %c0_i32, %c0_i32_0 : i32, i32
  }
  func.func @transform_6(%arg0: i32) -> (i32, i32) {
    %c0_i32 = arith.constant 0 : i32
    %c0_i32_0 = arith.constant 0 : i32
    %c0_i32_1 = arith.constant 0 : i32
    return %c0_i32, %c0_i32_0 : i32, i32
  }
  func.func @transform_7(%arg0: i32) -> (i32, i32) {
    %c0_i32 = arith.constant 0 : i32
    %c0_i32_0 = arith.constant 0 : i32
    %c0_i32_1 = arith.constant 0 : i32
    return %c0_i32, %c0_i32_0 : i32, i32
  }
  func.func @transform_8(%arg0: i32) -> (i32, i32) {
    %c0_i32 = arith.constant 0 : i32
    %c0_i32_0 = arith.constant 0 : i32
    %c0_i32_1 = arith.constant 0 : i32
    return %c0_i32, %c0_i32_0 : i32, i32
  }
  func.func @transform_9(%arg0: i32) -> (i32, i32) {
    %c0_i32 = arith.constant 0 : i32
    %c0_i32_0 = arith.constant 0 : i32
    return %arg0, %c0_i32 : i32, i32
  }
}

</mosaic_0001>

<bundles_post_ra>
// kernel: icu_lstm_forward.1
= control target key start
LH: loop header
LB: loop body
LE: loop exit
PB: predicated region body
PF: predicated region fallthrough
CT: control target
= control target key end

     0   :  { %vm122_vm0 = vcmask 130048   ;;  %s6604_s1 = inlined_call_operand.vmem [shape: f32[16,512], index: 1, kind: input, shape index: {}]   ;;  %s6605_s0 = inlined_call_operand.vmem [shape: f32[8,8,16], index: 0, kind: input, shape index: {}]   ;;  %s6606_s2 = inlined_call_operand.vmem [shape: f32[128,512], index: 2, kind: input, shape index: {}]   ;;  %s6607_s3 = inlined_call_operand.vmem [shape: f32[1,512], index: 3, kind: input, shape index: {}]   ;;  %s6608_s4 = inlined_call_operand.vmem [shape: f32[128,512], index: 4, kind: input, shape index: {}]   ;;  %s6609_s5 = inlined_call_operand.vmem [shape: f32[128,512], index: 5, kind: input, shape index: {}]   ;;  %s6610_s6 = inlined_call_operand.vmem [shape: f32[1,512], index: 6, kind: input, shape index: {}]   ;;  %s6611_s8 = inlined_call_operand.vmem [shape: f32[1,4], index: 8, kind: input, shape index: {}]   ;;  %s6612_s7 = inlined_call_operand.vmem [shape: f32[128,4], index: 7, kind: input, shape index: {}]   ;;  %s6613_s9 = inlined_call_operand.vmem [shape: f32[8,4], index: 9, kind: output, shape index: {}]  }
   0x1   :  { %v44_v0 = vld [vmem:[%s6604_s1 + $0x20] sm:$0xff]  ;;  %v3546_v3 = vld [vmem:[%s6605_s0 + $0x28] sm:$0xff]  ;;  %v3551_v4 = vld [vmem:[%s6605_s0 + $0x30] sm:$0xff] }
   0x2   :  { %v40_v1 = vld [vmem:[%s6604_s1] sm:$0xff]  ;;  %161 = vmatpush.msra.mxu0 %v44_v0  ;;  %3091 = vmatpush.msra.mxu1 %v44_v0  ;;  %v3556_v5 = vld [vmem:[%s6605_s0 + $0x38] sm:$0xff]  ;;  %v45_v6 = vld [vmem:[%s6604_s1 + $0x28] sm:$0xff] }
   0x3   :  { %3092 = vmatpush.msra.mxu2 %v44_v0  ;;  %3093 = vmatpush.msra.mxu3 %v44_v0  ;;  %v32_v2 = vld [vmem:[%s6605_s0] sm:$0xff]  ;;  %v46_v7 = vld [vmem:[%s6604_s1 + $0x30] sm:$0xff]  ;;  %v47_v8 = vld [vmem:[%s6604_s1 + $0x38] sm:$0xff] }
   0x4   :  { %162 = vmatpush.msra.mxu0 %v40_v1  ;;  %3094 = vmatpush.msra.mxu1 %v40_v1  ;;  %v3573_v9 = vld [vmem:[%s6606_s2 + $0x1e0] sm:$0xff]  ;;  %v41_v10 = vld [vmem:[%s6604_s1 + $0x8] sm:$0xff]  ;;  %v42_v11 = vld [vmem:[%s6604_s1 + $0x10] sm:$0xff] }
   0x5   :  { %3095 = vmatpush.msra.mxu2 %v40_v1  ;;  %3096 = vmatpush.msra.mxu3 %v40_v1  ;;  %v43_v12 = vld [vmem:[%s6604_s1 + $0x18] sm:$0xff]  ;;  %v3591_v13 = vld [vmem:[%s6606_s2 + $0x1e8] sm:$0xff]  ;;  %v3597_v14 = vld [vmem:[%s6606_s2 + $0x1c0] sm:$0xff] }
   0x6   :  { %3011 = vmatmul.msk.f32.vlgmr.msra.gmra.mxu0 %vm122_vm0, %v32_v2  ;;  %3016 = vmatmul.msk.f32.vlgmr.msra.gmra.mxu1 %vm122_vm0, %v3546_v3  ;;  %v3602_v15 = vld [vmem:[%s6606_s2 + $0x1f8] sm:$0xff]  ;;  %v3607_v16 = vld [vmem:[%s6606_s2 + $0x1c8] sm:$0xff]  ;;  %v3612_v17 = vld [vmem:[%s6606_s2 + $0x1f0] sm:$0xff] }
   0x7   :  { %3017 = vmatmul.msk.f32.vlgmr.msra.gmra.mxu2 %vm122_vm0, %v3551_v4  ;;  %3018 = vmatmul.msk.f32.vlgmr.msra.gmra.mxu3 %vm122_vm0, %v3556_v5  ;;  %v33_v18 = vld [vmem:[%s6605_s0 + $0x8] sm:$0xff]  ;;  %v3624_v19 = vld [vmem:[%s6606_s2 + $0x1a0] sm:$0xff]  ;;  %v3637_v21 = vld [vmem:[%s6606_s2 + $0x1d8] sm:$0xff] }
   0x8   :  { %202 = vmatpush.msrb.mxu1 %v45_v6  ;;  %243 = vmatpush.msrb.mxu2 %v46_v7  ;;  %v3629_v20 = vld [vmem:[%s6606_s2 + $0x1a8] sm:$0xff]  ;;  %v3642_v22 = vld [vmem:[%s6606_s2 + $0x1d0] sm:$0xff]  ;;  %v3649_v23 = vld [vmem:[%s6606_s2 + $0x180] sm:$0xff] }
   0x9   :  { %284 = vmatpush.msrb.mxu3 %v47_v8  ;;  %311 = vmatpush.msrb.mxu0 %v3573_v9  ;;  %v3654_v24 = vld [vmem:[%s6606_s2 + $0x188] sm:$0xff]  ;;  %v3661_v25 = vld [vmem:[%s6606_s2 + $0x1b8] sm:$0xff]  ;;  %v3666_v26 = vld [vmem:[%s6606_s2 + $0x1b0] sm:$0xff] }
   0xa   :  { %203 = vmatpush.msrb.mxu1 %v41_v10  ;;  %244 = vmatpush.msrb.mxu2 %v42_v11  ;;  %v3671_v27 = vld [vmem:[%s6606_s2 + $0x160] sm:$0xff]  ;;  %v3677_v28 = vld [vmem:[%s6606_s2 + $0x168] sm:$0xff]  ;;  %v3685_v29 = vld [vmem:[%s6606_s2 + $0x198] sm:$0xff] }
   0xb   :  { %285 = vmatpush.msrb.mxu3 %v43_v12  ;;  %312 = vmatpush.msrb.mxu0 %v3597_v14  ;;  %v3690_v30 = vld [vmem:[%s6606_s2 + $0x190] sm:$0xff]  ;;  %v3702_v32 = vld [vmem:[%s6606_s2 + $0x140] sm:$0xff]  ;;  %v3708_v33 = vld [vmem:[%s6606_s2 + $0x148] sm:$0xff] }
   0xc   :  { %331 = vmatpush.msra.mxu1 %v3591_v13  ;;  %351 = vmatpush.msra.mxu2 %v3612_v17  ;;  %v34_v31 = vld [vmem:[%s6605_s0 + $0x10] sm:$0xff]  ;;  %v3716_v34 = vld [vmem:[%s6606_s2 + $0x178] sm:$0xff]  ;;  %v3728_v36 = vld [vmem:[%s6606_s2 + $0x120] sm:$0xff] }
   0xd   :  { %371 = vmatpush.msra.mxu3 %v3602_v15  ;;  %313 = vmatpush.msrb.mxu0 %v3624_v19  ;;  %v3721_v35 = vld [vmem:[%s6606_s2 + $0x170] sm:$0xff]  ;;  %v3733_v37 = vld [vmem:[%s6606_s2 + $0x128] sm:$0xff]  ;;  %v3740_v38 = vld [vmem:[%s6606_s2 + $0x158] sm:$0xff] }
   0xe   :  { %332 = vmatpush.msra.mxu1 %v3607_v16  ;;  %3012 = vmatmul.msk.f32.gmra.mxu0 %vm122_vm0, %v33_v18  ;;  %v3745_v39 = vld [vmem:[%s6606_s2 + $0x150] sm:$0xff]  ;;  %v3750_v40 = vld [vmem:[%s6606_s2 + $0x100] sm:$0xff]  ;;  %v3756_v41 = vld [vmem:[%s6606_s2 + $0x108] sm:$0xff] }
   0xf   :  { %3019 = vmatmul.msk.f32.vlgmr.msrb.gmra.mxu1 %vm122_vm0, %v32_v2  ;;  %3027 = vmatmul.msk.f32.vlgmr.msrb.gmra.mxu2 %vm122_vm0, %v32_v2  ;;  %v3764_v42 = vld [vmem:[%s6606_s2 + $0x138] sm:$0xff]  ;;  %v3769_v43 = vld [vmem:[%s6606_s2 + $0x130] sm:$0xff]  ;;  %v3781_v45 = vld [vmem:[%s6606_s2 + $0xe0] sm:$0xff] }
  0x10   :  { %3035 = vmatmul.msk.f32.vlgmr.msrb.gmra.mxu3 %vm122_vm0, %v32_v2  ;;  %333 = vmatpush.msra.mxu1 %v3629_v20  ;;  %v35_v44 = vld [vmem:[%s6605_s0 + $0x18] sm:$0xff]  ;;  %v3787_v46 = vld [vmem:[%s6606_s2 + $0xe8] sm:$0xff]  ;;  %v3800_v48 = vld [vmem:[%s6606_s2 + $0x110] sm:$0xff] }
  0x11   :  { %372 = vmatpush.msra.mxu3 %v3637_v21  ;;  %352 = vmatpush.msra.mxu2 %v3642_v22  ;;  %v3795_v47 = vld [vmem:[%s6606_s2 + $0x118] sm:$0xff]  ;;  %v3807_v49 = vld [vmem:[%s6606_s2 + $0xc0] sm:$0xff]  ;;  %v3812_v50 = vld [vmem:[%s6606_s2 + $0xc8] sm:$0xff] }
  0x12   :  { %314 = vmatpush.msrb.mxu0 %v3649_v23  ;;  %334 = vmatpush.msra.mxu1 %v3654_v24  ;;  %v3819_v51 = vld [vmem:[%s6606_s2 + $0xf8] sm:$0xff]  ;;  %v3824_v52 = vld [vmem:[%s6606_s2 + $0xf0] sm:$0xff]  ;;  %v3829_v53 = vld [vmem:[%s6606_s2 + $0xa0] sm:$0xff] }
  0x13   :  { %373 = vmatpush.msra.mxu3 %v3661_v25  ;;  %353 = vmatpush.msra.mxu2 %v3666_v26  ;;  %6878 = vst [vmem:[#allocation2_spill] sm:$0xff] %v3829_v53  ;;  %v3835_v54 = vld [vmem:[%s6606_s2 + $0xa8] sm:$0xff]  ;;  %v3843_v55 = vld [vmem:[%s6606_s2 + $0xd8] sm:$0xff]  ;;  %v3848_v56 = vld [vmem:[%s6606_s2 + $0xd0] sm:$0xff] }
  0x14   :  { %315 = vmatpush.msrb.mxu0 %v3671_v27  ;;  %335 = vmatpush.msra.mxu1 %v3677_v28  ;;  %6879 = vst [vmem:[#allocation3_spill] sm:$0xff] %v3835_v54  ;;  %v3853_v57 = vld [vmem:[%s6606_s2 + $0x80] sm:$0xff]  ;;  %v3874_v60 = vld [vmem:[%s6606_s2 + $0x88] sm:$0xff]  ;;  %v3879_v61 = vld [vmem:[%s6606_s2 + $0xb8] sm:$0xff] }
  0x15   :  { %374 = vmatpush.msra.mxu3 %v3685_v29  ;;  %354 = vmatpush.msra.mxu2 %v3690_v30  ;;  %6880 = vst [vmem:[#allocation4_spill] sm:$0xff] %v3843_v55  ;;  %v36_v58 = vld [vmem:[%s6605_s0 + $0x20] sm:$0xff]  ;;  %v3891_v63 = vld [vmem:[%s6606_s2 + $0xb0] sm:$0xff]  ;;  %v3898_v0 = vld [vmem:[%s6606_s2 + $0x68] sm:$0xff] }
  0x16   :  { %3013 = vmatmul.msk.f32.gmra.mxu0 %vm122_vm0, %v34_v31  ;;  %336 = vmatpush.msra.mxu1 %v3708_v33  ;;  %6881 = vst [vmem:[#allocation5_spill] sm:$0xff] %v3853_v57  ;;  %v3865_v59 = vld [vmem:[%s6606_s2 + $0x60] sm:$0xff]  ;;  %v3903_v1 = vld [vmem:[%s6606_s2 + $0x98] sm:$0xff]  ;;  %v3915_v6 = vld [vmem:[%s6606_s2 + $0x90] sm:$0xff] }
  0x17   :  { %3020 = vmatmul.msk.f32.gmra.mxu1 %vm122_vm0, %v33_v18  ;;  %3028 = vmatmul.msk.f32.gmra.mxu2 %vm122_vm0, %v33_v18  ;;  %6882 = vst [vmem:[#allocation6_spill] sm:$0xff] %v3865_v59  ;;  %v3886_v62 = vld [vmem:[%s6606_s2 + $0x40] sm:$0xff]  ;;  %v3921_v7 = vld [vmem:[%s6606_s2 + $0x48] sm:$0xff]  ;;  %v3927_v8 = vld [vmem:[%s6606_s2 + $0x78] sm:$0xff] }
  0x18   :  { %3036 = vmatmul.msk.f32.gmra.mxu3 %vm122_vm0, %v33_v18  ;;  %316 = vmatpush.msrb.mxu0 %v3702_v32  ;;  %6883 = vst [vmem:[#allocation7_spill] sm:$0xff] %v3874_v60  ;;  %v3908_v2 = vld [vmem:[%s6606_s2 + $0x20] sm:$0xff]  ;;  %v3943_v11 = vld [vmem:[%s6606_s2 + $0x28] sm:$0xff]  ;;  %v3950_v12 = vld [vmem:[%s6606_s2 + $0x70] sm:$0xff] }
  0x19   :  { %375 = vmatpush.msra.mxu3 %v3716_v34  ;;  %355 = vmatpush.msra.mxu2 %v3721_v35  ;;  %6884 = vst [vmem:[#allocation8_spill] sm:$0xff] %v3879_v61  ;;  %v3932_v10 = vld [vmem:[%s6606_s2] sm:$0xff]  ;;  %v3955_v18 = vld [vmem:[%s6606_s2 + $0x58] sm:$0xff] }
  0x1a   :  { %317 = vmatpush.msrb.mxu0 %v3728_v36  ;;  %337 = vmatpush.msra.mxu1 %v3733_v37  ;;  %6885 = vst [vmem:[#allocation9_spill] sm:$0xff] %v3886_v62 }
  0x1b   :  { %376 = vmatpush.msra.mxu3 %v3740_v38  ;;  %356 = vmatpush.msra.mxu2 %v3745_v39  ;;  %6886 = vst [vmem:[#allocation10_spill] sm:$0xff] %v3891_v63 }
  0x1c   :  { %318 = vmatpush.msrb.mxu0 %v3750_v40  ;;  %338 = vmatpush.msra.mxu1 %v3756_v41  ;;  %6887 = vst [vmem:[#allocation11_spill] sm:$0xff] %v3898_v0 }
  0x1d   :  { %377 = vmatpush.msra.mxu3 %v3764_v42  ;;  %357 = vmatpush.msra.mxu2 %v3769_v43  ;;  %6888 = vst [vmem:[#allocation12_spill] sm:$0xff] %v3903_v1 }
  0x1e   :  { %3014 = vmatmul.msk.f32.gmra.mxu0 %vm122_vm0, %v35_v44  ;;  %339 = vmatpush.msra.mxu1 %v3787_v46  ;;  %6889 = vst [vmem:[#allocation13_spill] sm:$0xff] %v3908_v2 }
  0x1f   :  { %3021 = vmatmul.msk.f32.gmra.mxu1 %vm122_vm0, %v34_v31  ;;  %3029 = vmatmul.msk.f32.gmra.mxu2 %vm122_vm0, %v34_v31  ;;  %6890 = vst [vmem:[#allocation14_spill] sm:$0xff] %v3915_v6 }
  0x20   :  { %3037 = vmatmul.msk.f32.gmra.mxu3 %vm122_vm0, %v34_v31  ;;  %319 = vmatpush.msrb.mxu0 %v3781_v45  ;;  %6891 = vst [vmem:[#allocation15_spill] sm:$0xff] %v3921_v7  ;;  %v6618_v31 = vmov 0.0  }
  0x21   :  { %378 = vmatpush.msra.mxu3 %v3795_v47  ;;  %358 = vmatpush.msra.mxu2 %v3800_v48  ;;  %6892 = vst [vmem:[#allocation16_spill] sm:$0xff] %v3927_v8 }
  0x22   :  { %320 = vmatpush.msrb.mxu0 %v3807_v49  ;;  %340 = vmatpush.msra.mxu1 %v3812_v50  ;;  %6893 = vst [vmem:[#allocation17_spill] sm:$0xff] %v3932_v10 }
  0x23   :  { %379 = vmatpush.msra.mxu3 %v3819_v51  ;;  %359 = vmatpush.msra.mxu2 %v3824_v52  ;;  %6894 = vst [vmem:[#allocation18_spill] sm:$0xff] %v3943_v11 }
  0x24   :  { %321 = vmatpush.msrb.mxu0 %v3829_v53  ;;  %341 = vmatpush.msra.mxu1 %v3835_v54  ;;  %6895 = vst [vmem:[#allocation19_spill] sm:$0xff] %v3950_v12 }
  0x25   :  { %380 = vmatpush.msra.mxu3 %v3843_v55  ;;  %360 = vmatpush.msra.mxu2 %v3848_v56  ;;  %6896 = vst [vmem:[#allocation20_spill] sm:$0xff] %v3955_v18 }
  0x26   :  { %322 = vmatpush.msrb.mxu0 %v3853_v57  ;;  %342 = vmatpush.msra.mxu1 %v3874_v60 }
  0x27   :  { %3022 = vmatmul.msk.f32.gmra.mxu1 %vm122_vm0, %v35_v44  ;;  %3015 = vmatmul.msk.f32.gmra.mxu0 %vm122_vm0, %v36_v58 }
  0x28   :  { %3030 = vmatmul.msk.f32.gmra.mxu2 %vm122_vm0, %v35_v44  ;;  %3038 = vmatmul.msk.f32.gmra.mxu3 %vm122_vm0, %v35_v44  ;;  %v3962_v44 = vld [vmem:[%s6606_s2 + $0x8] sm:$0xff] }
  0x29   :  { %323 = vmatpush.msrb.mxu0 %v3865_v59  ;;  %381 = vmatpush.msra.mxu3 %v3879_v61  ;;  %6897 = vst [vmem:[#allocation21_spill] sm:$0xff] %v3962_v44 }
  0x2a   :  { %361 = vmatpush.msra.mxu2 %v3891_v63  ;;  %343 = vmatpush.msra.mxu1 %v3898_v0 }
  0x2b   :  { %324 = vmatpush.msrb.mxu0 %v3886_v62  ;;  %382 = vmatpush.msra.mxu3 %v3903_v1 }
  0x2c   :  { %362 = vmatpush.msra.mxu2 %v3915_v6  ;;  %344 = vmatpush.msra.mxu1 %v3921_v7 }
  0x2d   :  { %325 = vmatpush.msrb.mxu0 %v3908_v2  ;;  %383 = vmatpush.msra.mxu3 %v3927_v8  ;;  %v3974_v2 = vld [vmem:[%s6606_s2 + $0x38] sm:$0xff] }
  0x2e   :  { %345 = vmatpush.msra.mxu1 %v3943_v11  ;;  %6899 = vst [vmem:[#allocation23_spill] sm:$0xff] %v3974_v2  ;;  %363 = vmatpush.msra.mxu2 %v3950_v12 }
  0x2f   :  { %326 = vmatpush.msrb.mxu0 %v3932_v10  ;;  %3023 = vmatmul.msk.f32.gmra.mxu1 %vm122_vm0, %v36_v58  ;;  %v3969_v10 = vld [vmem:[%s6606_s2 + $0x50] sm:$0xff] }
  0x30   :  { %3031 = vmatmul.msk.f32.gmra.mxu2 %vm122_vm0, %v36_v58  ;;  %327 = vmatmul.f32.vlgmr.msrb.gmra.mxu0 %v6618_v31  ;;  %6898 = vst [vmem:[#allocation22_spill] sm:$0xff] %v3969_v10  ;;  %v3987_v31 = vld [vmem:[%s6606_s2 + $0x18] sm:$0xff] }
  0x31   :  { %3039 = vmatmul.msk.f32.gmra.mxu3 %vm122_vm0, %v36_v58  ;;  %346 = vmatpush.msra.mxu1 %v3962_v44  ;;  %v3982_v58 = vld [vmem:[%s6606_s2 + $0x30] sm:$0xff]  ;;  %6901 = vst [vmem:[#allocation25_spill] sm:$0xff] %v3987_v31 }
  0x32   :  { %384 = vmatpush.msra.mxu3 %v3955_v18  ;;  %6900 = vst [vmem:[#allocation24_spill] sm:$0xff] %v3982_v58  ;;  %458 = vmatpush.msra.mxu0 %v3573_v9  ;;  %v3998_v44 = vld [vmem:[%s6606_s2 + $0x10] sm:$0xff] }
  0x33   :  { %364 = vmatpush.msra.mxu2 %v3969_v10  ;;  %478 = vmatpush.msrb.mxu1 %v3591_v13  ;;  %6902 = vst [vmem:[#allocation26_spill] sm:$0xff] %v3998_v44 }
  0x34   :  { %385 = vmatpush.msra.mxu3 %v3974_v2  ;;  %459 = vmatpush.msra.mxu0 %v3597_v14 }
  0x35   :  { %365 = vmatpush.msra.mxu2 %v3982_v58  ;;  %479 = vmatpush.msrb.mxu1 %v3607_v16 }
  0x36   :  { %386 = vmatpush.msra.mxu3 %v3987_v31  ;;  %460 = vmatpush.msra.mxu0 %v3624_v19 }
  0x37   :  { %3024 = vmatmul.msk.f32.gmra.mxu1 %vm122_vm0, %v3546_v3  ;;  %366 = vmatpush.msra.mxu2 %v3998_v44 }
  0x38   :  { %518 = vmatpush.msrb.mxu3 %v3602_v15  ;;  %3032 = vmatmul.msk.f32.gmra.mxu2 %vm122_vm0, %v3546_v3 }
  0x39   :  { %3040 = vmatmul.msk.f32.gmra.mxu3 %vm122_vm0, %v3546_v3  ;;  %498 = vmatpush.msrb.mxu2 %v3612_v17  ;;  %v6903_v3 = vmov 0.0  }
  0x3a   :  { %519 = vmatpush.msrb.mxu3 %v3637_v21  ;;  %480 = vmatpush.msrb.mxu1 %v3629_v20 }
  0x3b   :  { %499 = vmatpush.msrb.mxu2 %v3642_v22  ;;  %461 = vmatpush.msra.mxu0 %v3649_v23 }
  0x3c   :  { %520 = vmatpush.msrb.mxu3 %v3661_v25  ;;  %481 = vmatpush.msrb.mxu1 %v3654_v24 }
  0x3d   :  { %500 = vmatpush.msrb.mxu2 %v3666_v26  ;;  %462 = vmatpush.msra.mxu0 %v3671_v27 }
  0x3e   :  { %521 = vmatpush.msrb.mxu3 %v3685_v29  ;;  %482 = vmatpush.msrb.mxu1 %v3677_v28 }
  0x3f   :  { %3025 = vmatmul.msk.f32.gmra.mxu1 %vm122_vm0, %v3551_v4  ;;  %501 = vmatpush.msrb.mxu2 %v3690_v30 }
  0x40   :  { %3033 = vmatmul.msk.f32.gmra.mxu2 %vm122_vm0, %v3551_v4  ;;  %522 = vmatpush.msrb.mxu3 %v3716_v34 }
  0x41   :  { %3041 = vmatmul.msk.f32.gmra.mxu3 %vm122_vm0, %v3551_v4  ;;  %463 = vmatpush.msra.mxu0 %v3702_v32  ;;  %v6904_v4 = vld [vmem:[#allocation13_spill] sm:$0xff] }
  0x42   :  { %502 = vmatpush.msrb.mxu2 %v3721_v35  ;;  %483 = vmatpush.msrb.mxu1 %v3708_v33 }
  0x43   :  { %523 = vmatpush.msrb.mxu3 %v3740_v38  ;;  %464 = vmatpush.msra.mxu0 %v3728_v36 }
  0x44   :  { %503 = vmatpush.msrb.mxu2 %v3745_v39  ;;  %484 = vmatpush.msrb.mxu1 %v3733_v37 }
  0x45   :  { %524 = vmatpush.msrb.mxu3 %v3764_v42  ;;  %465 = vmatpush.msra.mxu0 %v3750_v40 }
  0x46   :  { %504 = vmatpush.msrb.mxu2 %v3769_v43  ;;  %485 = vmatpush.msrb.mxu1 %v3756_v41 }
  0x47   :  { %3026 = vmatmul.msk.f32.gmra.mxu1 %vm122_vm0, %v3556_v5  ;;  %525 = vmatpush.msrb.mxu3 %v3795_v47 }
  0x48   :  { %3034 = vmatmul.msk.f32.gmra.mxu2 %vm122_vm0, %v3556_v5  ;;  %466 = vmatpush.msra.mxu0 %v3781_v45 }
  0x49   :  { %3042 = vmatmul.msk.f32.gmra.mxu3 %vm122_vm0, %v3556_v5  ;;  %505 = vmatpush.msrb.mxu2 %v3800_v48  ;;  %v6905_v5 = vld [vmem:[#allocation17_spill] sm:$0xff] }
  0x4a   :  { %486 = vmatpush.msrb.mxu1 %v3787_v46  ;;  %526 = vmatpush.msrb.mxu3 %v3819_v51 }
  0x4b   :  { %506 = vmatpush.msrb.mxu2 %v3824_v52  ;;  %467 = vmatpush.msra.mxu0 %v3807_v49 }
  0x4c   :  { %487 = vmatpush.msrb.mxu1 %v3812_v50  ;;  %527 = vmatpush.msrb.mxu3 %v3843_v55 }
  0x4d   :  { %507 = vmatpush.msrb.mxu2 %v3848_v56  ;;  %468 = vmatpush.msra.mxu0 %v3829_v53 }
  0x4e   :  { %488 = vmatpush.msrb.mxu1 %v3835_v54  ;;  %528 = vmatpush.msrb.mxu3 %v3879_v61 }
  0x4f   :  { %347 = vmatmul.f32.vlgmr.msra.gmra.mxu1 %v6903_v3  ;;  %508 = vmatpush.msrb.mxu2 %v3891_v63 }
  0x50   :  { %367 = vmatmul.f32.vlgmr.msra.gmra.mxu2 %v6903_v3  ;;  %469 = vmatpush.msra.mxu0 %v3853_v57 }
  0x51   :  { %387 = vmatmul.f32.vlgmr.msra.gmra.mxu3 %v6903_v3  ;;  %489 = vmatpush.msrb.mxu1 %v3874_v60  ;;  %v6906_v3 = vld [vmem:[#allocation21_spill] sm:$0xff] }
  0x52   :  { %509 = vmatpush.msrb.mxu2 %v3915_v6  ;;  %470 = vmatpush.msra.mxu0 %v3865_v59 }
  0x53   :  { %529 = vmatpush.msrb.mxu3 %v3903_v1  ;;  %490 = vmatpush.msrb.mxu1 %v3898_v0 }
  0x54   :  { %510 = vmatpush.msrb.mxu2 %v3950_v12  ;;  %471 = vmatpush.msra.mxu0 %v3886_v62 }
  0x55   :  { %530 = vmatpush.msrb.mxu3 %v3927_v8  ;;  %491 = vmatpush.msrb.mxu1 %v3921_v7 }
  0x56   :  { %511 = vmatpush.msrb.mxu2 %v3969_v10  ;;  %472 = vmatpush.msra.mxu0 %v6904_v4 }
  0x57   :  { %531 = vmatpush.msrb.mxu3 %v3955_v18  ;;  %492 = vmatpush.msrb.mxu1 %v3943_v11 }
  0x58   :  { %512 = vmatpush.msrb.mxu2 %v3982_v58  ;;  %473 = vmatpush.msra.mxu0 %v6905_v5 }
  0x59   :  { %532 = vmatpush.msrb.mxu3 %v3974_v2  ;;  %493 = vmatpush.msrb.mxu1 %v6906_v3 }
  0x5a   :  { %513 = vmatpush.msrb.mxu2 %v3998_v44  ;;  %605 = vmatpush.msrb.mxu0 %v3573_v9 }
  0x5b   :  { %533 = vmatpush.msrb.mxu3 %v3987_v31  ;;  %625 = vmatpush.msra.mxu1 %v3591_v13 }
  0x5c   :  { %645 = vmatpush.msra.mxu2 %v3612_v17  ;;  %606 = vmatpush.msrb.mxu0 %v3597_v14 }
  0x5d   :  { %665 = vmatpush.msra.mxu3 %v3602_v15  ;;  %626 = vmatpush.msra.mxu1 %v3607_v16 }
  0x5e   :  { %646 = vmatpush.msra.mxu2 %v3642_v22  ;;  %607 = vmatpush.msrb.mxu0 %v3624_v19 }
  0x5f   :  { %666 = vmatpush.msra.mxu3 %v3637_v21  ;;  %627 = vmatpush.msra.mxu1 %v3629_v20 }
  0x60   :  { %647 = vmatpush.msra.mxu2 %v3666_v26  ;;  %608 = vmatpush.msrb.mxu0 %v3649_v23 }
  0x61   :  { %667 = vmatpush.msra.mxu3 %v3661_v25  ;;  %628 = vmatpush.msra.mxu1 %v3654_v24 }
  0x62   :  { %648 = vmatpush.msra.mxu2 %v3690_v30  ;;  %609 = vmatpush.msrb.mxu0 %v3671_v27 }
  0x63   :  { %668 = vmatpush.msra.mxu3 %v3685_v29  ;;  %629 = vmatpush.msra.mxu1 %v3677_v28 }
  0x64   :  { %649 = vmatpush.msra.mxu2 %v3721_v35  ;;  %610 = vmatpush.msrb.mxu0 %v3702_v32 }
  0x65   :  { %669 = vmatpush.msra.mxu3 %v3716_v34  ;;  %630 = vmatpush.msra.mxu1 %v3708_v33 }
  0x66   :  { %650 = vmatpush.msra.mxu2 %v3745_v39  ;;  %611 = vmatpush.msrb.mxu0 %v3728_v36 }
  0x67   :  { %670 = vmatpush.msra.mxu3 %v3740_v38  ;;  %631 = vmatpush.msra.mxu1 %v3733_v37 }
  0x68   :  { %651 = vmatpush.msra.mxu2 %v3769_v43  ;;  %612 = vmatpush.msrb.mxu0 %v3750_v40 }
  0x69   :  { %671 = vmatpush.msra.mxu3 %v3764_v42  ;;  %632 = vmatpush.msra.mxu1 %v3756_v41 }
  0x6a   :  { %652 = vmatpush.msra.mxu2 %v3800_v48  ;;  %613 = vmatpush.msrb.mxu0 %v3781_v45 }
  0x6b   :  { %672 = vmatpush.msra.mxu3 %v3795_v47  ;;  %633 = vmatpush.msra.mxu1 %v3787_v46 }
  0x6c   :  { %653 = vmatpush.msra.mxu2 %v3824_v52  ;;  %614 = vmatpush.msrb.mxu0 %v3807_v49 }
  0x6d   :  { %673 = vmatpush.msra.mxu3 %v3819_v51  ;;  %634 = vmatpush.msra.mxu1 %v3812_v50 }
  0x6e   :  { %654 = vmatpush.msra.mxu2 %v3848_v56  ;;  %615 = vmatpush.msrb.mxu0 %v3829_v53 }
  0x6f   :  { %674 = vmatpush.msra.mxu3 %v3843_v55  ;;  %635 = vmatpush.msra.mxu1 %v3835_v54 }
  0x70   :  { %655 = vmatpush.msra.mxu2 %v3891_v63  ;;  %616 = vmatpush.msrb.mxu0 %v3853_v57 }
  0x71   :  { %675 = vmatpush.msra.mxu3 %v3879_v61  ;;  %636 = vmatpush.msra.mxu1 %v3874_v60 }
  0x72   :  { %656 = vmatpush.msra.mxu2 %v3915_v6  ;;  %617 = vmatpush.msrb.mxu0 %v3865_v59 }
  0x73   :  { %676 = vmatpush.msra.mxu3 %v3903_v1  ;;  %637 = vmatpush.msra.mxu1 %v3898_v0 }
  0x74   :  { %657 = vmatpush.msra.mxu2 %v3950_v12  ;;  %618 = vmatpush.msrb.mxu0 %v3886_v62 }
  0x75   :  { %677 = vmatpush.msra.mxu3 %v3927_v8  ;;  %638 = vmatpush.msra.mxu1 %v3921_v7 }
  0x76   :  { %658 = vmatpush.msra.mxu2 %v3969_v10  ;;  %619 = vmatpush.msrb.mxu0 %v6904_v4 }
  0x77   :  { %678 = vmatpush.msra.mxu3 %v3955_v18  ;;  %639 = vmatpush.msra.mxu1 %v3943_v11 }
  0x78   :  { %659 = vmatpush.msra.mxu2 %v3982_v58  ;;  %620 = vmatpush.msrb.mxu0 %v6905_v5 }
  0x79   :  { %679 = vmatpush.msra.mxu3 %v3974_v2  ;;  %640 = vmatpush.msra.mxu1 %v6906_v3 }
  0x7a   :  { %660 = vmatpush.msra.mxu2 %v3998_v44 }
  0x7b   :  { %680 = vmatpush.msra.mxu3 %v3987_v31 }
  0x83   :  { %v164_v7 = vpop.f32.mrf.mxu0  ;;  %v4148_v10 = vpop.f32.mrf.mxu1 }
  0x84   :  { %6907 = vst [vmem:[#allocation27_spill] sm:$0xff] %v4148_v10 }
  0x8a   :  { %v4150_v18 = vpop.f32.mrf.mxu2  ;;  %v4152_v4 = vpop.f32.mrf.mxu3 }
  0x8b   :  { %6908 = vst [vmem:[#allocation28_spill] sm:$0xff] %v4150_v18  ;;  %v4154_v62 = vpop.f32.mrf.mxu0 }
  0x8c   :  { %6909 = vst [vmem:[#allocation29_spill] sm:$0xff] %v4152_v4  ;;  %v205_v11 = vpop.f32.mrf.mxu1 }
  0x8d   :  { %6910 = vst [vmem:[#allocation30_spill] sm:$0xff] %v4154_v62 }
  0x92   :  { %v246_v58 = vpop.f32.mrf.mxu2 }
  0x93   :  { %v287_v2 = vpop.f32.mrf.mxu3  ;;  %v4158_v5 = vpop.f32.mrf.mxu0 }
  0x94   :  { %v4156_v8 = vpop.f32.mrf.mxu1  ;;  %6912 = vst [vmem:[#allocation32_spill] sm:$0xff] %v4158_v5 }
  0x95   :  { %6911 = vst [vmem:[#allocation31_spill] sm:$0xff] %v4156_v8 }
  0x9a   :  { %v4160_v3 = vpop.f32.mrf.mxu2 }
  0x9b   :  { %6913 = vst [vmem:[#allocation33_spill] sm:$0xff] %v4160_v3  ;;  %v4162_v44 = vpop.f32.mrf.mxu3  ;;  %v4166_v10 = vpop.f32.mrf.mxu0 }
  0x9c   :  { %6914 = vst [vmem:[#allocation34_spill] sm:$0xff] %v4162_v44  ;;  %v4164_v31 = vpop.f32.mrf.mxu1 }
  0x9d   :  { %6915 = vst [vmem:[#allocation35_spill] sm:$0xff] %v4164_v31  ;;  %v112_v31 = vld [vmem:[%s6607_s3] sm:$0xf] }
  0x9e   :  { %6916 = vst [vmem:[#allocation36_spill] sm:$0xff] %v4166_v10  ;;  %v4206_v6 = vperm.slane %v112_v31, 1 }
  0xa0   :  { %6934 = vst [vmem:[#allocation54_spill] sm:$0xff] %v4206_v6 }
  0xa2   :  { %v4168_v18 = vpop.f32.mrf.mxu2 }
  0xa3   :  { %6917 = vst [vmem:[#allocation37_spill] sm:$0xff] %v4168_v18  ;;  %v4170_v4 = vpop.f32.mrf.mxu3 }
  0xa4   :  { %6918 = vst [vmem:[#allocation38_spill] sm:$0xff] %v4170_v4  ;;  %v4172_v12 = vpop.f32.mrf.mxu1  ;;  %v4174_v62 = vpop.f32.mrf.mxu0  ;;  %v4191_v4 = vperm.slane %v112_v31, 0 }
  0xa5   :  { %6919 = vst [vmem:[#allocation39_spill] sm:$0xff] %v4172_v12 }
  0xa6   :  { %6920 = vst [vmem:[#allocation40_spill] sm:$0xff] %v4174_v62  ;;  %v165_v62 = vadd.f32 %v164_v7, %v4191_v4 }
  0xa7   :  { %6927 = vst [vmem:[#allocation47_spill] sm:$0xff] %v4191_v4 }
  0xab   :  { %v4176_v0 = vpop.f32.mrf.mxu2  ;;  %v4178_v8 = vpop.f32.mrf.mxu3 }
  0xac   :  { %6921 = vst [vmem:[#allocation41_spill] sm:$0xff] %v4176_v0  ;;  %v4180_v5 = vpop.f32.mrf.mxu1 }
  0xad   :  { %6922 = vst [vmem:[#allocation42_spill] sm:$0xff] %v4178_v8  ;;  %v328_v12 = vpop.f32.mrf.mxu0 }
  0xae   :  { %6923 = vst [vmem:[#allocation43_spill] sm:$0xff] %v4180_v5  ;;  %v391_v0 = vadd.f32 %v328_v12, %v165_v62  ;;  %v206_v62 = vadd.f32 %v205_v11, %v4206_v6 }
  0xb0   :  { %v3043_v59 = vmul.f32 -1.442695, %v391_v0 }
  0xb2   :  { %3099 = vpow2.f32 %v3043_v59 }
  0xb3   :  { %v4185_v3 = vpop.f32.mrf.mxu2 }
  0xb4   :  { %6924 = vst [vmem:[#allocation44_spill] sm:$0xff] %v4185_v3  ;;  %v4187_v10 = vpop.f32.mrf.mxu3  ;;  %v4189_v18 = vpop.f32.mrf.mxu1 }
  0xb5   :  { %6925 = vst [vmem:[#allocation45_spill] sm:$0xff] %v4187_v10 }
  0xb6   :  { %6926 = vst [vmem:[#allocation46_spill] sm:$0xff] %v4189_v18 }
  0xb8   :  { %v3100_v18 = vpop.eup %3099 }
  0xb9   :  { %v398_v60 = vadd.f32 1.0, %v3100_v18  ;;  %v4216_v18 = vperm.slane %v112_v31, 2 }
  0xbb   :  { %v4194_v44 = vpop.f32.mrf.mxu2  ;;  %3101 = vrcp.f32 %v398_v60  ;;  %6938 = vst [vmem:[#allocation58_spill] sm:$0xff] %v4216_v18  ;;  %vm404_vm2 = vweird.f32 %v398_v60 }
  0xbc   :  { %6928 = vst [vmem:[#allocation48_spill] sm:$0xff] %v4194_v44  ;;  %v4196_v8 = vpop.f32.mrf.mxu3  ;;  %v4198_v5 = vpop.f32.mrf.mxu1 }
  0xbd   :  { %6929 = vst [vmem:[#allocation49_spill] sm:$0xff] %v4196_v8 }
  0xbe   :  { %6930 = vst [vmem:[#allocation50_spill] sm:$0xff] %v4198_v5  ;;  %v4211_v5 = vperm.slane %v112_v31, 3 }
  0xc0   :  { %6936 = vst [vmem:[#allocation56_spill] sm:$0xff] %v4211_v5 }
  0xc3   :  { %v4204_v10 = vpop.f32.mrf.mxu2 }
  0xc4   :  { %v4200_v1 = vpop.f32.mrf.mxu3  ;;  %v4202_v3 = vpop.f32.mrf.mxu1  ;;  %6933 = vst [vmem:[#allocation53_spill] sm:$0xff] %v4204_v10 }
  0xc5   :  { %6931 = vst [vmem:[#allocation51_spill] sm:$0xff] %v4200_v1  ;;  %v3102_v10 = vpop.eup %3101 }
  0xc6   :  { %6932 = vst [vmem:[#allocation52_spill] sm:$0xff] %v4202_v3  ;;  %v288_v3 = vadd.f32 %v287_v2, %v4211_v5  ;;  %v400_v11 = vmul.f32 %v3102_v10, %v398_v60  ;;  %vm405_vm1 = vweird.f32 %v3102_v10 }
  0xc7   :  { %vm406_vm4 = vmor %vm404_vm2, %vm405_vm1 }
  0xcb   :  { %v4213_v0 = vpop.f32.mrf.mxu2 }
  0xcc   :  { %v4209_v7 = vpop.f32.mrf.mxu3  ;;  %v348_v12 = vpop.f32.mrf.mxu1  ;;  %6937 = vst [vmem:[#allocation57_spill] sm:$0xff] %v4213_v0 }
  0xcd   :  { %6935 = vst [vmem:[#allocation55_spill] sm:$0xff] %v4209_v7  ;;  %v392_v44 = vadd.f32 %v348_v12, %v206_v62  ;;  %v247_v12 = vadd.f32 %v246_v58, %v4216_v18 }
  0xcf   :  { %v3044_v59 = vmul.f32 -1.442695, %v392_v44  ;;  %v401_v44 = vsub.f32 1.0, %v400_v11 }
  0xd1   :  { %3103 = vpow2.f32 %v3044_v59  ;;  %v402_v59 = vmul.f32 %v3102_v10, %v401_v44 }
  0xd3   :  { %v368_v62 = vpop.f32.mrf.mxu2  ;;  %v403_v31 = vadd.f32 %v3102_v10, %v402_v59 }
  0xd4   :  { %v388_v1 = vpop.f32.mrf.mxu3  ;;  %v393_v57 = vadd.f32 %v368_v62, %v247_v12 }
  0xd5   :  { %v394_v8 = vadd.f32 %v388_v1, %v288_v3  ;;  %v407_v11 = vsel %vm406_vm4, %v3102_v10, %v403_v31 }
  0xd7   :  { %v3104_v4 = vpop.eup %3103  ;;  %v3045_v6 = vmul.f32 -1.442695, %v394_v8  ;;  %v410_v8 = vand.u32 2147483648, %v398_v60 }
  0xd8   :  { %v417_v7 = vadd.f32 1.0, %v3104_v4  ;;  %v408_v4 = vand.u32 2147483647, %v398_v60 }
  0xd9   :  { %3105 = vpow2.f32 %v3045_v6  ;;  %v411_v44 = vor.u32 1.1754944e-38, %v410_v8 }
  0xda   :  { %3107 = vrcp.f32 %v417_v7  ;;  %v429_v3 = vand.u32 2147483648, %v417_v7  ;;  %v427_v63 = vand.u32 2147483647, %v417_v7  ;;  %vm423_vm5 = vweird.f32 %v417_v7 }
  0xdb   :  { %3109 = vtanh.f32 %v393_v57  ;;  %vm409_vm7 = vcmp.eq.f32.partialorder %v408_v4, 8.507059e+37 }
  0xdc   :  { %vm428_vm8 = vcmp.eq.f32.partialorder %v427_v63, 8.507059e+37  ;;  %v412_v59 = vsel %vm409_vm7, %v411_v44, %v407_v11 }
  0xdf   :  { %v3106_v0 = vpop.eup %3105 }
  0xe0   :  { %v3108_v61 = vpop.eup %3107  ;;  %v437_v2 = vadd.f32 1.0, %v3106_v0  ;;  %v430_v0 = vor.u32 1.1754944e-38, %v429_v3 }
  0xe1   :  { %v419_v5 = vmul.f32 %v3108_v61, %v417_v7  ;;  %vm424_vm3 = vweird.f32 %v3108_v61  ;;  %v3110_v58 = vpop.eup %3109 }
  0xe2   :  { %3111 = vrcp.f32 %v437_v2  ;;  %vm425_vm6 = vmor %vm423_vm5, %vm424_vm3  ;;  %v449_v7 = vand.u32 2147483648, %v437_v2  ;;  %vm443_vm10 = vweird.f32 %v437_v2  ;;  %v447_v31 = vand.u32 2147483647, %v437_v2 }
  0xe3   :  { %v420_v1 = vsub.f32 1.0, %v419_v5 }
  0xe4   :  { %vm448_vm12 = vcmp.eq.f32.partialorder %v447_v31, 8.507059e+37 }
  0xe5   :  { %v421_v6 = vmul.f32 %v3108_v61, %v420_v1  ;;  %v454_v1 = vmul.f32 %v3110_v58, %v412_v59 }
  0xe7   :  { %v422_v62 = vadd.f32 %v3108_v61, %v421_v6 }
  0xe8   :  { %v3112_v12 = vpop.eup %3111 }
  0xe9   :  { %v426_v57 = vsel %vm425_vm6, %v3108_v61, %v422_v62  ;;  %v439_v5 = vmul.f32 %v3112_v12, %v437_v2  ;;  %vm444_vm9 = vweird.f32 %v3112_v12  ;;  %v450_v61 = vor.u32 1.1754944e-38, %v449_v7  ;;  %v6970_v2 = vld [vmem:[#allocation34_spill] sm:$0xff] }
  0xea   :  { %v431_v18 = vsel %vm428_vm8, %v430_v0, %v426_v57  ;;  %vm445_vm11 = vmor %vm443_vm10, %vm444_vm9 }
  0xeb   :  { %v453_v54 = vmul.f32 0.0, %v431_v18  ;;  %v440_v60 = vsub.f32 1.0, %v439_v5  ;;  %v6969_v18 = vld [vmem:[#allocation56_spill] sm:$0xff] }
  0xec   :  { %v291_v4 = vadd.f32 %v6970_v2, %v6969_v18 }
  0xed   :  { %v4219_v53 = vadd.f32 %v454_v1, %v453_v54  ;;  %v441_v55 = vmul.f32 %v3112_v12, %v440_v60  ;;  %v6971_v1 = vld [vmem:[#allocation58_spill] sm:$0xff]  ;;  %v6972_v60 = vld [vmem:[#allocation33_spill] sm:$0xff] }
  0xef   :  { %3113 = vtanh.f32 %v4219_v53  ;;  %v442_v10 = vadd.f32 %v3112_v12, %v441_v55 }
  0xf1   :  { %v446_v3 = vsel %vm445_vm11, %v3112_v12, %v442_v10  ;;  %v250_v10 = vadd.f32 %v6972_v60, %v6971_v1 }
  0xf2   :  { %v451_v8 = vsel %vm448_vm12, %v450_v61, %v446_v3 }
  0xf5   :  { %v3114_v63 = vpop.eup %3113 }
  0xf6   :  { %v4222_v6 = vmul.f32 %v3114_v63, %v451_v8 }
  0xf8   :  { %6939 = vst [vmem:[#allocation59_spill] sm:$0xff] %v4222_v6  ;;  %474 = vmatmul.f32.vlgmr.msra.gmra.mxu0 %v4222_v6  ;;  %494 = vmatmul.f32.vlgmr.msrb.gmra.mxu1 %v4222_v6 }
  0xf9   :  { %514 = vmatmul.f32.vlgmr.msrb.gmra.mxu2 %v4222_v6  ;;  %534 = vmatmul.f32.vlgmr.msrb.gmra.mxu3 %v4222_v6  ;;  %v4494_v6 = vld [vmem:[%s6606_s2 + $0x118] sm:$0xff] }
  0xfa   :  { %752 = vmatpush.msra.mxu0 %v3573_v9  ;;  %772 = vmatpush.msrb.mxu1 %v3591_v13  ;;  %v6940_v9 = vld [vmem:[#allocation4_spill] sm:$0xff]  ;;  %v6941_v13 = vld [vmem:[#allocation2_spill] sm:$0xff] }
  0xfb   :  { %792 = vmatpush.msrb.mxu2 %v3612_v17  ;;  %812 = vmatpush.msrb.mxu3 %v3602_v15  ;;  %v6943_v15 = vld [vmem:[#allocation10_spill] sm:$0xff]  ;;  %v6945_v17 = vld [vmem:[#allocation5_spill] sm:$0xff] }
  0xfc   :  { %753 = vmatpush.msra.mxu0 %v3597_v14  ;;  %773 = vmatpush.msrb.mxu1 %v3607_v16  ;;  %v6942_v14 = vld [vmem:[#allocation3_spill] sm:$0xff]  ;;  %v6944_v16 = vld [vmem:[#allocation8_spill] sm:$0xff] }
  0xfd   :  { %793 = vmatpush.msrb.mxu2 %v3642_v22  ;;  %813 = vmatpush.msrb.mxu3 %v3637_v21  ;;  %v6948_v21 = vld [vmem:[#allocation12_spill] sm:$0xff]  ;;  %v6949_v22 = vld [vmem:[#allocation6_spill] sm:$0xff] }
  0xfe   :  { %754 = vmatpush.msra.mxu0 %v3624_v19  ;;  %774 = vmatpush.msrb.mxu1 %v3629_v20  ;;  %v6946_v19 = vld [vmem:[#allocation7_spill] sm:$0xff]  ;;  %v6947_v20 = vld [vmem:[#allocation14_spill] sm:$0xff] }
  0xff   :  { %794 = vmatpush.msrb.mxu2 %v3666_v26  ;;  %814 = vmatpush.msrb.mxu3 %v3661_v25  ;;  %v6952_v25 = vld [vmem:[#allocation16_spill] sm:$0xff]  ;;  %v6953_v26 = vld [vmem:[#allocation9_spill] sm:$0xff] }
 0x100   :  { %755 = vmatpush.msra.mxu0 %v3649_v23  ;;  %775 = vmatpush.msrb.mxu1 %v3654_v24  ;;  %v6950_v23 = vld [vmem:[#allocation11_spill] sm:$0xff] }
 0x101   :  { %795 = vmatpush.msrb.mxu2 %v3690_v30  ;;  %815 = vmatpush.msrb.mxu3 %v3685_v29  ;;  %v6951_v24 = vld [vmem:[#allocation19_spill] sm:$0xff]  ;;  %v6956_v29 = vld [vmem:[#allocation20_spill] sm:$0xff]  ;;  %v6957_v30 = vld [vmem:[#allocation13_spill] sm:$0xff] }
 0x102   :  { %756 = vmatpush.msra.mxu0 %v3671_v27  ;;  %776 = vmatpush.msrb.mxu1 %v3677_v28  ;;  %v6954_v27 = vld [vmem:[#allocation15_spill] sm:$0xff]  ;;  %v6955_v28 = vld [vmem:[#allocation22_spill] sm:$0xff] }
 0x103   :  { %796 = vmatpush.msrb.mxu2 %v3721_v35  ;;  %816 = vmatpush.msrb.mxu3 %v3716_v34  ;;  %v6960_v34 = vld [vmem:[#allocation23_spill] sm:$0xff]  ;;  %v6961_v35 = vld [vmem:[#allocation17_spill] sm:$0xff] }
 0x104   :  { %757 = vmatpush.msra.mxu0 %v3702_v32  ;;  %777 = vmatpush.msrb.mxu1 %v3708_v33  ;;  %v6958_v32 = vld [vmem:[#allocation18_spill] sm:$0xff]  ;;  %v6959_v33 = vld [vmem:[#allocation24_spill] sm:$0xff] }
 0x105   :  { %797 = vmatpush.msrb.mxu2 %v3745_v39  ;;  %817 = vmatpush.msrb.mxu3 %v3740_v38  ;;  %v6964_v38 = vld [vmem:[#allocation25_spill] sm:$0xff]  ;;  %v6965_v39 = vld [vmem:[#allocation47_spill] sm:$0xff] }
 0x106   :  { %758 = vmatpush.msra.mxu0 %v3728_v36  ;;  %778 = vmatpush.msrb.mxu1 %v3733_v37  ;;  %v6962_v36 = vld [vmem:[#allocation21_spill] sm:$0xff]  ;;  %v6963_v37 = vld [vmem:[#allocation26_spill] sm:$0xff] }
 0x107   :  { %798 = vmatpush.msrb.mxu2 %v3769_v43  ;;  %818 = vmatpush.msrb.mxu3 %v3764_v42  ;;  %v6967_v42 = vld [vmem:[#allocation54_spill] sm:$0xff]  ;;  %v6968_v43 = vld [vmem:[#allocation31_spill] sm:$0xff] }
 0x108   :  { %759 = vmatpush.msra.mxu0 %v3750_v40  ;;  %779 = vmatpush.msrb.mxu1 %v3756_v41  ;;  %v6966_v40 = vld [vmem:[#allocation30_spill] sm:$0xff] }
 0x109   :  { %799 = vmatpush.msrb.mxu2 %v3800_v48  ;;  %819 = vmatpush.msrb.mxu3 %v3795_v47  ;;  %v168_v41 = vadd.f32 %v6966_v40, %v6965_v39 }
 0x10a   :  { %760 = vmatpush.msra.mxu0 %v3781_v45  ;;  %780 = vmatpush.msrb.mxu1 %v3787_v46  ;;  %v209_v45 = vadd.f32 %v6968_v43, %v6967_v42 }
 0x10b   :  { %800 = vmatpush.msrb.mxu2 %v3824_v52  ;;  %820 = vmatpush.msrb.mxu3 %v3819_v51 }
 0x10c   :  { %761 = vmatpush.msra.mxu0 %v3807_v49  ;;  %781 = vmatpush.msrb.mxu1 %v3812_v50 }
 0x10d   :  { %801 = vmatpush.msrb.mxu2 %v3848_v56  ;;  %821 = vmatpush.msrb.mxu3 %v6940_v9 }
 0x10e   :  { %762 = vmatpush.msra.mxu0 %v6941_v13  ;;  %782 = vmatpush.msrb.mxu1 %v6942_v14 }
 0x10f   :  { %802 = vmatpush.msrb.mxu2 %v6943_v15  ;;  %822 = vmatpush.msrb.mxu3 %v6944_v16 }
 0x110   :  { %763 = vmatpush.msra.mxu0 %v6945_v17  ;;  %783 = vmatpush.msrb.mxu1 %v6946_v19 }
 0x111   :  { %803 = vmatpush.msrb.mxu2 %v6947_v20  ;;  %823 = vmatpush.msrb.mxu3 %v6948_v21 }
 0x112   :  { %764 = vmatpush.msra.mxu0 %v6949_v22  ;;  %784 = vmatpush.msrb.mxu1 %v6950_v23 }
 0x113   :  { %804 = vmatpush.msrb.mxu2 %v6951_v24  ;;  %824 = vmatpush.msrb.mxu3 %v6952_v25 }
 0x114   :  { %765 = vmatpush.msra.mxu0 %v6953_v26  ;;  %785 = vmatpush.msrb.mxu1 %v6954_v27 }
 0x115   :  { %805 = vmatpush.msrb.mxu2 %v6955_v28  ;;  %825 = vmatpush.msrb.mxu3 %v6956_v29 }
 0x116   :  { %766 = vmatpush.msra.mxu0 %v6957_v30  ;;  %786 = vmatpush.msrb.mxu1 %v6958_v32 }
 0x117   :  { %806 = vmatpush.msrb.mxu2 %v6959_v33  ;;  %826 = vmatpush.msrb.mxu3 %v6960_v34 }
 0x118   :  { %767 = vmatpush.msra.mxu0 %v6961_v35  ;;  %787 = vmatpush.msrb.mxu1 %v6962_v36 }
 0x119   :  { %807 = vmatpush.msrb.mxu2 %v6963_v37  ;;  %827 = vmatpush.msrb.mxu3 %v6964_v38 }
 0x175   :  { %v475_v46 = vpop.f32.mrf.mxu0  ;;  %v495_v47 = vpop.f32.mrf.mxu1 }
 0x176   :  { %v538_v49 = vadd.f32 %v475_v46, %v168_v41  ;;  %v539_v50 = vadd.f32 %v495_v47, %v209_v45 }
 0x178   :  { %v3046_v54 = vmul.f32 -1.442695, %v538_v49  ;;  %v3047_v55 = vmul.f32 -1.442695, %v539_v50 }
 0x17a   :  { %3115 = vpow2.f32 %v3046_v54 }
 0x17b   :  { %3117 = vpow2.f32 %v3047_v55 }
 0x17c   :  { %v535_v58 = vpop.f32.mrf.mxu3  ;;  %v515_v5 = vpop.f32.mrf.mxu2 }
 0x17d   :  { %v541_v11 = vadd.f32 %v535_v58, %v291_v4  ;;  %v540_v3 = vadd.f32 %v515_v5, %v250_v10 }
 0x17f   :  { %v3048_v62 = vmul.f32 -1.442695, %v541_v11 }
 0x180   :  { %v3116_v12 = vpop.eup %3115 }
 0x181   :  { %v3118_v0 = vpop.eup %3117  ;;  %v545_v44 = vadd.f32 1.0, %v3116_v12  ;;  %3119 = vpow2.f32 %v3048_v62 }
 0x182   :  { %v564_v57 = vadd.f32 1.0, %v3118_v0 }
 0x183   :  { %3121 = vrcp.f32 %v545_v44  ;;  %v557_v41 = vand.u32 2147483648, %v545_v44  ;;  %v555_v46 = vand.u32 2147483647, %v545_v44  ;;  %vm551_vm15 = vweird.f32 %v545_v44 }
 0x184   :  { %3123 = vrcp.f32 %v564_v57  ;;  %v576_v43 = vand.u32 2147483648, %v564_v57  ;;  %v574_v49 = vand.u32 2147483647, %v564_v57  ;;  %vm570_vm0 = vweird.f32 %v564_v57 }
 0x185   :  { %v558_v55 = vor.u32 1.1754944e-38, %v557_v41  ;;  %vm556_vm3 = vcmp.eq.f32.partialorder %v555_v46, 8.507059e+37  ;;  %v4337_v46 = vld [vmem:[%s6606_s2 + $0x1c0] sm:$0xff] }
 0x186   :  { %v577_v58 = vor.u32 1.1754944e-38, %v576_v43  ;;  %vm575_vm4 = vcmp.eq.f32.partialorder %v574_v49, 8.507059e+37  ;;  %v4325_v43 = vld [vmem:[%s6606_s2 + $0x1f0] sm:$0xff] }
 0x187   :  { %v3120_v59 = vpop.eup %3119  ;;  %v4349_v49 = vld [vmem:[%s6606_s2 + $0x1d0] sm:$0xff] }
 0x188   :  { %v584_v7 = vadd.f32 1.0, %v3120_v59 }
 0x189   :  { %v3122_v31 = vpop.eup %3121 }
 0x18a   :  { %v3124_v61 = vpop.eup %3123  ;;  %v547_v63 = vmul.f32 %v3122_v31, %v545_v44  ;;  %3125 = vrcp.f32 %v584_v7  ;;  %vm552_vm13 = vweird.f32 %v3122_v31  ;;  %vm590_vm6 = vweird.f32 %v584_v7 }
 0x18b   :  { %v566_v8 = vmul.f32 %v3124_v61, %v564_v57  ;;  %3127 = vtanh.f32 %v540_v3  ;;  %vm571_vm14 = vweird.f32 %v3124_v61  ;;  %vm553_vm1 = vmor %vm551_vm15, %vm552_vm13 }
 0x18c   :  { %v548_v13 = vsub.f32 1.0, %v547_v63  ;;  %vm572_vm2 = vmor %vm570_vm0, %vm571_vm14  ;;  %v596_v63 = vand.u32 2147483648, %v584_v7 }
 0x18d   :  { %v567_v40 = vsub.f32 1.0, %v566_v8 }
 0x18e   :  { %v549_v45 = vmul.f32 %v3122_v31, %v548_v13  ;;  %v597_v13 = vor.u32 1.1754944e-38, %v596_v63  ;;  %v4451_v63 = vld [vmem:[%s6606_s2 + $0x158] sm:$0xff] }
 0x18f   :  { %v568_v47 = vmul.f32 %v3124_v61, %v567_v40 }
 0x190   :  { %v3126_v50 = vpop.eup %3125  ;;  %v550_v54 = vadd.f32 %v3122_v31, %v549_v45  ;;  %v4331_v45 = vld [vmem:[%s6606_s2 + $0x1f8] sm:$0xff] }
 0x191   :  { %v569_v2 = vadd.f32 %v3124_v61, %v568_v47  ;;  %v586_v4 = vmul.f32 %v3126_v50, %v584_v7  ;;  %v3128_v62 = vpop.eup %3127  ;;  %vm591_vm5 = vweird.f32 %v3126_v50  ;;  %v4343_v47 = vld [vmem:[%s6606_s2 + $0x1c8] sm:$0xff] }
 0x192   :  { %v554_v11 = vsel %vm553_vm1, %v3122_v31, %v550_v54  ;;  %v594_v31 = vand.u32 2147483647, %v584_v7  ;;  %vm592_vm7 = vmor %vm590_vm6, %vm591_vm5  ;;  %v4319_v7 = vld [vmem:[%s6606_s2 + $0x1e8] sm:$0xff]  ;;  %v4361_v54 = vld [vmem:[%s6606_s2 + $0x1a0] sm:$0xff] }
 0x193   :  { %v559_v12 = vsel %vm556_vm3, %v558_v55, %v554_v11  ;;  %v573_v0 = vsel %vm572_vm2, %v3124_v61, %v569_v2  ;;  %v587_v5 = vsub.f32 1.0, %v586_v4  ;;  %v4367_v55 = vld [vmem:[%s6606_s2 + $0x1a8] sm:$0xff]  ;;  %v4373_v2 = vld [vmem:[%s6606_s2 + $0x1b0] sm:$0xff]  ;;  %v4379_v4 = vld [vmem:[%s6606_s2 + $0x1b8] sm:$0xff] }
 0x194   :  { %v578_v59 = vsel %vm575_vm4, %v577_v58, %v573_v0  ;;  %v601_v60 = vmul.f32 %v3128_v62, %v559_v12  ;;  %vm595_vm8 = vcmp.eq.f32.partialorder %v594_v31, 8.507059e+37  ;;  %v4385_v58 = vld [vmem:[%s6606_s2 + $0x180] sm:$0xff]  ;;  %v4391_v11 = vld [vmem:[%s6606_s2 + $0x188] sm:$0xff]  ;;  %v4397_v62 = vld [vmem:[%s6606_s2 + $0x190] sm:$0xff] }
 0x195   :  { %v600_v10 = vmul.f32 %v578_v59, %v4219_v53  ;;  %v588_v3 = vmul.f32 %v3126_v50, %v587_v5  ;;  %v4313_v53 = vld [vmem:[%s6606_s2 + $0x1e0] sm:$0xff]  ;;  %v4403_v12 = vld [vmem:[%s6606_s2 + $0x198] sm:$0xff]  ;;  %v4415_v5 = vld [vmem:[%s6606_s2 + $0x168] sm:$0xff] }
 0x196   :  { %v4409_v0 = vld [vmem:[%s6606_s2 + $0x160] sm:$0xff]  ;;  %v4421_v59 = vld [vmem:[%s6606_s2 + $0x170] sm:$0xff] }
 0x197   :  { %v4301_v44 = vadd.f32 %v601_v60, %v600_v10  ;;  %v589_v57 = vadd.f32 %v3126_v50, %v588_v3  ;;  %v4427_v60 = vld [vmem:[%s6606_s2 + $0x178] sm:$0xff]  ;;  %v4433_v10 = vld [vmem:[%s6606_s2 + $0x140] sm:$0xff]  ;;  %v4439_v3 = vld [vmem:[%s6606_s2 + $0x148] sm:$0xff] }
 0x198   :  { %v4457_v31 = vld [vmem:[%s6606_s2 + $0x120] sm:$0xff] }
 0x199   :  { %3129 = vtanh.f32 %v4301_v44  ;;  %v593_v8 = vsel %vm592_vm7, %v3126_v50, %v589_v57  ;;  %v4355_v50 = vld [vmem:[%s6606_s2 + $0x1d8] sm:$0xff]  ;;  %v4445_v57 = vld [vmem:[%s6606_s2 + $0x150] sm:$0xff] }
 0x19a   :  { %v598_v40 = vsel %vm595_vm8, %v597_v13, %v593_v8  ;;  %v4463_v8 = vld [vmem:[%s6606_s2 + $0x128] sm:$0xff]  ;;  %v4469_v13 = vld [vmem:[%s6606_s2 + $0x130] sm:$0xff] }
 0x19f   :  { %v3130_v61 = vpop.eup %3129 }
 0x1a0   :  { %v4304_v41 = vmul.f32 %v3130_v61, %v598_v40  ;;  %v4475_v61 = vld [vmem:[%s6606_s2 + $0x138] sm:$0xff]  ;;  %v4481_v40 = vld [vmem:[%s6606_s2 + $0x100] sm:$0xff] }
 0x1a1   :  { %6974 = vst [vmem:[#allocation2_spill] sm:$0xff] %v4481_v40 }
 0x1a2   :  { %6973 = vst [vmem:[#allocation4_spill] sm:$0xff] %v4304_v41  ;;  %621 = vmatmul.f32.vlgmr.msrb.gmra.mxu0 %v4304_v41  ;;  %641 = vmatmul.f32.vlgmr.msra.gmra.mxu1 %v4304_v41 }
 0x1a3   :  { %661 = vmatmul.f32.vlgmr.msra.gmra.mxu2 %v4304_v41  ;;  %681 = vmatmul.f32.vlgmr.msra.gmra.mxu3 %v4304_v41  ;;  %v4487_v41 = vld [vmem:[%s6606_s2 + $0x108] sm:$0xff] }
 0x1a4   :  { %899 = vmatpush.msrb.mxu0 %v4313_v53  ;;  %919 = vmatpush.msra.mxu1 %v4319_v7  ;;  %6975 = vst [vmem:[#allocation3_spill] sm:$0xff] %v4487_v41 }
 0x1a5   :  { %939 = vmatpush.msra.mxu2 %v4325_v43  ;;  %959 = vmatpush.msra.mxu3 %v4331_v45 }
 0x1a6   :  { %900 = vmatpush.msrb.mxu0 %v4337_v46  ;;  %920 = vmatpush.msra.mxu1 %v4343_v47 }
 0x1a7   :  { %940 = vmatpush.msra.mxu2 %v4349_v49  ;;  %960 = vmatpush.msra.mxu3 %v4355_v50 }
 0x1a8   :  { %901 = vmatpush.msrb.mxu0 %v4361_v54  ;;  %921 = vmatpush.msra.mxu1 %v4367_v55 }
 0x1a9   :  { %941 = vmatpush.msra.mxu2 %v4373_v2  ;;  %961 = vmatpush.msra.mxu3 %v4379_v4 }
 0x1aa   :  { %902 = vmatpush.msrb.mxu0 %v4385_v58  ;;  %922 = vmatpush.msra.mxu1 %v4391_v11 }
 0x1ab   :  { %942 = vmatpush.msra.mxu2 %v4397_v62  ;;  %962 = vmatpush.msra.mxu3 %v4403_v12 }
 0x1ac   :  { %903 = vmatpush.msrb.mxu0 %v4409_v0  ;;  %923 = vmatpush.msra.mxu1 %v4415_v5 }
 0x1ad   :  { %943 = vmatpush.msra.mxu2 %v4421_v59  ;;  %963 = vmatpush.msra.mxu3 %v4427_v60 }
 0x1ae   :  { %904 = vmatpush.msrb.mxu0 %v4433_v10  ;;  %924 = vmatpush.msra.mxu1 %v4439_v3 }
 0x1af   :  { %944 = vmatpush.msra.mxu2 %v4445_v57  ;;  %964 = vmatpush.msra.mxu3 %v4451_v63 }
 0x1b0   :  { %905 = vmatpush.msrb.mxu0 %v4457_v31  ;;  %925 = vmatpush.msra.mxu1 %v4463_v8 }
 0x1b1   :  { %945 = vmatpush.msra.mxu2 %v4469_v13  ;;  %965 = vmatpush.msra.mxu3 %v4475_v61 }
 0x1b2   :  { %906 = vmatpush.msrb.mxu0 %v4481_v40  ;;  %926 = vmatpush.msra.mxu1 %v4487_v41  ;;  %v4500_v40 = vld [vmem:[%s6606_s2 + $0xe0] sm:$0xff]  ;;  %v4506_v41 = vld [vmem:[%s6606_s2 + $0xe8] sm:$0xff] }
 0x1b3   :  { %946 = vmatpush.msra.mxu2 %v3800_v48  ;;  %966 = vmatpush.msra.mxu3 %v4494_v6  ;;  %6976 = vst [vmem:[#allocation10_spill] sm:$0xff] %v4500_v40  ;;  %v4514_v48 = vld [vmem:[%s6606_s2 + $0xc0] sm:$0xff] }
 0x1b4   :  { %907 = vmatpush.msrb.mxu0 %v4500_v40  ;;  %927 = vmatpush.msra.mxu1 %v4506_v41  ;;  %v4520_v40 = vld [vmem:[%s6606_s2 + $0xc8] sm:$0xff] }
 0x1b5   :  { %947 = vmatpush.msra.mxu2 %v3824_v52  ;;  %967 = vmatpush.msra.mxu3 %v3819_v51  ;;  %v4528_v51 = vld [vmem:[%s6606_s2 + $0xa0] sm:$0xff]  ;;  %v6978_v52 = vld [vmem:[#allocation32_spill] sm:$0xff] }
 0x1b6   :  { %908 = vmatpush.msrb.mxu0 %v4514_v48  ;;  %928 = vmatpush.msra.mxu1 %v4520_v40  ;;  %6977 = vst [vmem:[#allocation8_spill] sm:$0xff] %v4528_v51 }
 0x1b7   :  { %948 = vmatpush.msra.mxu2 %v3848_v56  ;;  %968 = vmatpush.msra.mxu3 %v6940_v9  ;;  %v171_v56 = vadd.f32 %v6978_v52, %v6965_v39  ;;  %v6979_v9 = vld [vmem:[#allocation35_spill] sm:$0xff] }
 0x1b8   :  { %909 = vmatpush.msrb.mxu0 %v4528_v51  ;;  %929 = vmatpush.msra.mxu1 %v6942_v14  ;;  %v212_v14 = vadd.f32 %v6979_v9, %v6967_v42 }
 0x1b9   :  { %949 = vmatpush.msra.mxu2 %v6943_v15  ;;  %969 = vmatpush.msra.mxu3 %v6944_v16 }
 0x1ba   :  { %910 = vmatpush.msrb.mxu0 %v6945_v17  ;;  %930 = vmatpush.msra.mxu1 %v6946_v19 }
 0x1bb   :  { %950 = vmatpush.msra.mxu2 %v6947_v20  ;;  %970 = vmatpush.msra.mxu3 %v6948_v21 }
 0x1bc   :  { %911 = vmatpush.msrb.mxu0 %v6949_v22  ;;  %931 = vmatpush.msra.mxu1 %v6950_v23  ;;  %v6980_v22 = vld [vmem:[#allocation38_spill] sm:$0xff] }
 0x1bd   :  { %951 = vmatpush.msra.mxu2 %v6951_v24  ;;  %971 = vmatpush.msra.mxu3 %v6952_v25  ;;  %v294_v23 = vadd.f32 %v6980_v22, %v6969_v18 }
 0x1be   :  { %912 = vmatpush.msrb.mxu0 %v6953_v26  ;;  %932 = vmatpush.msra.mxu1 %v6954_v27 }
 0x1bf   :  { %952 = vmatpush.msra.mxu2 %v6955_v28  ;;  %972 = vmatpush.msra.mxu3 %v6956_v29 }
 0x1c0   :  { %913 = vmatpush.msrb.mxu0 %v6957_v30  ;;  %933 = vmatpush.msra.mxu1 %v6958_v32 }
 0x1c1   :  { %953 = vmatpush.msra.mxu2 %v6959_v33  ;;  %973 = vmatpush.msra.mxu3 %v6960_v34  ;;  %v6981_v34 = vld [vmem:[#allocation37_spill] sm:$0xff] }
 0x1c2   :  { %914 = vmatpush.msrb.mxu0 %v6961_v35  ;;  %934 = vmatpush.msra.mxu1 %v6962_v36  ;;  %v253_v35 = vadd.f32 %v6981_v34, %v6971_v1 }
 0x1c3   :  { %954 = vmatpush.msra.mxu2 %v6963_v37  ;;  %974 = vmatpush.msra.mxu3 %v6964_v38 }
 0x21f   :  { %v622_v15 = vpop.f32.mrf.mxu0  ;;  %v642_v16 = vpop.f32.mrf.mxu1 }
 0x220   :  { %v685_v17 = vadd.f32 %v622_v15, %v171_v56  ;;  %v686_v19 = vadd.f32 %v642_v16, %v212_v14 }
 0x222   :  { %v3049_v20 = vmul.f32 -1.442695, %v685_v17  ;;  %v3050_v21 = vmul.f32 -1.442695, %v686_v19 }
 0x224   :  { %3131 = vpow2.f32 %v3049_v20 }
 0x225   :  { %3133 = vpow2.f32 %v3050_v21 }
 0x226   :  { %v682_v24 = vpop.f32.mrf.mxu3  ;;  %v662_v32 = vpop.f32.mrf.mxu2 }
 0x227   :  { %v688_v25 = vadd.f32 %v682_v24, %v294_v23  ;;  %v687_v38 = vadd.f32 %v662_v32, %v253_v35 }
 0x229   :  { %v3051_v26 = vmul.f32 -1.442695, %v688_v25 }
 0x22a   :  { %v3132_v27 = vpop.eup %3131 }
 0x22b   :  { %v3134_v28 = vpop.eup %3133  ;;  %v692_v29 = vadd.f32 1.0, %v3132_v27  ;;  %3135 = vpow2.f32 %v3051_v26 }
 0x22c   :  { %v711_v30 = vadd.f32 1.0, %v3134_v28 }
 0x22d   :  { %3137 = vrcp.f32 %v692_v29  ;;  %v704_v16 = vand.u32 2147483648, %v692_v29  ;;  %v702_v20 = vand.u32 2147483647, %v692_v29  ;;  %vm698_vm11 = vweird.f32 %v692_v29 }
 0x22e   :  { %3139 = vrcp.f32 %v711_v30  ;;  %v723_v17 = vand.u32 2147483648, %v711_v30  ;;  %v721_v22 = vand.u32 2147483647, %v711_v30  ;;  %vm717_vm12 = vweird.f32 %v711_v30 }
 0x22f   :  { %v705_v25 = vor.u32 1.1754944e-38, %v704_v16  ;;  %vm703_vm15 = vcmp.eq.f32.partialorder %v702_v20, 8.507059e+37 }
 0x230   :  { %v724_v28 = vor.u32 1.1754944e-38, %v723_v17  ;;  %vm722_vm0 = vcmp.eq.f32.partialorder %v721_v22, 8.507059e+37  ;;  %v4605_v22 = vld [vmem:[%s6606_s2 + $0x110] sm:$0xff] }
 0x231   :  { %v3136_v33 = vpop.eup %3135 }
 0x232   :  { %v731_v36 = vadd.f32 1.0, %v3136_v33 }
 0x233   :  { %v3138_v37 = vpop.eup %3137 }
 0x234   :  { %v3140_v52 = vpop.eup %3139  ;;  %v694_v56 = vmul.f32 %v3138_v37, %v692_v29  ;;  %3141 = vrcp.f32 %v731_v36  ;;  %vm699_vm9 = vweird.f32 %v3138_v37  ;;  %v743_v16 = vand.u32 2147483648, %v731_v36 }
 0x235   :  { %v713_v9 = vmul.f32 %v3140_v52, %v711_v30  ;;  %3143 = vtanh.f32 %v687_v38  ;;  %vm718_vm10 = vweird.f32 %v3140_v52  ;;  %vm700_vm13 = vmor %vm698_vm11, %vm699_vm9  ;;  %vm737_vm2 = vweird.f32 %v731_v36 }
 0x236   :  { %v695_v14 = vsub.f32 1.0, %v694_v56  ;;  %vm719_vm14 = vmor %vm717_vm12, %vm718_vm10 }
 0x237   :  { %v714_v15 = vsub.f32 1.0, %v713_v9 }
 0x238   :  { %v696_v19 = vmul.f32 %v3138_v37, %v695_v14 }
 0x239   :  { %v715_v21 = vmul.f32 %v3140_v52, %v714_v15 }
 0x23a   :  { %v3142_v23 = vpop.eup %3141  ;;  %v697_v24 = vadd.f32 %v3138_v37, %v696_v19  ;;  %v744_v19 = vor.u32 1.1754944e-38, %v743_v16  ;;  %v4707_v16 = vld [vmem:[%s6606_s2 + $0x40] sm:$0xff] }
 0x23b   :  { %v716_v26 = vadd.f32 %v3140_v52, %v715_v21  ;;  %v733_v27 = vmul.f32 %v3142_v23, %v731_v36  ;;  %v3144_v33 = vpop.eup %3143  ;;  %vm738_vm1 = vweird.f32 %v3142_v23  ;;  %6999 = vst [vmem:[#allocation24_spill] sm:$0xff] %v4707_v16 }
 0x23c   :  { %v701_v32 = vsel %vm700_vm13, %v3138_v37, %v697_v24  ;;  %v741_v37 = vand.u32 2147483647, %v731_v36  ;;  %vm739_vm3 = vmor %vm737_vm2, %vm738_vm1  ;;  %v6984_v36 = vld [vmem:[#allocation3_spill] sm:$0xff]  ;;  %v4614_v24 = vld [vmem:[%s6606_s2 + $0xf0] sm:$0xff] }
 0x23d   :  { %v706_v34 = vsel %vm703_vm15, %v705_v25, %v701_v32  ;;  %v720_v35 = vsel %vm719_vm14, %v3140_v52, %v716_v26  ;;  %v734_v38 = vsub.f32 1.0, %v733_v27  ;;  %v4620_v25 = vld [vmem:[%s6606_s2 + $0xf8] sm:$0xff]  ;;  %v4628_v26 = vld [vmem:[%s6606_s2 + $0xd0] sm:$0xff] }
 0x23e   :  { %v725_v56 = vsel %vm722_vm0, %v724_v28, %v720_v35  ;;  %v748_v9 = vmul.f32 %v3144_v33, %v706_v34  ;;  %vm742_vm4 = vcmp.eq.f32.partialorder %v741_v37, 8.507059e+37  ;;  %6986 = vst [vmem:[#allocation7_spill] sm:$0xff] %v4628_v26  ;;  %v4634_v27 = vld [vmem:[%s6606_s2 + $0xd8] sm:$0xff]  ;;  %v4641_v28 = vld [vmem:[%s6606_s2 + $0xa8] sm:$0xff]  ;;  %v4647_v32 = vld [vmem:[%s6606_s2 + $0xb0] sm:$0xff] }
 0x23f   :  { %v747_v14 = vmul.f32 %v725_v56, %v4301_v44  ;;  %v735_v15 = vmul.f32 %v3142_v23, %v734_v38  ;;  %v6983_v44 = vld [vmem:[#allocation2_spill] sm:$0xff]  ;;  %6987 = vst [vmem:[#allocation14_spill] sm:$0xff] %v4634_v27  ;;  %v4653_v33 = vld [vmem:[%s6606_s2 + $0xb8] sm:$0xff]  ;;  %v4665_v35 = vld [vmem:[%s6606_s2 + $0x88] sm:$0xff] }
 0x240   :  { %6988 = vst [vmem:[#allocation12_spill] sm:$0xff] %v4641_v28  ;;  %v4659_v34 = vld [vmem:[%s6606_s2 + $0x80] sm:$0xff]  ;;  %v4671_v38 = vld [vmem:[%s6606_s2 + $0x90] sm:$0xff]  ;;  %v4677_v56 = vld [vmem:[%s6606_s2 + $0x98] sm:$0xff] }
 0x241   :  { %v4563_v29 = vadd.f32 %v748_v9, %v747_v14  ;;  %v736_v30 = vadd.f32 %v3142_v23, %v735_v15  ;;  %6989 = vst [vmem:[#allocation6_spill] sm:$0xff] %v4647_v32  ;;  %v4683_v9 = vld [vmem:[%s6606_s2 + $0x60] sm:$0xff]  ;;  %v4689_v14 = vld [vmem:[%s6606_s2 + $0x68] sm:$0xff]  ;;  %v4695_v15 = vld [vmem:[%s6606_s2 + $0x70] sm:$0xff] }
 0x242   :  { %6990 = vst [vmem:[#allocation11_spill] sm:$0xff] %v4653_v33  ;;  %v4713_v37 = vld [vmem:[%s6606_s2 + $0x48] sm:$0xff] }
 0x243   :  { %3145 = vtanh.f32 %v4563_v29  ;;  %v740_v17 = vsel %vm739_vm3, %v3142_v23, %v736_v30  ;;  %v6985_v23 = vld [vmem:[#allocation10_spill] sm:$0xff]  ;;  %6991 = vst [vmem:[#allocation19_spill] sm:$0xff] %v4659_v34  ;;  %v4701_v30 = vld [vmem:[%s6606_s2 + $0x78] sm:$0xff] }
 0x244   :  { %v745_v20 = vsel %vm742_vm4, %v744_v19, %v740_v17  ;;  %6992 = vst [vmem:[#allocation16_spill] sm:$0xff] %v4665_v35  ;;  %v4719_v17 = vld [vmem:[%s6606_s2 + $0x50] sm:$0xff]  ;;  %v4725_v19 = vld [vmem:[%s6606_s2 + $0x58] sm:$0xff] }
 0x245   :  { %6993 = vst [vmem:[#allocation9_spill] sm:$0xff] %v4671_v38 }
 0x246   :  { %6994 = vst [vmem:[#allocation15_spill] sm:$0xff] %v4677_v56 }
 0x247   :  { %6995 = vst [vmem:[#allocation22_spill] sm:$0xff] %v4683_v9 }
 0x248   :  { %6996 = vst [vmem:[#allocation20_spill] sm:$0xff] %v4689_v14 }
 0x249   :  { %v3146_v52 = vpop.eup %3145  ;;  %6997 = vst [vmem:[#allocation13_spill] sm:$0xff] %v4695_v15 }
 0x24a   :  { %v4566_v21 = vmul.f32 %v3146_v52, %v745_v20  ;;  %6998 = vst [vmem:[#allocation18_spill] sm:$0xff] %v4701_v30  ;;  %v4731_v52 = vld [vmem:[%s6606_s2 + $0x20] sm:$0xff]  ;;  %v4737_v20 = vld [vmem:[%s6606_s2 + $0x28] sm:$0xff] }
 0x24b   :  { %7000 = vst [vmem:[#allocation23_spill] sm:$0xff] %v4713_v37 }
 0x24c   :  { %6982 = vst [vmem:[#allocation5_spill] sm:$0xff] %v4566_v21  ;;  %768 = vmatmul.f32.vlgmr.msra.gmra.mxu0 %v4566_v21  ;;  %788 = vmatmul.f32.vlgmr.msrb.gmra.mxu1 %v4566_v21 }
 0x24d   :  { %808 = vmatmul.f32.vlgmr.msrb.gmra.mxu2 %v4566_v21  ;;  %828 = vmatmul.f32.vlgmr.msrb.gmra.mxu3 %v4566_v21  ;;  %7001 = vst [vmem:[#allocation17_spill] sm:$0xff] %v4719_v17  ;;  %v4743_v21 = vld [vmem:[%s6606_s2 + $0x30] sm:$0xff] }
 0x24e   :  { %1046 = vmatpush.msra.mxu0 %v4313_v53  ;;  %1066 = vmatpush.msrb.mxu1 %v4319_v7  ;;  %7002 = vst [vmem:[#allocation21_spill] sm:$0xff] %v4725_v19 }
 0x24f   :  { %1086 = vmatpush.msrb.mxu2 %v4325_v43  ;;  %1106 = vmatpush.msrb.mxu3 %v4331_v45  ;;  %7003 = vst [vmem:[#allocation26_spill] sm:$0xff] %v4731_v52 }
 0x250   :  { %1047 = vmatpush.msra.mxu0 %v4337_v46  ;;  %1067 = vmatpush.msrb.mxu1 %v4343_v47  ;;  %7004 = vst [vmem:[#allocation25_spill] sm:$0xff] %v4737_v20 }
 0x251   :  { %1087 = vmatpush.msrb.mxu2 %v4349_v49  ;;  %1107 = vmatpush.msrb.mxu3 %v4355_v50  ;;  %7005 = vst [vmem:[#allocation30_spill] sm:$0xff] %v4743_v21 }
 0x252   :  { %1048 = vmatpush.msra.mxu0 %v4361_v54  ;;  %1068 = vmatpush.msrb.mxu1 %v4367_v55 }
 0x253   :  { %1088 = vmatpush.msrb.mxu2 %v4373_v2  ;;  %1108 = vmatpush.msrb.mxu3 %v4379_v4 }
 0x254   :  { %1049 = vmatpush.msra.mxu0 %v4385_v58  ;;  %1069 = vmatpush.msrb.mxu1 %v4391_v11 }
 0x255   :  { %1089 = vmatpush.msrb.mxu2 %v4397_v62  ;;  %1109 = vmatpush.msrb.mxu3 %v4403_v12 }
 0x256   :  { %1050 = vmatpush.msra.mxu0 %v4409_v0  ;;  %1070 = vmatpush.msrb.mxu1 %v4415_v5 }
 0x257   :  { %1090 = vmatpush.msrb.mxu2 %v4421_v59  ;;  %1110 = vmatpush.msrb.mxu3 %v4427_v60 }
 0x258   :  { %1051 = vmatpush.msra.mxu0 %v4433_v10  ;;  %1071 = vmatpush.msrb.mxu1 %v4439_v3 }
 0x259   :  { %1091 = vmatpush.msrb.mxu2 %v4445_v57  ;;  %1111 = vmatpush.msrb.mxu3 %v4451_v63 }
 0x25a   :  { %1052 = vmatpush.msra.mxu0 %v4457_v31  ;;  %1072 = vmatpush.msrb.mxu1 %v4463_v8 }
 0x25b   :  { %1092 = vmatpush.msrb.mxu2 %v4469_v13  ;;  %1112 = vmatpush.msrb.mxu3 %v4475_v61 }
 0x25c   :  { %1053 = vmatpush.msra.mxu0 %v6983_v44  ;;  %1073 = vmatpush.msrb.mxu1 %v6984_v36 }
 0x25d   :  { %1093 = vmatpush.msrb.mxu2 %v4605_v22  ;;  %1113 = vmatpush.msrb.mxu3 %v4494_v6 }
 0x25e   :  { %1054 = vmatpush.msra.mxu0 %v6985_v23  ;;  %1074 = vmatpush.msrb.mxu1 %v4506_v41 }
 0x25f   :  { %1094 = vmatpush.msrb.mxu2 %v4614_v24  ;;  %1114 = vmatpush.msrb.mxu3 %v4620_v25 }
 0x260   :  { %1055 = vmatpush.msra.mxu0 %v4514_v48  ;;  %1075 = vmatpush.msrb.mxu1 %v4520_v40 }
 0x261   :  { %1095 = vmatpush.msrb.mxu2 %v4628_v26  ;;  %1115 = vmatpush.msrb.mxu3 %v4634_v27 }
 0x262   :  { %1056 = vmatpush.msra.mxu0 %v4528_v51  ;;  %1076 = vmatpush.msrb.mxu1 %v4641_v28 }
 0x263   :  { %1096 = vmatpush.msrb.mxu2 %v4647_v32  ;;  %1116 = vmatpush.msrb.mxu3 %v4653_v33 }
 0x264   :  { %1057 = vmatpush.msra.mxu0 %v4659_v34  ;;  %1077 = vmatpush.msrb.mxu1 %v4665_v35 }
 0x265   :  { %1097 = vmatpush.msrb.mxu2 %v4671_v38  ;;  %1117 = vmatpush.msrb.mxu3 %v4677_v56 }
 0x266   :  { %1058 = vmatpush.msra.mxu0 %v4683_v9  ;;  %1078 = vmatpush.msrb.mxu1 %v4689_v14 }
 0x267   :  { %1098 = vmatpush.msrb.mxu2 %v4695_v15  ;;  %1118 = vmatpush.msrb.mxu3 %v4701_v30 }
 0x268   :  { %1059 = vmatpush.msra.mxu0 %v4707_v16  ;;  %1079 = vmatpush.msrb.mxu1 %v4713_v37  ;;  %v7012_v37 = vld [vmem:[#allocation39_spill] sm:$0xff] }
 0x269   :  { %1099 = vmatpush.msrb.mxu2 %v4719_v17  ;;  %1119 = vmatpush.msrb.mxu3 %v4725_v19  ;;  %v4749_v19 = vld [vmem:[%s6606_s2 + $0x38] sm:$0xff] }
 0x26a   :  { %1060 = vmatpush.msra.mxu0 %v4731_v52  ;;  %1080 = vmatpush.msrb.mxu1 %v4737_v20  ;;  %7006 = vst [vmem:[#allocation31_spill] sm:$0xff] %v4749_v19  ;;  %v4755_v52 = vld [vmem:[%s6606_s2] sm:$0xff]  ;;  %v4761_v20 = vld [vmem:[%s6606_s2 + $0x8] sm:$0xff] }
 0x26b   :  { %1100 = vmatpush.msrb.mxu2 %v4743_v21  ;;  %1120 = vmatpush.msrb.mxu3 %v4749_v19  ;;  %7007 = vst [vmem:[#allocation34_spill] sm:$0xff] %v4755_v52  ;;  %v4767_v21 = vld [vmem:[%s6606_s2 + $0x10] sm:$0xff]  ;;  %v4773_v19 = vld [vmem:[%s6606_s2 + $0x18] sm:$0xff] }
 0x26c   :  { %1061 = vmatpush.msra.mxu0 %v4755_v52  ;;  %7008 = vst [vmem:[#allocation33_spill] sm:$0xff] %v4761_v20  ;;  %1081 = vmatpush.msrb.mxu1 %v4761_v20  ;;  %v7011_v52 = vld [vmem:[#allocation36_spill] sm:$0xff]  ;;  %v215_v20 = vadd.f32 %v7012_v37, %v6967_v42 }
 0x26d   :  { %7009 = vst [vmem:[#allocation32_spill] sm:$0xff] %v4767_v21  ;;  %1101 = vmatpush.msrb.mxu2 %v4767_v21  ;;  %1121 = vmatpush.msrb.mxu3 %v4773_v19  ;;  %v174_v17 = vadd.f32 %v7011_v52, %v6965_v39  ;;  %v7013_v21 = vld [vmem:[#allocation42_spill] sm:$0xff] }
 0x26e   :  { %7010 = vst [vmem:[#allocation35_spill] sm:$0xff] %v4773_v19  ;;  %v297_v38 = vadd.f32 %v7013_v21, %v6969_v18 }
 0x2c9   :  { %v769_v16 = vpop.f32.mrf.mxu0  ;;  %v789_v30 = vpop.f32.mrf.mxu1 }
 0x2ca   :  { %v832_v15 = vadd.f32 %v769_v16, %v174_v17  ;;  %v833_v14 = vadd.f32 %v789_v30, %v215_v20 }
 0x2cc   :  { %v3052_v9 = vmul.f32 -1.442695, %v832_v15  ;;  %v3053_v56 = vmul.f32 -1.442695, %v833_v14  ;;  %v7014_v15 = vld [vmem:[#allocation41_spill] sm:$0xff] }
 0x2cd   :  { %v256_v14 = vadd.f32 %v7014_v15, %v6971_v1 }
 0x2ce   :  { %3147 = vpow2.f32 %v3052_v9 }
 0x2cf   :  { %3149 = vpow2.f32 %v3053_v56 }
 0x2d0   :  { %v829_v35 = vpop.f32.mrf.mxu3  ;;  %v809_v37 = vpop.f32.mrf.mxu2 }
 0x2d1   :  { %v835_v34 = vadd.f32 %v829_v35, %v297_v38  ;;  %v834_v17 = vadd.f32 %v809_v37, %v256_v14 }
 0x2d3   :  { %v3054_v19 = vmul.f32 -1.442695, %v835_v34 }
 0x2d4   :  { %v3148_v33 = vpop.eup %3147 }
 0x2d5   :  { %v3150_v32 = vpop.eup %3149  ;;  %v839_v52 = vadd.f32 1.0, %v3148_v33  ;;  %3151 = vpow2.f32 %v3054_v19 }
 0x2d6   :  { %v858_v39 = vadd.f32 1.0, %v3150_v32 }
 0x2d7   :  { %3153 = vrcp.f32 %v839_v52  ;;  %v851_v20 = vand.u32 2147483648, %v839_v52  ;;  %v849_v19 = vand.u32 2147483647, %v839_v52  ;;  %vm845_vm7 = vweird.f32 %v839_v52 }
 0x2d8   :  { %3155 = vrcp.f32 %v858_v39  ;;  %v870_v33 = vand.u32 2147483648, %v858_v39  ;;  %v868_v42 = vand.u32 2147483647, %v858_v39  ;;  %vm864_vm8 = vweird.f32 %v858_v39 }
 0x2d9   :  { %v852_v37 = vor.u32 1.1754944e-38, %v851_v20  ;;  %vm850_vm11 = vcmp.eq.f32.partialorder %v849_v19, 8.507059e+37 }
 0x2da   :  { %vm869_vm12 = vcmp.eq.f32.partialorder %v868_v42, 8.507059e+37 }
 0x2db   :  { %v3152_v16 = vpop.eup %3151 }
 0x2dc   :  { %v878_v9 = vadd.f32 1.0, %v3152_v16 }
 0x2dd   :  { %v3154_v30 = vpop.eup %3153 }
 0x2de   :  { %v3156_v21 = vpop.eup %3155  ;;  %v841_v56 = vmul.f32 %v3154_v30, %v839_v52  ;;  %3157 = vrcp.f32 %v878_v9  ;;  %vm846_vm5 = vweird.f32 %v3154_v30  ;;  %vm884_vm14 = vweird.f32 %v878_v9 }
 0x2df   :  { %v860_v35 = vmul.f32 %v3156_v21, %v858_v39  ;;  %3159 = vtanh.f32 %v834_v17  ;;  %vm865_vm6 = vweird.f32 %v3156_v21  ;;  %vm847_vm9 = vmor %vm845_vm7, %vm846_vm5 }
 0x2e0   :  { %v842_v34 = vsub.f32 1.0, %v841_v56  ;;  %vm866_vm10 = vmor %vm864_vm8, %vm865_vm6  ;;  %v871_v56 = vor.u32 1.1754944e-38, %v870_v33 }
 0x2e1   :  { %v861_v38 = vsub.f32 1.0, %v860_v35 }
 0x2e2   :  { %v843_v32 = vmul.f32 %v3154_v30, %v842_v34 }
 0x2e3   :  { %v862_v18 = vmul.f32 %v3156_v21, %v861_v38 }
 0x2e4   :  { %v3158_v28 = vpop.eup %3157  ;;  %v844_v15 = vadd.f32 %v3154_v30, %v843_v32 }
 0x2e5   :  { %v863_v16 = vadd.f32 %v3156_v21, %v862_v18  ;;  %v880_v14 = vmul.f32 %v3158_v28, %v878_v9  ;;  %v3160_v17 = vpop.eup %3159  ;;  %vm885_vm13 = vweird.f32 %v3158_v28  ;;  %v890_v18 = vand.u32 2147483648, %v878_v9 }
 0x2e6   :  { %v848_v35 = vsel %vm847_vm9, %v3154_v30, %v844_v15  ;;  %v888_v30 = vand.u32 2147483647, %v878_v9  ;;  %vm886_vm15 = vmor %vm884_vm14, %vm885_vm13  ;;  %v7022_v9 = vld [vmem:[#allocation19_spill] sm:$0xff]  ;;  %v7023_v15 = vld [vmem:[#allocation16_spill] sm:$0xff] }
 0x2e7   :  { %v853_v1 = vsel %vm850_vm11, %v852_v37, %v848_v35  ;;  %v867_v34 = vsel %vm866_vm10, %v3156_v21, %v863_v16  ;;  %v881_v51 = vsub.f32 1.0, %v880_v14  ;;  %v891_v33 = vor.u32 1.1754944e-38, %v890_v18  ;;  %v7024_v37 = vld [vmem:[#allocation9_spill] sm:$0xff]  ;;  %v7025_v16 = vld [vmem:[#allocation15_spill] sm:$0xff]  ;;  %v7026_v14 = vld [vmem:[#allocation22_spill] sm:$0xff] }
 0x2e8   :  { %v872_v38 = vsel %vm869_vm12, %v871_v56, %v867_v34  ;;  %v895_v27 = vmul.f32 %v3160_v17, %v853_v1  ;;  %vm889_vm0 = vcmp.eq.f32.partialorder %v888_v30, 8.507059e+37  ;;  %v7016_v1 = vld [vmem:[#allocation7_spill] sm:$0xff]  ;;  %v7027_v56 = vld [vmem:[#allocation20_spill] sm:$0xff]  ;;  %v7028_v35 = vld [vmem:[#allocation13_spill] sm:$0xff] }
 0x2e9   :  { %v894_v26 = vmul.f32 %v872_v38, %v4563_v29  ;;  %v882_v32 = vmul.f32 %v3158_v28, %v881_v51  ;;  %v7017_v51 = vld [vmem:[#allocation14_spill] sm:$0xff]  ;;  %v7018_v29 = vld [vmem:[#allocation8_spill] sm:$0xff]  ;;  %v7031_v38 = vld [vmem:[#allocation23_spill] sm:$0xff] }
 0x2ea   :  { %v7029_v17 = vld [vmem:[#allocation18_spill] sm:$0xff]  ;;  %v7030_v34 = vld [vmem:[#allocation24_spill] sm:$0xff]  ;;  %v7035_v30 = vld [vmem:[#allocation25_spill] sm:$0xff] }
 0x2eb   :  { %v4785_v52 = vadd.f32 %v895_v27, %v894_v26  ;;  %v883_v39 = vadd.f32 %v3158_v28, %v882_v32  ;;  %v7019_v26 = vld [vmem:[#allocation12_spill] sm:$0xff]  ;;  %v7020_v27 = vld [vmem:[#allocation6_spill] sm:$0xff]  ;;  %v7032_v32 = vld [vmem:[#allocation17_spill] sm:$0xff] }
 0x2ec   :  { %v7034_v18 = vld [vmem:[#allocation26_spill] sm:$0xff] }
 0x2ed   :  { %3161 = vtanh.f32 %v4785_v52  ;;  %v887_v20 = vsel %vm886_vm15, %v3158_v28, %v883_v39  ;;  %v7021_v28 = vld [vmem:[#allocation11_spill] sm:$0xff]  ;;  %v7033_v39 = vld [vmem:[#allocation21_spill] sm:$0xff] }
 0x2ee   :  { %v892_v21 = vsel %vm889_vm0, %v891_v33, %v887_v20  ;;  %v7036_v20 = vld [vmem:[#allocation30_spill] sm:$0xff]  ;;  %v7037_v33 = vld [vmem:[#allocation31_spill] sm:$0xff] }
 0x2f3   :  { %v3162_v42 = vpop.eup %3161 }
 0x2f4   :  { %v4788_v19 = vmul.f32 %v3162_v42, %v892_v21  ;;  %v7038_v42 = vld [vmem:[#allocation34_spill] sm:$0xff]  ;;  %v7039_v21 = vld [vmem:[#allocation33_spill] sm:$0xff] }
 0x2f6   :  { %7015 = vst [vmem:[#allocation38_spill] sm:$0xff] %v4788_v19  ;;  %915 = vmatmul.f32.vlgmr.msrb.gmra.mxu0 %v4788_v19  ;;  %935 = vmatmul.f32.vlgmr.msra.gmra.mxu1 %v4788_v19 }
 0x2f7   :  { %955 = vmatmul.f32.vlgmr.msra.gmra.mxu2 %v4788_v19  ;;  %975 = vmatmul.f32.vlgmr.msra.gmra.mxu3 %v4788_v19  ;;  %v7040_v19 = vld [vmem:[#allocation32_spill] sm:$0xff] }
 0x2f8   :  { %1193 = vmatpush.msrb.mxu0 %v4313_v53  ;;  %1213 = vmatpush.msra.mxu1 %v4319_v7 }
 0x2f9   :  { %1233 = vmatpush.msra.mxu2 %v4325_v43  ;;  %1253 = vmatpush.msra.mxu3 %v4331_v45 }
 0x2fa   :  { %1194 = vmatpush.msrb.mxu0 %v4337_v46  ;;  %1214 = vmatpush.msra.mxu1 %v4343_v47 }
 0x2fb   :  { %1234 = vmatpush.msra.mxu2 %v4349_v49  ;;  %1254 = vmatpush.msra.mxu3 %v4355_v50 }
 0x2fc   :  { %1195 = vmatpush.msrb.mxu0 %v4361_v54  ;;  %1215 = vmatpush.msra.mxu1 %v4367_v55 }
 0x2fd   :  { %1235 = vmatpush.msra.mxu2 %v4373_v2  ;;  %1255 = vmatpush.msra.mxu3 %v4379_v4 }
 0x2fe   :  { %1196 = vmatpush.msrb.mxu0 %v4385_v58  ;;  %1216 = vmatpush.msra.mxu1 %v4391_v11 }
 0x2ff   :  { %1236 = vmatpush.msra.mxu2 %v4397_v62  ;;  %1256 = vmatpush.msra.mxu3 %v4403_v12 }
 0x300   :  { %1197 = vmatpush.msrb.mxu0 %v4409_v0  ;;  %1217 = vmatpush.msra.mxu1 %v4415_v5 }
 0x301   :  { %1237 = vmatpush.msra.mxu2 %v4421_v59  ;;  %1257 = vmatpush.msra.mxu3 %v4427_v60 }
 0x302   :  { %1198 = vmatpush.msrb.mxu0 %v4433_v10  ;;  %1218 = vmatpush.msra.mxu1 %v4439_v3 }
 0x303   :  { %1238 = vmatpush.msra.mxu2 %v4445_v57  ;;  %1258 = vmatpush.msra.mxu3 %v4451_v63 }
 0x304   :  { %1199 = vmatpush.msrb.mxu0 %v4457_v31  ;;  %1219 = vmatpush.msra.mxu1 %v4463_v8 }
 0x305   :  { %1239 = vmatpush.msra.mxu2 %v4469_v13  ;;  %1259 = vmatpush.msra.mxu3 %v4475_v61 }
 0x306   :  { %1200 = vmatpush.msrb.mxu0 %v6983_v44  ;;  %1220 = vmatpush.msra.mxu1 %v6984_v36 }
 0x307   :  { %1240 = vmatpush.msra.mxu2 %v4605_v22  ;;  %1260 = vmatpush.msra.mxu3 %v4494_v6 }
 0x308   :  { %1201 = vmatpush.msrb.mxu0 %v6985_v23  ;;  %1221 = vmatpush.msra.mxu1 %v4506_v41 }
 0x309   :  { %1241 = vmatpush.msra.mxu2 %v4614_v24  ;;  %1261 = vmatpush.msra.mxu3 %v4620_v25 }
 0x30a   :  { %1202 = vmatpush.msrb.mxu0 %v4514_v48  ;;  %1222 = vmatpush.msra.mxu1 %v4520_v40 }
 0x30b   :  { %1242 = vmatpush.msra.mxu2 %v7016_v1  ;;  %1262 = vmatpush.msra.mxu3 %v7017_v51 }
 0x30c   :  { %1203 = vmatpush.msrb.mxu0 %v7018_v29  ;;  %1223 = vmatpush.msra.mxu1 %v7019_v26 }
 0x30d   :  { %1243 = vmatpush.msra.mxu2 %v7020_v27  ;;  %1263 = vmatpush.msra.mxu3 %v7021_v28 }
 0x30e   :  { %1204 = vmatpush.msrb.mxu0 %v7022_v9  ;;  %1224 = vmatpush.msra.mxu1 %v7023_v15 }
 0x30f   :  { %1244 = vmatpush.msra.mxu2 %v7024_v37  ;;  %1264 = vmatpush.msra.mxu3 %v7025_v16  ;;  %v7047_v37 = vld [vmem:[#allocation45_spill] sm:$0xff] }
 0x310   :  { %1205 = vmatpush.msrb.mxu0 %v7026_v14  ;;  %1225 = vmatpush.msra.mxu1 %v7027_v56 }
 0x311   :  { %1245 = vmatpush.msra.mxu2 %v7028_v35  ;;  %1265 = vmatpush.msra.mxu3 %v7029_v17  ;;  %v7045_v35 = vld [vmem:[#allocation43_spill] sm:$0xff] }
 0x312   :  { %1206 = vmatpush.msrb.mxu0 %v7030_v34  ;;  %1226 = vmatpush.msra.mxu1 %v7031_v38  ;;  %v7041_v34 = vld [vmem:[#allocation35_spill] sm:$0xff] }
 0x313   :  { %1246 = vmatpush.msra.mxu2 %v7032_v32  ;;  %1266 = vmatpush.msra.mxu3 %v7033_v39  ;;  %v7042_v38 = vld [vmem:[#allocation47_spill] sm:$0xff]  ;;  %v7043_v32 = vld [vmem:[#allocation40_spill] sm:$0xff]  ;;  %v7044_v39 = vld [vmem:[#allocation54_spill] sm:$0xff] }
 0x314   :  { %1207 = vmatpush.msrb.mxu0 %v7034_v18  ;;  %1227 = vmatpush.msra.mxu1 %v7035_v30  ;;  %v177_v17 = vadd.f32 %v7043_v32, %v7042_v38  ;;  %v218_v18 = vadd.f32 %v7045_v35, %v7044_v39 }
 0x315   :  { %1247 = vmatpush.msra.mxu2 %v7036_v20  ;;  %1267 = vmatpush.msra.mxu3 %v7037_v33 }
 0x316   :  { %1208 = vmatpush.msrb.mxu0 %v7038_v42  ;;  %1228 = vmatpush.msra.mxu1 %v7039_v21  ;;  %v7046_v42 = vld [vmem:[#allocation56_spill] sm:$0xff] }
 0x317   :  { %1248 = vmatpush.msra.mxu2 %v7040_v19  ;;  %1268 = vmatpush.msra.mxu3 %v7041_v34  ;;  %v300_v21 = vadd.f32 %v7047_v37, %v7046_v42 }
 0x373   :  { %v916_v56 = vpop.f32.mrf.mxu0  ;;  %v936_v30 = vpop.f32.mrf.mxu1 }
 0x374   :  { %v979_v14 = vadd.f32 %v916_v56, %v177_v17  ;;  %v980_v20 = vadd.f32 %v936_v30, %v218_v18  ;;  %v7048_v17 = vld [vmem:[#allocation58_spill] sm:$0xff] }
 0x376   :  { %v3055_v16 = vmul.f32 -1.442695, %v979_v14  ;;  %v3056_v33 = vmul.f32 -1.442695, %v980_v20  ;;  %v7049_v14 = vld [vmem:[#allocation44_spill] sm:$0xff] }
 0x377   :  { %v259_v18 = vadd.f32 %v7049_v14, %v7048_v17 }
 0x378   :  { %3163 = vpow2.f32 %v3055_v16 }
 0x379   :  { %3165 = vpow2.f32 %v3056_v33 }
 0x37a   :  { %v976_v19 = vpop.f32.mrf.mxu3  ;;  %v956_v35 = vpop.f32.mrf.mxu2 }
 0x37b   :  { %v982_v15 = vadd.f32 %v976_v19, %v300_v21  ;;  %v981_v20 = vadd.f32 %v956_v35, %v259_v18 }
 0x37d   :  { %v3057_v34 = vmul.f32 -1.442695, %v982_v15 }
 0x37e   :  { %v3164_v9 = vpop.eup %3163 }
 0x37f   :  { %v3166_v28 = vpop.eup %3165  ;;  %v986_v32 = vadd.f32 1.0, %v3164_v9  ;;  %3167 = vpow2.f32 %v3057_v34 }
 0x380   :  { %v1005_v38 = vadd.f32 1.0, %v3166_v28 }
 0x381   :  { %3169 = vrcp.f32 %v986_v32  ;;  %v998_v42 = vand.u32 2147483648, %v986_v32  ;;  %v996_v34 = vand.u32 2147483647, %v986_v32  ;;  %vm992_vm3 = vweird.f32 %v986_v32 }
 0x382   :  { %3171 = vrcp.f32 %v1005_v38  ;;  %v1017_v9 = vand.u32 2147483648, %v1005_v38  ;;  %v1015_v27 = vand.u32 2147483647, %v1005_v38  ;;  %vm1011_vm4 = vweird.f32 %v1005_v38 }
 0x383   :  { %v999_v35 = vor.u32 1.1754944e-38, %v998_v42  ;;  %vm997_vm7 = vcmp.eq.f32.partialorder %v996_v34, 8.507059e+37 }
 0x384   :  { %vm1016_vm8 = vcmp.eq.f32.partialorder %v1015_v27, 8.507059e+37 }
 0x385   :  { %v3168_v56 = vpop.eup %3167 }
 0x386   :  { %v1025_v16 = vadd.f32 1.0, %v3168_v56 }
 0x387   :  { %v3170_v30 = vpop.eup %3169 }
 0x388   :  { %v3172_v37 = vpop.eup %3171  ;;  %v988_v33 = vmul.f32 %v3170_v30, %v986_v32  ;;  %3173 = vrcp.f32 %v1025_v16  ;;  %vm993_vm1 = vweird.f32 %v3170_v30  ;;  %vm1031_vm10 = vweird.f32 %v1025_v16 }
 0x389   :  { %v1007_v19 = vmul.f32 %v3172_v37, %v1005_v38  ;;  %3175 = vtanh.f32 %v981_v20  ;;  %vm1012_vm2 = vweird.f32 %v3172_v37  ;;  %vm994_vm5 = vmor %vm992_vm3, %vm993_vm1  ;;  %v1035_v42 = vand.u32 2147483647, %v1025_v16 }
 0x38a   :  { %v989_v15 = vsub.f32 1.0, %v988_v33  ;;  %vm1013_vm6 = vmor %vm1011_vm4, %vm1012_vm2  ;;  %v1018_v33 = vor.u32 1.1754944e-38, %v1017_v9 }
 0x38b   :  { %v1008_v21 = vsub.f32 1.0, %v1007_v19  ;;  %vm1036_vm12 = vcmp.eq.f32.partialorder %v1035_v42, 8.507059e+37 }
 0x38c   :  { %v990_v28 = vmul.f32 %v3170_v30, %v989_v15 }
 0x38d   :  { %v1009_v39 = vmul.f32 %v3172_v37, %v1008_v21 }
 0x38e   :  { %v3174_v26 = vpop.eup %3173  ;;  %v991_v14 = vadd.f32 %v3170_v30, %v990_v28 }
 0x38f   :  { %v1010_v56 = vadd.f32 %v3172_v37, %v1009_v39  ;;  %v1027_v18 = vmul.f32 %v3174_v26, %v1025_v16  ;;  %v3176_v20 = vpop.eup %3175  ;;  %vm1032_vm9 = vweird.f32 %v3174_v26  ;;  %v1037_v39 = vand.u32 2147483648, %v1025_v16 }
 0x390   :  { %v995_v19 = vsel %vm994_vm5, %v3170_v30, %v991_v14  ;;  %vm1033_vm11 = vmor %vm1031_vm10, %vm1032_vm9 }
 0x391   :  { %v1000_v17 = vsel %vm997_vm7, %v999_v35, %v995_v19  ;;  %v1014_v15 = vsel %vm1013_vm6, %v3172_v37, %v1010_v56  ;;  %v1028_v29 = vsub.f32 1.0, %v1027_v18  ;;  %v1038_v9 = vor.u32 1.1754944e-38, %v1037_v39  ;;  %v7082_v19 = vld [vmem:[#allocation58_spill] sm:$0xff] }
 0x392   :  { %v1019_v21 = vsel %vm1016_vm8, %v1018_v33, %v1014_v15  ;;  %v1042_v51 = vmul.f32 %v3176_v20, %v1000_v17  ;;  %v7083_v20 = vld [vmem:[#allocation48_spill] sm:$0xff] }
 0x393   :  { %v1041_v1 = vmul.f32 %v1019_v21, %v4785_v52  ;;  %v1029_v28 = vmul.f32 %v3174_v26, %v1028_v29  ;;  %v7080_v52 = vld [vmem:[#allocation56_spill] sm:$0xff]  ;;  %v262_v15 = vadd.f32 %v7083_v20, %v7082_v19 }
 0x394   :  { %v7084_v20 = vld [vmem:[#allocation28_spill] sm:$0xff] }
 0x395   :  { %v4867_v32 = vadd.f32 %v1042_v51, %v1041_v1  ;;  %v1030_v38 = vadd.f32 %v3174_v26, %v1029_v28  ;;  %v7081_v1 = vld [vmem:[#allocation49_spill] sm:$0xff] }
 0x396   :  { %v303_v51 = vadd.f32 %v7081_v1, %v7080_v52  ;;  %v1539_v1 = vld [vmem:[%s6608_s4 + $0x1a0] sm:$0xff] }
 0x397   :  { %3177 = vtanh.f32 %v4867_v32  ;;  %v1034_v30 = vsel %vm1033_vm11, %v3174_v26, %v1030_v38 }
 0x398   :  { %v1039_v37 = vsel %vm1036_vm12, %v1038_v9, %v1034_v30 }
 0x39d   :  { %v3178_v27 = vpop.eup %3177 }
 0x39e   :  { %v4870_v34 = vmul.f32 %v3178_v27, %v1039_v37 }
 0x3a0   :  { %1062 = vmatmul.f32.vlgmr.msra.gmra.mxu0 %v4870_v34  ;;  %1082 = vmatmul.f32.vlgmr.msrb.gmra.mxu1 %v4870_v34 }
 0x3a1   :  { %1102 = vmatmul.f32.vlgmr.msrb.gmra.mxu2 %v4870_v34  ;;  %1122 = vmatmul.f32.vlgmr.msrb.gmra.mxu3 %v4870_v34 }
 0x3a2   :  { %1340 = vmatpush.msra.mxu0 %v4313_v53  ;;  %1360 = vmatpush.msrb.mxu1 %v4319_v7  ;;  %v7050_v53 = vld [vmem:[#allocation7_spill] sm:$0xff]  ;;  %v7051_v7 = vld [vmem:[#allocation14_spill] sm:$0xff] }
 0x3a3   :  { %1380 = vmatpush.msrb.mxu2 %v4325_v43  ;;  %1400 = vmatpush.msrb.mxu3 %v4331_v45  ;;  %v7052_v43 = vld [vmem:[#allocation8_spill] sm:$0xff] }
 0x3a4   :  { %1341 = vmatpush.msra.mxu0 %v4337_v46  ;;  %1361 = vmatpush.msrb.mxu1 %v4343_v47  ;;  %v7053_v45 = vld [vmem:[#allocation12_spill] sm:$0xff]  ;;  %v7055_v46 = vld [vmem:[#allocation11_spill] sm:$0xff] }
 0x3a5   :  { %1381 = vmatpush.msrb.mxu2 %v4349_v49  ;;  %1401 = vmatpush.msrb.mxu3 %v4355_v50  ;;  %v7057_v47 = vld [vmem:[#allocation16_spill] sm:$0xff]  ;;  %v7058_v49 = vld [vmem:[#allocation9_spill] sm:$0xff]  ;;  %v7059_v50 = vld [vmem:[#allocation15_spill] sm:$0xff] }
 0x3a6   :  { %1342 = vmatpush.msra.mxu0 %v4361_v54  ;;  %1362 = vmatpush.msrb.mxu1 %v4367_v55  ;;  %v7060_v54 = vld [vmem:[#allocation22_spill] sm:$0xff]  ;;  %v7061_v55 = vld [vmem:[#allocation20_spill] sm:$0xff] }
 0x3a7   :  { %1382 = vmatpush.msrb.mxu2 %v4373_v2  ;;  %1402 = vmatpush.msrb.mxu3 %v4379_v4  ;;  %v7062_v2 = vld [vmem:[#allocation13_spill] sm:$0xff]  ;;  %v7063_v4 = vld [vmem:[#allocation18_spill] sm:$0xff] }
 0x3a8   :  { %1343 = vmatpush.msra.mxu0 %v4385_v58  ;;  %1363 = vmatpush.msrb.mxu1 %v4391_v11  ;;  %v7064_v58 = vld [vmem:[#allocation24_spill] sm:$0xff]  ;;  %v7065_v11 = vld [vmem:[#allocation23_spill] sm:$0xff] }
 0x3a9   :  { %1383 = vmatpush.msrb.mxu2 %v4397_v62  ;;  %1403 = vmatpush.msrb.mxu3 %v4403_v12  ;;  %v7066_v62 = vld [vmem:[#allocation17_spill] sm:$0xff] }
 0x3aa   :  { %1344 = vmatpush.msra.mxu0 %v4409_v0  ;;  %1364 = vmatpush.msrb.mxu1 %v4415_v5  ;;  %v7067_v12 = vld [vmem:[#allocation21_spill] sm:$0xff]  ;;  %v7068_v0 = vld [vmem:[#allocation26_spill] sm:$0xff] }
 0x3ab   :  { %1384 = vmatpush.msrb.mxu2 %v4421_v59  ;;  %1404 = vmatpush.msrb.mxu3 %v4427_v60  ;;  %v7069_v5 = vld [vmem:[#allocation25_spill] sm:$0xff]  ;;  %v7070_v59 = vld [vmem:[#allocation30_spill] sm:$0xff]  ;;  %v7071_v60 = vld [vmem:[#allocation31_spill] sm:$0xff] }
 0x3ac   :  { %1345 = vmatpush.msra.mxu0 %v4433_v10  ;;  %1365 = vmatpush.msrb.mxu1 %v4439_v3  ;;  %v7072_v10 = vld [vmem:[#allocation34_spill] sm:$0xff]  ;;  %v7073_v3 = vld [vmem:[#allocation33_spill] sm:$0xff] }
 0x3ad   :  { %1385 = vmatpush.msrb.mxu2 %v4445_v57  ;;  %1405 = vmatpush.msrb.mxu3 %v4451_v63  ;;  %v7074_v57 = vld [vmem:[#allocation32_spill] sm:$0xff]  ;;  %v7075_v63 = vld [vmem:[#allocation35_spill] sm:$0xff] }
 0x3ae   :  { %1346 = vmatpush.msra.mxu0 %v4457_v31  ;;  %1366 = vmatpush.msrb.mxu1 %v4463_v8  ;;  %v7076_v31 = vld [vmem:[#allocation47_spill] sm:$0xff] }
 0x3af   :  { %1386 = vmatpush.msrb.mxu2 %v4469_v13  ;;  %1406 = vmatpush.msrb.mxu3 %v4475_v61  ;;  %v7077_v8 = vld [vmem:[#allocation27_spill] sm:$0xff]  ;;  %v7078_v61 = vld [vmem:[#allocation54_spill] sm:$0xff] }
 0x3b0   :  { %1347 = vmatpush.msra.mxu0 %v6983_v44  ;;  %1367 = vmatpush.msrb.mxu1 %v6984_v36  ;;  %v180_v13 = vadd.f32 %v7077_v8, %v7076_v31 }
 0x3b1   :  { %1387 = vmatpush.msrb.mxu2 %v4605_v22  ;;  %1407 = vmatpush.msrb.mxu3 %v4494_v6  ;;  %v7054_v6 = vld [vmem:[#allocation6_spill] sm:$0xff] }
 0x3b2   :  { %1348 = vmatpush.msra.mxu0 %v6985_v23  ;;  %1368 = vmatpush.msrb.mxu1 %v4506_v41  ;;  %v7056_v41 = vld [vmem:[#allocation19_spill] sm:$0xff] }
 0x3b3   :  { %1388 = vmatpush.msrb.mxu2 %v4614_v24  ;;  %1408 = vmatpush.msrb.mxu3 %v4620_v25 }
 0x3b4   :  { %1349 = vmatpush.msra.mxu0 %v4514_v48  ;;  %1369 = vmatpush.msrb.mxu1 %v4520_v40  ;;  %v7079_v40 = vld [vmem:[#allocation46_spill] sm:$0xff] }
 0x3b5   :  { %1389 = vmatpush.msrb.mxu2 %v7050_v53  ;;  %1409 = vmatpush.msrb.mxu3 %v7051_v7  ;;  %v221_v48 = vadd.f32 %v7079_v40, %v7078_v61 }
 0x3b6   :  { %1350 = vmatpush.msra.mxu0 %v7052_v43  ;;  %1370 = vmatpush.msrb.mxu1 %v7053_v45 }
 0x3b7   :  { %1390 = vmatpush.msrb.mxu2 %v7054_v6  ;;  %1410 = vmatpush.msrb.mxu3 %v7055_v46 }
 0x3b8   :  { %1351 = vmatpush.msra.mxu0 %v7056_v41  ;;  %1371 = vmatpush.msrb.mxu1 %v7057_v47 }
 0x3b9   :  { %1391 = vmatpush.msrb.mxu2 %v7058_v49  ;;  %1411 = vmatpush.msrb.mxu3 %v7059_v50 }
 0x3ba   :  { %1352 = vmatpush.msra.mxu0 %v7060_v54  ;;  %1372 = vmatpush.msrb.mxu1 %v7061_v55 }
 0x3bb   :  { %1392 = vmatpush.msrb.mxu2 %v7062_v2  ;;  %1412 = vmatpush.msrb.mxu3 %v7063_v4 }
 0x3bc   :  { %1353 = vmatpush.msra.mxu0 %v7064_v58  ;;  %1373 = vmatpush.msrb.mxu1 %v7065_v11 }
 0x3bd   :  { %1393 = vmatpush.msrb.mxu2 %v7066_v62  ;;  %1413 = vmatpush.msrb.mxu3 %v7067_v12 }
 0x3be   :  { %1354 = vmatpush.msra.mxu0 %v7068_v0  ;;  %1374 = vmatpush.msrb.mxu1 %v7069_v5 }
 0x3bf   :  { %1394 = vmatpush.msrb.mxu2 %v7070_v59  ;;  %1414 = vmatpush.msrb.mxu3 %v7071_v60 }
 0x3c0   :  { %1355 = vmatpush.msra.mxu0 %v7072_v10  ;;  %1375 = vmatpush.msrb.mxu1 %v7073_v3 }
 0x3c1   :  { %1395 = vmatpush.msrb.mxu2 %v7074_v57  ;;  %1415 = vmatpush.msrb.mxu3 %v7075_v63 }
 0x41d   :  { %v1063_v44 = vpop.f32.mrf.mxu0  ;;  %v1083_v36 = vpop.f32.mrf.mxu1 }
 0x41e   :  { %v1126_v22 = vadd.f32 %v1063_v44, %v180_v13  ;;  %v1127_v23 = vadd.f32 %v1083_v36, %v221_v48  ;;  %v1548_v48 = vld [vmem:[%s6608_s4 + $0x1e8] sm:$0xff]  ;;  %v1549_v44 = vld [vmem:[%s6608_s4 + $0x1f0] sm:$0xff]  ;;  %v1550_v36 = vld [vmem:[%s6608_s4 + $0x1f8] sm:$0xff] }
 0x420   :  { %v3058_v24 = vmul.f32 -1.442695, %v1126_v22  ;;  %v3059_v25 = vmul.f32 -1.442695, %v1127_v23  ;;  %v1543_v22 = vld [vmem:[%s6608_s4 + $0x1c0] sm:$0xff]  ;;  %v1544_v23 = vld [vmem:[%s6608_s4 + $0x1c8] sm:$0xff] }
 0x422   :  { %3179 = vpow2.f32 %v3058_v24  ;;  %v1545_v24 = vld [vmem:[%s6608_s4 + $0x1d0] sm:$0xff] }
 0x423   :  { %3181 = vpow2.f32 %v3059_v25  ;;  %v1546_v25 = vld [vmem:[%s6608_s4 + $0x1d8] sm:$0xff] }
 0x424   :  { %v1123_v29 = vpop.f32.mrf.mxu3  ;;  %v1103_v18 = vpop.f32.mrf.mxu2 }
 0x425   :  { %v1129_v26 = vadd.f32 %v1123_v29, %v303_v51  ;;  %v1128_v38 = vadd.f32 %v1103_v18, %v262_v15  ;;  %v1540_v51 = vld [vmem:[%s6608_s4 + $0x1a8] sm:$0xff]  ;;  %v1541_v29 = vld [vmem:[%s6608_s4 + $0x1b0] sm:$0xff]  ;;  %v183_v15 = vadd.f32 %v7084_v20, %v7076_v31 }
 0x426   :  { %v1532_v18 = vld [vmem:[%s6608_s4 + $0x168] sm:$0xff] }
 0x427   :  { %v3060_v17 = vmul.f32 -1.442695, %v1129_v26  ;;  %v1542_v26 = vld [vmem:[%s6608_s4 + $0x1b8] sm:$0xff] }
 0x428   :  { %v3180_v16 = vpop.eup %3179 }
 0x429   :  { %v3182_v14 = vpop.eup %3181  ;;  %v1133_v35 = vadd.f32 1.0, %v3180_v16  ;;  %3183 = vpow2.f32 %v3060_v17  ;;  %v1535_v17 = vld [vmem:[%s6608_s4 + $0x180] sm:$0xff]  ;;  %v1536_v16 = vld [vmem:[%s6608_s4 + $0x188] sm:$0xff] }
 0x42a   :  { %v1152_v56 = vadd.f32 1.0, %v3182_v14  ;;  %v1537_v14 = vld [vmem:[%s6608_s4 + $0x190] sm:$0xff] }
 0x42b   :  { %3185 = vrcp.f32 %v1133_v35  ;;  %v1145_v37 = vand.u32 2147483648, %v1133_v35  ;;  %v1143_v43 = vand.u32 2147483647, %v1133_v35  ;;  %vm1139_vm15 = vweird.f32 %v1133_v35 }
 0x42c   :  { %3187 = vrcp.f32 %v1152_v56  ;;  %v1164_v53 = vand.u32 2147483648, %v1152_v56  ;;  %v1162_v6 = vand.u32 2147483647, %v1152_v56  ;;  %vm1158_vm0 = vweird.f32 %v1152_v56 }
 0x42d   :  { %v1146_v47 = vor.u32 1.1754944e-38, %v1145_v37  ;;  %vm1144_vm3 = vcmp.eq.f32.partialorder %v1143_v43, 8.507059e+37  ;;  %v1523_v43 = vld [vmem:[%s6608_s4 + $0x120] sm:$0xff] }
 0x42e   :  { %v1165_v54 = vor.u32 1.1754944e-38, %v1164_v53  ;;  %vm1163_vm4 = vcmp.eq.f32.partialorder %v1162_v6, 8.507059e+37  ;;  %v1525_v6 = vld [vmem:[%s6608_s4 + $0x130] sm:$0xff] }
 0x42f   :  { %v3184_v33 = vpop.eup %3183 }
 0x430   :  { %v1172_v21 = vadd.f32 1.0, %v3184_v33  ;;  %v1533_v33 = vld [vmem:[%s6608_s4 + $0x170] sm:$0xff] }
 0x431   :  { %v3186_v28 = vpop.eup %3185 }
 0x432   :  { %v3188_v39 = vpop.eup %3187  ;;  %v1135_v42 = vmul.f32 %v3186_v28, %v1133_v35  ;;  %3189 = vrcp.f32 %v1172_v21  ;;  %vm1140_vm13 = vweird.f32 %v3186_v28  ;;  %v1184_v10 = vand.u32 2147483648, %v1172_v21  ;;  %v1538_v35 = vld [vmem:[%s6608_s4 + $0x198] sm:$0xff] }
 0x433   :  { %v1154_v30 = vmul.f32 %v3188_v39, %v1152_v56  ;;  %3191 = vtanh.f32 %v1128_v38  ;;  %vm1159_vm14 = vweird.f32 %v3188_v39  ;;  %vm1141_vm1 = vmor %vm1139_vm15, %vm1140_vm13  ;;  %vm1178_vm6 = vweird.f32 %v1172_v21  ;;  %v1531_v56 = vld [vmem:[%s6608_s4 + $0x160] sm:$0xff]  ;;  %v1534_v38 = vld [vmem:[%s6608_s4 + $0x178] sm:$0xff] }
 0x434   :  { %v1136_v9 = vsub.f32 1.0, %v1135_v42  ;;  %vm1160_vm2 = vmor %vm1158_vm0, %vm1159_vm14  ;;  %v1182_v3 = vand.u32 2147483647, %v1172_v21  ;;  %v1185_v63 = vor.u32 1.1754944e-38, %v1184_v10  ;;  %v1512_v10 = vld [vmem:[%s6608_s4 + $0xc8] sm:$0xff] }
 0x435   :  { %v1155_v27 = vsub.f32 1.0, %v1154_v30  ;;  %v1527_v30 = vld [vmem:[%s6608_s4 + $0x140] sm:$0xff] }
 0x436   :  { %v1137_v7 = vmul.f32 %v3186_v28, %v1136_v9  ;;  %vm1183_vm8 = vcmp.eq.f32.partialorder %v1182_v3, 8.507059e+37  ;;  %v1528_v9 = vld [vmem:[%s6608_s4 + $0x148] sm:$0xff]  ;;  %v1513_v3 = vld [vmem:[%s6608_s4 + $0xd0] sm:$0xff] }
 0x437   :  { %v1156_v45 = vmul.f32 %v3188_v39, %v1155_v27  ;;  %v1529_v27 = vld [vmem:[%s6608_s4 + $0x150] sm:$0xff] }
 0x438   :  { %v3190_v46 = vpop.eup %3189  ;;  %v1138_v41 = vadd.f32 %v3186_v28, %v1137_v7  ;;  %v1530_v7 = vld [vmem:[%s6608_s4 + $0x158] sm:$0xff] }
 0x439   :  { %v1157_v49 = vadd.f32 %v3188_v39, %v1156_v45  ;;  %v1174_v50 = vmul.f32 %v3190_v46, %v1172_v21  ;;  %v3192_v2 = vpop.eup %3191  ;;  %vm1179_vm5 = vweird.f32 %v3190_v46  ;;  %v7085_v21 = vld [vmem:[#allocation50_spill] sm:$0xff]  ;;  %v1524_v45 = vld [vmem:[%s6608_s4 + $0x128] sm:$0xff] }
 0x43a   :  { %v1142_v55 = vsel %vm1141_vm1, %v3186_v28, %v1138_v41  ;;  %vm1180_vm7 = vmor %vm1178_vm6, %vm1179_vm5  ;;  %v224_v28 = vadd.f32 %v7085_v21, %v7078_v61  ;;  %v1493_v21 = vld [vmem:[%s6608_s4 + $0x30] sm:$0xff] }
 0x43b   :  { %v1147_v4 = vsel %vm1144_vm3, %v1146_v47, %v1142_v55  ;;  %v1161_v58 = vsel %vm1160_vm2, %v3188_v39, %v1157_v49  ;;  %v1175_v11 = vsub.f32 1.0, %v1174_v50  ;;  %v1526_v47 = vld [vmem:[%s6608_s4 + $0x138] sm:$0xff]  ;;  %v1519_v49 = vld [vmem:[%s6608_s4 + $0x100] sm:$0xff]  ;;  %v1520_v50 = vld [vmem:[%s6608_s4 + $0x108] sm:$0xff] }
 0x43c   :  { %v1166_v62 = vsel %vm1163_vm4, %v1165_v54, %v1161_v58  ;;  %v1189_v12 = vmul.f32 %v3192_v2, %v1147_v4  ;;  %v1521_v54 = vld [vmem:[%s6608_s4 + $0x110] sm:$0xff]  ;;  %v1522_v55 = vld [vmem:[%s6608_s4 + $0x118] sm:$0xff]  ;;  %v7086_v2 = vld [vmem:[#allocation51_spill] sm:$0xff] }
 0x43d   :  { %v1188_v0 = vmul.f32 %v1166_v62, %v4867_v32  ;;  %v1176_v5 = vmul.f32 %v3190_v46, %v1175_v11  ;;  %v1547_v32 = vld [vmem:[%s6608_s4 + $0x1e0] sm:$0xff]  ;;  %v306_v4 = vadd.f32 %v7086_v2, %v7080_v52  ;;  %v1516_v11 = vld [vmem:[%s6608_s4 + $0xe8] sm:$0xff]  ;;  %v1517_v62 = vld [vmem:[%s6608_s4 + $0xf0] sm:$0xff] }
 0x43e   :  { %v1515_v58 = vld [vmem:[%s6608_s4 + $0xe0] sm:$0xff] }
 0x43f   :  { %v4949_v59 = vadd.f32 %v1189_v12, %v1188_v0  ;;  %v1177_v60 = vadd.f32 %v3190_v46, %v1176_v5  ;;  %v1518_v0 = vld [vmem:[%s6608_s4 + $0xf8] sm:$0xff] }
 0x441   :  { %3193 = vtanh.f32 %v4949_v59  ;;  %v1181_v57 = vsel %vm1180_vm7, %v3190_v46, %v1177_v60  ;;  %v1511_v60 = vld [vmem:[%s6608_s4 + $0xc0] sm:$0xff] }
 0x442   :  { %v1186_v13 = vsel %vm1183_vm8, %v1185_v63, %v1181_v57  ;;  %v1514_v57 = vld [vmem:[%s6608_s4 + $0xd8] sm:$0xff] }
 0x447   :  { %v3194_v8 = vpop.eup %3193 }
 0x448   :  { %v4952_v40 = vmul.f32 %v3194_v8, %v1186_v13  ;;  %v1507_v8 = vld [vmem:[%s6608_s4 + $0xa0] sm:$0xff]  ;;  %v1508_v13 = vld [vmem:[%s6608_s4 + $0xa8] sm:$0xff] }
 0x44a   :  { %1209 = vmatmul.f32.vlgmr.msrb.gmra.mxu0 %v4952_v40  ;;  %1229 = vmatmul.f32.vlgmr.msra.gmra.mxu1 %v4952_v40 }
 0x44b   :  { %1249 = vmatmul.f32.vlgmr.msra.gmra.mxu2 %v4952_v40  ;;  %1269 = vmatmul.f32.vlgmr.msra.gmra.mxu3 %v4952_v40 }
 0x44c   :  { %1625 = vmatpush.msrb.mxu0 %v1547_v32  ;;  %1666 = vmatpush.msra.mxu1 %v1548_v48  ;;  %v1509_v32 = vld [vmem:[%s6608_s4 + $0xb0] sm:$0xff] }
 0x44d   :  { %1707 = vmatpush.msra.mxu2 %v1549_v44  ;;  %1748 = vmatpush.msra.mxu3 %v1550_v36  ;;  %v1510_v44 = vld [vmem:[%s6608_s4 + $0xb8] sm:$0xff]  ;;  %v1503_v36 = vld [vmem:[%s6608_s4 + $0x80] sm:$0xff] }
 0x44e   :  { %1626 = vmatpush.msrb.mxu0 %v1543_v22  ;;  %1667 = vmatpush.msra.mxu1 %v1544_v23  ;;  %v1504_v22 = vld [vmem:[%s6608_s4 + $0x88] sm:$0xff] }
 0x44f   :  { %1708 = vmatpush.msra.mxu2 %v1545_v24  ;;  %1749 = vmatpush.msra.mxu3 %v1546_v25  ;;  %v1505_v25 = vld [vmem:[%s6608_s4 + $0x90] sm:$0xff] }
 0x450   :  { %1627 = vmatpush.msrb.mxu0 %v1539_v1  ;;  %1668 = vmatpush.msra.mxu1 %v1540_v51  ;;  %v1506_v1 = vld [vmem:[%s6608_s4 + $0x98] sm:$0xff] }
 0x451   :  { %1709 = vmatpush.msra.mxu2 %v1541_v29  ;;  %1750 = vmatpush.msra.mxu3 %v1542_v26  ;;  %v1499_v29 = vld [vmem:[%s6608_s4 + $0x60] sm:$0xff]  ;;  %v1500_v26 = vld [vmem:[%s6608_s4 + $0x68] sm:$0xff] }
 0x452   :  { %1628 = vmatpush.msrb.mxu0 %v1535_v17  ;;  %1669 = vmatpush.msra.mxu1 %v1536_v16  ;;  %v1501_v17 = vld [vmem:[%s6608_s4 + $0x70] sm:$0xff]  ;;  %v1502_v16 = vld [vmem:[%s6608_s4 + $0x78] sm:$0xff] }
 0x453   :  { %1710 = vmatpush.msra.mxu2 %v1537_v14  ;;  %1751 = vmatpush.msra.mxu3 %v1538_v35  ;;  %v1495_v14 = vld [vmem:[%s6608_s4 + $0x40] sm:$0xff]  ;;  %v1496_v35 = vld [vmem:[%s6608_s4 + $0x48] sm:$0xff] }
 0x454   :  { %1629 = vmatpush.msrb.mxu0 %v1531_v56  ;;  %1670 = vmatpush.msra.mxu1 %v1532_v18  ;;  %v1497_v56 = vld [vmem:[%s6608_s4 + $0x50] sm:$0xff]  ;;  %v1498_v18 = vld [vmem:[%s6608_s4 + $0x58] sm:$0xff] }
 0x455   :  { %1711 = vmatpush.msra.mxu2 %v1533_v33  ;;  %1752 = vmatpush.msra.mxu3 %v1534_v38  ;;  %v1491_v33 = vld [vmem:[%s6608_s4 + $0x20] sm:$0xff] }
 0x456   :  { %1630 = vmatpush.msrb.mxu0 %v1527_v30  ;;  %1671 = vmatpush.msra.mxu1 %v1528_v9  ;;  %v1487_v30 = vld [vmem:[%s6608_s4] sm:$0xff]  ;;  %v1488_v9 = vld [vmem:[%s6608_s4 + $0x8] sm:$0xff] }
 0x457   :  { %1712 = vmatpush.msra.mxu2 %v1529_v27  ;;  %1753 = vmatpush.msra.mxu3 %v1530_v7 }
 0x458   :  { %1631 = vmatpush.msrb.mxu0 %v1523_v43  ;;  %1672 = vmatpush.msra.mxu1 %v1524_v45 }
 0x459   :  { %1713 = vmatpush.msra.mxu2 %v1525_v6  ;;  %1754 = vmatpush.msra.mxu3 %v1526_v47 }
 0x45a   :  { %1632 = vmatpush.msrb.mxu0 %v1519_v49  ;;  %1673 = vmatpush.msra.mxu1 %v1520_v50 }
 0x45b   :  { %1714 = vmatpush.msra.mxu2 %v1521_v54  ;;  %1755 = vmatpush.msra.mxu3 %v1522_v55 }
 0x45c   :  { %1633 = vmatpush.msrb.mxu0 %v1515_v58  ;;  %1674 = vmatpush.msra.mxu1 %v1516_v11 }
 0x45d   :  { %1715 = vmatpush.msra.mxu2 %v1517_v62  ;;  %1756 = vmatpush.msra.mxu3 %v1518_v0 }
 0x45e   :  { %1634 = vmatpush.msrb.mxu0 %v1511_v60  ;;  %1675 = vmatpush.msra.mxu1 %v1512_v10 }
 0x45f   :  { %1716 = vmatpush.msra.mxu2 %v1513_v3  ;;  %1757 = vmatpush.msra.mxu3 %v1514_v57 }
 0x460   :  { %1635 = vmatpush.msrb.mxu0 %v1507_v8  ;;  %1676 = vmatpush.msra.mxu1 %v1508_v13 }
 0x461   :  { %1717 = vmatpush.msra.mxu2 %v1509_v32  ;;  %1758 = vmatpush.msra.mxu3 %v1510_v44 }
 0x462   :  { %1636 = vmatpush.msrb.mxu0 %v1503_v36  ;;  %1677 = vmatpush.msra.mxu1 %v1504_v22 }
 0x463   :  { %1718 = vmatpush.msra.mxu2 %v1505_v25  ;;  %1759 = vmatpush.msra.mxu3 %v1506_v1 }
 0x464   :  { %1637 = vmatpush.msrb.mxu0 %v1499_v29  ;;  %1678 = vmatpush.msra.mxu1 %v1500_v26  ;;  %v7089_v26 = vld [vmem:[#allocation4_spill] sm:$0xff] }
 0x465   :  { %1719 = vmatpush.msra.mxu2 %v1501_v17  ;;  %1760 = vmatpush.msra.mxu3 %v1502_v16  ;;  %v7090_v17 = vld [vmem:[#allocation5_spill] sm:$0xff]  ;;  %v5191_v16 = vld [vmem:[%s6609_s5 + $0x1e0] sm:$0xff] }
 0x466   :  { %1638 = vmatpush.msrb.mxu0 %v1495_v14  ;;  %1679 = vmatpush.msra.mxu1 %v1496_v35  ;;  %7091 = vst [vmem:[#allocation37_spill] sm:$0xff] %v5191_v16  ;;  %v5196_v14 = vld [vmem:[%s6609_s5 + $0x1e8] sm:$0xff]  ;;  %v5201_v35 = vld [vmem:[%s6609_s5 + $0x1c0] sm:$0xff] }
 0x467   :  { %1720 = vmatpush.msra.mxu2 %v1497_v56  ;;  %1761 = vmatpush.msra.mxu3 %v1498_v18  ;;  %v5208_v56 = vld [vmem:[%s6609_s5 + $0x1c8] sm:$0xff]  ;;  %v5213_v18 = vld [vmem:[%s6609_s5 + $0x1f8] sm:$0xff] }
 0x468   :  { %1639 = vmatpush.msrb.mxu0 %v1491_v33  ;;  %7092 = vst [vmem:[#allocation2_spill] sm:$0xff] %v5208_v56  ;;  %v5219_v33 = vld [vmem:[%s6609_s5 + $0x1a0] sm:$0xff] }
 0x469   :  { %1721 = vmatpush.msra.mxu2 %v1493_v21  ;;  %v7095_v21 = vld [vmem:[#allocation38_spill] sm:$0xff] }
 0x46a   :  { %1640 = vmatpush.msrb.mxu0 %v1487_v30  ;;  %v5284_v30 = vld [vmem:[%s6609_s5 + $0x160] sm:$0xff] }
 0x4c7   :  { %v1210_v39 = vpop.f32.mrf.mxu0  ;;  %v1230_v42 = vpop.f32.mrf.mxu1 }
 0x4c8   :  { %v1273_v37 = vadd.f32 %v1210_v39, %v183_v15  ;;  %v1274_v53 = vadd.f32 %v1230_v42, %v224_v28  ;;  %v1492_v15 = vld [vmem:[%s6608_s4 + $0x28] sm:$0xff]  ;;  %v1494_v28 = vld [vmem:[%s6608_s4 + $0x38] sm:$0xff] }
 0x4c9   :  { %v7087_v39 = vld [vmem:[#allocation53_spill] sm:$0xff]  ;;  %1680 = vmatpush.msra.mxu1 %v1492_v15  ;;  %1762 = vmatpush.msra.mxu3 %v1494_v28  ;;  %v5251_v28 = vld [vmem:[%s6609_s5 + $0x1f0] sm:$0xff] }
 0x4ca   :  { %v3061_v46 = vmul.f32 -1.442695, %v1273_v37  ;;  %v3062_v41 = vmul.f32 -1.442695, %v1274_v53  ;;  %v265_v42 = vadd.f32 %v7087_v39, %v7082_v19  ;;  %v1489_v37 = vld [vmem:[%s6608_s4 + $0x10] sm:$0xff]  ;;  %v1490_v53 = vld [vmem:[%s6608_s4 + $0x18] sm:$0xff] }
 0x4cb   :  { %1681 = vmatpush.msra.mxu1 %v1488_v9  ;;  %1722 = vmatpush.msra.mxu2 %v1489_v37  ;;  %v5229_v15 = vld [vmem:[%s6609_s5 + $0x1d8] sm:$0xff]  ;;  %v5273_v39 = vld [vmem:[%s6609_s5 + $0x180] sm:$0xff]  ;;  %v5292_v9 = vld [vmem:[%s6609_s5 + $0x168] sm:$0xff] }
 0x4cc   :  { %3195 = vpow2.f32 %v3061_v46  ;;  %1763 = vmatpush.msra.mxu3 %v1490_v53  ;;  %7094 = vst [vmem:[#allocation10_spill] sm:$0xff] %v5229_v15  ;;  %v5302_v37 = vld [vmem:[%s6609_s5 + $0x190] sm:$0xff]  ;;  %v5311_v53 = vld [vmem:[%s6609_s5 + $0x178] sm:$0xff] }
 0x4cd   :  { %3197 = vpow2.f32 %v3062_v41  ;;  %7097 = vst [vmem:[#allocation39_spill] sm:$0xff] %v5273_v39 }
 0x4ce   :  { %v1270_v12 = vpop.f32.mrf.mxu3  ;;  %v1250_v20 = vpop.f32.mrf.mxu2 }
 0x4cf   :  { %v1276_v5 = vadd.f32 %v1270_v12, %v306_v4  ;;  %v1275_v43 = vadd.f32 %v1250_v20, %v265_v42  ;;  %v5224_v20 = vld [vmem:[%s6609_s5 + $0x1a8] sm:$0xff] }
 0x4d0   :  { %7093 = vst [vmem:[#allocation3_spill] sm:$0xff] %v5224_v20  ;;  %v5278_v42 = vld [vmem:[%s6609_s5 + $0x188] sm:$0xff] }
 0x4d1   :  { %v3063_v63 = vmul.f32 -1.442695, %v1276_v5 }
 0x4d2   :  { %v3196_v48 = vpop.eup %3195 }
 0x4d3   :  { %v3198_v23 = vpop.eup %3197  ;;  %v5102_v24 = vadd.f32 1.0, %v3196_v48  ;;  %3199 = vpow2.f32 %v3063_v63 }
 0x4d4   :  { %v5110_v51 = vadd.f32 1.0, %v3198_v23 }
 0x4d5   :  { %3201 = vrcp.f32 %v5102_v24  ;;  %v1292_v49 = vand.u32 2147483648, %v5102_v24  ;;  %v1290_v55 = vand.u32 2147483647, %v5102_v24  ;;  %vm1286_vm11 = vweird.f32 %v5102_v24 }
 0x4d6   :  { %3203 = vrcp.f32 %v5110_v51  ;;  %v1311_v50 = vand.u32 2147483648, %v5110_v51  ;;  %v1309_v4 = vand.u32 2147483647, %v5110_v51  ;;  %vm1305_vm12 = vweird.f32 %v5110_v51 }
 0x4d7   :  { %v1293_v62 = vor.u32 1.1754944e-38, %v1292_v49  ;;  %vm1291_vm15 = vcmp.eq.f32.partialorder %v1290_v55, 8.507059e+37  ;;  %v5337_v49 = vld [vmem:[%s6609_s5 + $0x158] sm:$0xff] }
 0x4d8   :  { %v1312_v5 = vor.u32 1.1754944e-38, %v1311_v50  ;;  %vm1310_vm0 = vcmp.eq.f32.partialorder %v1309_v4, 8.507059e+37  ;;  %v5354_v4 = vld [vmem:[%s6609_s5 + $0x128] sm:$0xff] }
 0x4d9   :  { %v3200_v38 = vpop.eup %3199 }
 0x4da   :  { %v1319_v27 = vadd.f32 1.0, %v3200_v38  ;;  %v5268_v38 = vld [vmem:[%s6609_s5 + $0x1b0] sm:$0xff] }
 0x4db   :  { %v3202_v7 = vpop.eup %3201 }
 0x4dc   :  { %v3204_v45 = vpop.eup %3203  ;;  %v1282_v6 = vmul.f32 %v3202_v7, %v5102_v24  ;;  %3205 = vrcp.f32 %v1319_v27  ;;  %vm1287_vm9 = vweird.f32 %v3202_v7  ;;  %v1331_v22 = vand.u32 2147483648, %v1319_v27 }
 0x4dd   :  { %v1301_v46 = vmul.f32 %v3204_v45, %v5110_v51  ;;  %3207 = vtanh.f32 %v1275_v43  ;;  %vm1306_vm10 = vweird.f32 %v3204_v45  ;;  %vm1288_vm13 = vmor %vm1286_vm11, %vm1287_vm9  ;;  %vm1325_vm2 = vweird.f32 %v1319_v27  ;;  %v7098_v43 = vld [vmem:[#allocation29_spill] sm:$0xff] }
 0x4de   :  { %v1283_v41 = vsub.f32 1.0, %v1282_v6  ;;  %vm1307_vm14 = vmor %vm1305_vm12, %vm1306_vm10  ;;  %v1329_v23 = vand.u32 2147483647, %v1319_v27  ;;  %v1332_v25 = vor.u32 1.1754944e-38, %v1331_v22  ;;  %v7099_v6 = vld [vmem:[#allocation52_spill] sm:$0xff]  ;;  %v5428_v22 = vld [vmem:[%s6609_s5 + $0xa0] sm:$0xff] }
 0x4df   :  { %v1302_v47 = vsub.f32 1.0, %v1301_v46  ;;  %v227_v46 = vadd.f32 %v7099_v6, %v7078_v61  ;;  %v5344_v61 = vld [vmem:[%s6609_s5 + $0x150] sm:$0xff]  ;;  %7102 = vst [vmem:[#allocation41_spill] sm:$0xff] %v5428_v22 }
 0x4e0   :  { %v1284_v54 = vmul.f32 %v3202_v7, %v1283_v41  ;;  %vm1330_vm4 = vcmp.eq.f32.partialorder %v1329_v23, 8.507059e+37  ;;  %v5327_v41 = vld [vmem:[%s6609_s5 + $0x140] sm:$0xff]  ;;  %v5438_v23 = vld [vmem:[%s6609_s5 + $0x110] sm:$0xff] }
 0x4e1   :  { %v1303_v2 = vmul.f32 %v3204_v45, %v1302_v47  ;;  %v5332_v47 = vld [vmem:[%s6609_s5 + $0x148] sm:$0xff] }
 0x4e2   :  { %v3206_v58 = vpop.eup %3205  ;;  %v1285_v11 = vadd.f32 %v3202_v7, %v1284_v54 }
 0x4e3   :  { %v1304_v12 = vadd.f32 %v3204_v45, %v1303_v2  ;;  %v1321_v0 = vmul.f32 %v3206_v58, %v1319_v27  ;;  %v3208_v10 = vpop.eup %3207  ;;  %vm1326_vm1 = vweird.f32 %v3206_v58  ;;  %v5297_v27 = vld [vmem:[%s6609_s5 + $0x198] sm:$0xff]  ;;  %v5349_v2 = vld [vmem:[%s6609_s5 + $0x120] sm:$0xff] }
 0x4e4   :  { %v1289_v60 = vsel %vm1288_vm13, %v3202_v7, %v1285_v11  ;;  %vm1327_vm3 = vmor %vm1325_vm2, %vm1326_vm1  ;;  %v5316_v7 = vld [vmem:[%s6609_s5 + $0x170] sm:$0xff] }
 0x4e5   :  { %v1294_v3 = vsel %vm1291_vm15, %v1293_v62, %v1289_v60  ;;  %v1308_v57 = vsel %vm1307_vm14, %v3204_v45, %v1304_v12  ;;  %v1322_v63 = vsub.f32 1.0, %v1321_v0  ;;  %v186_v45 = vadd.f32 %v7098_v43, %v7076_v31  ;;  %v5368_v11 = vld [vmem:[%s6609_s5 + $0x130] sm:$0xff]  ;;  %v5373_v0 = vld [vmem:[%s6609_s5 + $0x100] sm:$0xff] }
 0x4e6   :  { %v1313_v8 = vsel %vm1310_vm0, %v1312_v5, %v1308_v57  ;;  %v1336_v13 = vmul.f32 %v3208_v10, %v1294_v3  ;;  %v5378_v5 = vld [vmem:[%s6609_s5 + $0x108] sm:$0xff]  ;;  %v5387_v60 = vld [vmem:[%s6609_s5 + $0xe0] sm:$0xff]  ;;  %v5397_v3 = vld [vmem:[%s6609_s5 + $0x118] sm:$0xff] }
 0x4e7   :  { %v1335_v32 = vmul.f32 %v1313_v8, %v4949_v59  ;;  %v1323_v48 = vmul.f32 %v3206_v58, %v1322_v63  ;;  %v7088_v59 = vld [vmem:[#allocation59_spill] sm:$0xff]  ;;  %v5403_v57 = vld [vmem:[%s6609_s5 + $0xc0] sm:$0xff]  ;;  %v5413_v8 = vld [vmem:[%s6609_s5 + $0xf8] sm:$0xff] }
 0x4e8   :  { %v5392_v10 = vld [vmem:[%s6609_s5 + $0xe8] sm:$0xff]  ;;  %v5481_v43 = vld [vmem:[%s6609_s5 + $0x60] sm:$0xff] }
 0x4e9   :  { %v5173_v44 = vadd.f32 %v1336_v13, %v1335_v32  ;;  %v1324_v36 = vadd.f32 %v3206_v58, %v1323_v48  ;;  %v5408_v63 = vld [vmem:[%s6609_s5 + $0xc8] sm:$0xff]  ;;  %v5422_v48 = vld [vmem:[%s6609_s5 + $0xd8] sm:$0xff]  ;;  %7109 = vst [vmem:[#allocation8_spill] sm:$0xff] %v5481_v43 }
 0x4ea   :  { %v7100_v13 = vld [vmem:[#allocation55_spill] sm:$0xff]  ;;  %7101 = vst [vmem:[#allocation42_spill] sm:$0xff] %v5422_v48 }
 0x4eb   :  { %3209 = vtanh.f32 %v5173_v44  ;;  %v1328_v24 = vsel %vm1327_vm3, %v3206_v58, %v1324_v36  ;;  %v5360_v58 = vld [vmem:[%s6609_s5 + $0x138] sm:$0xff]  ;;  %v309_v32 = vadd.f32 %v7100_v13, %v7080_v52  ;;  %v5433_v52 = vld [vmem:[%s6609_s5 + $0xa8] sm:$0xff]  ;;  %v5530_v13 = vld [vmem:[%s6609_s5 + $0x20] sm:$0xff] }
 0x4ec   :  { %v1333_v51 = vsel %vm1330_vm4, %v1332_v25, %v1328_v24  ;;  %7103 = vst [vmem:[#allocation40_spill] sm:$0xff] %v5433_v52  ;;  %v5445_v25 = vld [vmem:[%s6609_s5 + $0xb8] sm:$0xff] }
 0x4ed   :  { %7104 = vst [vmem:[#allocation43_spill] sm:$0xff] %v5445_v25 }
 0x4ee   :  { %7116 = vst [vmem:[#allocation15_spill] sm:$0xff] %v5530_v13 }
 0x4f1   :  { %v3210_v1 = vpop.eup %3209 }
 0x4f2   :  { %v1339_v29 = vmul.f32 %v3210_v1, %v1333_v51  ;;  %v5450_v1 = vld [vmem:[%s6609_s5 + $0xf0] sm:$0xff]  ;;  %v5457_v51 = vld [vmem:[%s6609_s5 + $0x80] sm:$0xff] }
 0x4f3   :  { %7105 = vst [vmem:[#allocation45_spill] sm:$0xff] %v5457_v51 }
 0x4f4   :  { %1356 = vmatmul.f32.vlgmr.msra.gmra.mxu0 %v1339_v29  ;;  %1376 = vmatmul.f32.vlgmr.msrb.gmra.mxu1 %v1339_v29 }
 0x4f5   :  { %1396 = vmatmul.f32.vlgmr.msrb.gmra.mxu2 %v1339_v29  ;;  %1416 = vmatmul.f32.vlgmr.msrb.gmra.mxu3 %v1339_v29 }
 0x4f6   :  { %1789 = vmatpush.msra.mxu0 %v5191_v16  ;;  %1809 = vmatpush.msrb.mxu1 %v5196_v14 }
 0x4f7   :  { %1849 = vmatpush.msrb.mxu3 %v5213_v18  ;;  %1829 = vmatpush.msrb.mxu2 %v5251_v28 }
 0x4f8   :  { %1790 = vmatpush.msra.mxu0 %v5201_v35  ;;  %1810 = vmatpush.msrb.mxu1 %v5208_v56 }
 0x4f9   :  { %1850 = vmatpush.msrb.mxu3 %v5229_v15 }
 0x4fa   :  { %1791 = vmatpush.msra.mxu0 %v5219_v33  ;;  %1811 = vmatpush.msrb.mxu1 %v5224_v20 }
 0x4fc   :  { %1641 = vmatmul.f32.vlgmr.msrb.gmra.mxu0 %v7088_v59  ;;  %1682 = vmatmul.f32.vlgmr.msra.gmra.mxu1 %v7088_v59 }
 0x4fd   :  { %1723 = vmatmul.f32.vlgmr.msra.gmra.mxu2 %v7088_v59  ;;  %1764 = vmatmul.f32.vlgmr.msra.gmra.mxu3 %v7088_v59 }
 0x4fe   :  { %1792 = vmatpush.msra.mxu0 %v5273_v39  ;;  %1812 = vmatpush.msrb.mxu1 %v5278_v42 }
 0x500   :  { %1793 = vmatpush.msra.mxu0 %v5284_v30  ;;  %1813 = vmatpush.msrb.mxu1 %v5292_v9 }
 0x502   :  { %1794 = vmatpush.msra.mxu0 %v5327_v41  ;;  %1814 = vmatpush.msrb.mxu1 %v5332_v47 }
 0x504   :  { %1644 = vmatmul.f32.gmra.mxu0 %v7089_v26  ;;  %1685 = vmatmul.f32.gmra.mxu1 %v7089_v26 }
 0x505   :  { %1726 = vmatmul.f32.gmra.mxu2 %v7089_v26  ;;  %1767 = vmatmul.f32.gmra.mxu3 %v7089_v26  ;;  %v5469_v26 = vld [vmem:[%s6609_s5 + $0x98] sm:$0xff] }
 0x506   :  { %1795 = vmatpush.msra.mxu0 %v5349_v2  ;;  %1815 = vmatpush.msrb.mxu1 %v5354_v4  ;;  %7107 = vst [vmem:[#allocation7_spill] sm:$0xff] %v5469_v26 }
 0x508   :  { %1796 = vmatpush.msra.mxu0 %v5373_v0  ;;  %1816 = vmatpush.msrb.mxu1 %v5378_v5 }
 0x50a   :  { %1797 = vmatpush.msra.mxu0 %v5387_v60  ;;  %1817 = vmatpush.msrb.mxu1 %v5392_v10 }
 0x50c   :  { %1647 = vmatmul.f32.gmra.mxu0 %v7090_v17  ;;  %1688 = vmatmul.f32.gmra.mxu1 %v7090_v17 }
 0x50d   :  { %1729 = vmatmul.f32.gmra.mxu2 %v7090_v17  ;;  %1770 = vmatmul.f32.gmra.mxu3 %v7090_v17  ;;  %v5474_v17 = vld [vmem:[%s6609_s5 + $0xd0] sm:$0xff] }
 0x50e   :  { %1798 = vmatpush.msra.mxu0 %v5403_v57  ;;  %1818 = vmatpush.msrb.mxu1 %v5408_v63  ;;  %7108 = vst [vmem:[#allocation14_spill] sm:$0xff] %v5474_v17 }
 0x510   :  { %1799 = vmatpush.msra.mxu0 %v5428_v22  ;;  %1819 = vmatpush.msrb.mxu1 %v5433_v52 }
 0x512   :  { %1800 = vmatpush.msra.mxu0 %v5457_v51 }
 0x514   :  { %1650 = vmatmul.f32.gmra.mxu0 %v7095_v21  ;;  %1691 = vmatmul.f32.gmra.mxu1 %v7095_v21 }
 0x515   :  { %1732 = vmatmul.f32.gmra.mxu2 %v7095_v21  ;;  %1773 = vmatmul.f32.gmra.mxu3 %v7095_v21 }
 0x516   :  { %1801 = vmatpush.msra.mxu0 %v5481_v43  ;;  %v5578_v43 = vld [vmem:[%s6609_s5 + $0x18] sm:$0xff] }
 0x517   :  { %7125 = vst [vmem:[#allocation21_spill] sm:$0xff] %v5578_v43 }
 0x51c   :  { %1653 = vmatmul.f32.gmra.mxu0 %v4870_v34  ;;  %1694 = vmatmul.f32.gmra.mxu1 %v4870_v34 }
 0x51d   :  { %1735 = vmatmul.f32.gmra.mxu2 %v4870_v34  ;;  %1776 = vmatmul.f32.gmra.mxu3 %v4870_v34  ;;  %v5257_v34 = vld [vmem:[%s6609_s5 + $0x1d0] sm:$0xff] }
 0x51e   :  { %1830 = vmatpush.msrb.mxu2 %v5257_v34 }
 0x520   :  { %1831 = vmatpush.msrb.mxu2 %v5268_v38 }
 0x522   :  { %1832 = vmatpush.msrb.mxu2 %v5302_v37 }
 0x524   :  { %1656 = vmatmul.f32.gmra.mxu0 %v4952_v40  ;;  %1697 = vmatmul.f32.gmra.mxu1 %v4952_v40 }
 0x525   :  { %1738 = vmatmul.f32.gmra.mxu2 %v4952_v40  ;;  %1779 = vmatmul.f32.gmra.mxu3 %v4952_v40  ;;  %v5263_v40 = vld [vmem:[%s6609_s5 + $0x1b8] sm:$0xff] }
 0x526   :  { %7096 = vst [vmem:[#allocation36_spill] sm:$0xff] %v5263_v40  ;;  %1851 = vmatpush.msrb.mxu3 %v5263_v40  ;;  %1833 = vmatpush.msrb.mxu2 %v5316_v7 }
 0x528   :  { %1852 = vmatpush.msrb.mxu3 %v5297_v27  ;;  %1834 = vmatpush.msrb.mxu2 %v5344_v61 }
 0x52a   :  { %1853 = vmatpush.msrb.mxu3 %v5311_v53  ;;  %1835 = vmatpush.msrb.mxu2 %v5368_v11 }
 0x52c   :  { %1659 = vmatmul.f32.gmra.mxu0 %v1339_v29  ;;  %1700 = vmatmul.f32.gmra.mxu1 %v1339_v29 }
 0x52d   :  { %1741 = vmatmul.f32.gmra.mxu2 %v1339_v29  ;;  %1782 = vmatmul.f32.gmra.mxu3 %v1339_v29  ;;  %v5462_v29 = vld [vmem:[%s6609_s5 + $0x88] sm:$0xff] }
 0x52e   :  { %1854 = vmatpush.msrb.mxu3 %v5337_v49  ;;  %1836 = vmatpush.msrb.mxu2 %v5438_v23  ;;  %7106 = vst [vmem:[#allocation44_spill] sm:$0xff] %v5462_v29 }
 0x52f   :  { %1820 = vmatpush.msrb.mxu1 %v5462_v29 }
 0x530   :  { %1855 = vmatpush.msrb.mxu3 %v5360_v58  ;;  %1837 = vmatpush.msrb.mxu2 %v5450_v1 }
 0x532   :  { %1856 = vmatpush.msrb.mxu3 %v5397_v3  ;;  %1838 = vmatpush.msrb.mxu2 %v5474_v17 }
 0x534   :  { %1857 = vmatpush.msrb.mxu3 %v5413_v8 }
 0x536   :  { %1858 = vmatpush.msrb.mxu3 %v5422_v48 }
 0x538   :  { %1859 = vmatpush.msrb.mxu3 %v5445_v25 }
 0x53a   :  { %1860 = vmatpush.msrb.mxu3 %v5469_v26 }
 0x571   :  { %v1357_v50 = vpop.f32.mrf.mxu0  ;;  %v1377_v31 = vpop.f32.mrf.mxu1 }
 0x572   :  { %v1420_v54 = vadd.f32 %v1357_v50, %v186_v45  ;;  %v1421_v55 = vadd.f32 %v1377_v31, %v227_v46  ;;  %v5486_v45 = vld [vmem:[%s6609_s5 + $0x68] sm:$0xff]  ;;  %v5495_v50 = vld [vmem:[%s6609_s5 + $0xb0] sm:$0xff]  ;;  %v5500_v31 = vld [vmem:[%s6609_s5 + $0x78] sm:$0xff] }
 0x573   :  { %7110 = vst [vmem:[#allocation12_spill] sm:$0xff] %v5486_v45  ;;  %1821 = vmatpush.msrb.mxu1 %v5486_v45  ;;  %1839 = vmatpush.msrb.mxu2 %v5495_v50  ;;  %v5573_v45 = vld [vmem:[%s6609_s5 + $0x38] sm:$0xff] }
 0x574   :  { %v3064_v62 = vmul.f32 -1.442695, %v1420_v54  ;;  %v3065_v12 = vmul.f32 -1.442695, %v1421_v55  ;;  %7111 = vst [vmem:[#allocation6_spill] sm:$0xff] %v5495_v50  ;;  %v5509_v55 = vld [vmem:[%s6609_s5 + $0x40] sm:$0xff]  ;;  %1861 = vmatpush.msrb.mxu3 %v5500_v31 }
 0x575   :  { %7112 = vst [vmem:[#allocation11_spill] sm:$0xff] %v5500_v31  ;;  %1802 = vmatpush.msra.mxu0 %v5509_v55 }
 0x576   :  { %3211 = vpow2.f32 %v3064_v62  ;;  %7113 = vst [vmem:[#allocation19_spill] sm:$0xff] %v5509_v55  ;;  %v5514_v62 = vld [vmem:[%s6609_s5 + $0x48] sm:$0xff]  ;;  %v7122_v55 = vld [vmem:[#allocation57_spill] sm:$0xff] }
 0x577   :  { %3213 = vpow2.f32 %v3065_v12  ;;  %7114 = vst [vmem:[#allocation16_spill] sm:$0xff] %v5514_v62  ;;  %v5522_v12 = vld [vmem:[%s6609_s5 + $0x90] sm:$0xff]  ;;  %1822 = vmatpush.msrb.mxu1 %v5514_v62  ;;  %v268_v31 = vadd.f32 %v7122_v55, %v7082_v19  ;;  %1803 = vmatpush.msra.mxu0 %v5530_v13 }
 0x578   :  { %v1417_v36 = vpop.f32.mrf.mxu3  ;;  %7115 = vst [vmem:[#allocation9_spill] sm:$0xff] %v5522_v12  ;;  %1840 = vmatpush.msrb.mxu2 %v5522_v12  ;;  %v5589_v13 = vld [vmem:[%s6609_s5 + $0x30] sm:$0xff] }
 0x579   :  { %v1423_v24 = vadd.f32 %v1417_v36, %v309_v32  ;;  %v5535_v32 = vld [vmem:[%s6609_s5 + $0x28] sm:$0xff]  ;;  %v5540_v36 = vld [vmem:[%s6609_s5 + $0x58] sm:$0xff]  ;;  %7124 = vst [vmem:[#allocation17_spill] sm:$0xff] %v5573_v45 }
 0x57a   :  { %7117 = vst [vmem:[#allocation22_spill] sm:$0xff] %v5535_v32  ;;  %1862 = vmatpush.msrb.mxu3 %v5540_v36  ;;  %1823 = vmatpush.msrb.mxu1 %v5535_v32 }
 0x57b   :  { %v3066_v59 = vmul.f32 -1.442695, %v1423_v24  ;;  %7118 = vst [vmem:[#allocation20_spill] sm:$0xff] %v5540_v36  ;;  %v5547_v24 = vld [vmem:[%s6609_s5 + $0x70] sm:$0xff] }
 0x57c   :  { %v3212_v21 = vpop.eup %3211  ;;  %7119 = vst [vmem:[#allocation13_spill] sm:$0xff] %v5547_v24  ;;  %v5568_v36 = vld [vmem:[%s6609_s5 + $0x50] sm:$0xff]  ;;  %1841 = vmatpush.msrb.mxu2 %v5547_v24  ;;  %1863 = vmatpush.msrb.mxu3 %v5573_v45 }
 0x57d   :  { %v3214_v6 = vpop.eup %3213  ;;  %v5488_v46 = vadd.f32 1.0, %v3212_v21  ;;  %3215 = vpow2.f32 %v3066_v59  ;;  %v1397_v59 = vpop.f32.mrf.mxu2  ;;  %v5554_v21 = vld [vmem:[%s6609_s5] sm:$0xff]  ;;  %7123 = vst [vmem:[#allocation23_spill] sm:$0xff] %v5568_v36 }
 0x57e   :  { %v5502_v54 = vadd.f32 1.0, %v3214_v6  ;;  %7120 = vst [vmem:[#allocation18_spill] sm:$0xff] %v5554_v21  ;;  %v5559_v6 = vld [vmem:[%s6609_s5 + $0x8] sm:$0xff]  ;;  %v1422_v32 = vadd.f32 %v1397_v59, %v268_v31  ;;  %1804 = vmatpush.msra.mxu0 %v5554_v21  ;;  %1842 = vmatpush.msrb.mxu2 %v5568_v36 }
 0x57f   :  { %3217 = vrcp.f32 %v5488_v46  ;;  %7121 = vst [vmem:[#allocation24_spill] sm:$0xff] %v5559_v6  ;;  %1824 = vmatpush.msrb.mxu1 %v5559_v6  ;;  %1864 = vmatpush.msrb.mxu3 %v5578_v43  ;;  %v1439_v21 = vand.u32 2147483648, %v5488_v46  ;;  %vm1433_vm7 = vweird.f32 %v5488_v46 }
 0x580   :  { %3219 = vrcp.f32 %v5502_v54  ;;  %7126 = vst [vmem:[#allocation26_spill] sm:$0xff] %v5589_v13  ;;  %1936 = vmatpush.msrb.mxu0 %v5191_v16  ;;  %1843 = vmatpush.msrb.mxu2 %v5589_v13  ;;  %v1458_v43 = vand.u32 2147483648, %v5502_v54  ;;  %v1437_v16 = vand.u32 2147483647, %v5488_v46  ;;  %vm1452_vm8 = vweird.f32 %v5502_v54 }
 0x581   :  { %1956 = vmatpush.msra.mxu1 %v5196_v14  ;;  %1996 = vmatpush.msra.mxu3 %v5213_v18 }
 0x582   :  { %1937 = vmatpush.msrb.mxu0 %v5201_v35  ;;  %vm1438_vm11 = vcmp.eq.f32.partialorder %v1437_v16, 8.507059e+37 }
 0x583   :  { %v3216_v62 = vpop.eup %3215  ;;  %1957 = vmatpush.msra.mxu1 %v5208_v56  ;;  %1997 = vmatpush.msra.mxu3 %v5229_v15 }
 0x584   :  { %v5580_v19 = vadd.f32 1.0, %v3216_v62  ;;  %v5599_v62 = vld [vmem:[%s6609_s5 + $0x10] sm:$0xff]  ;;  %1938 = vmatpush.msrb.mxu0 %v5219_v33 }
 0x585   :  { %v3218_v55 = vpop.eup %3217  ;;  %7127 = vst [vmem:[#allocation25_spill] sm:$0xff] %v5599_v62  ;;  %1844 = vmatpush.msrb.mxu2 %v5599_v62  ;;  %1958 = vmatpush.msra.mxu1 %v5224_v20 }
 0x586   :  { %v3220_v12 = vpop.eup %3219  ;;  %v1429_v26 = vmul.f32 %v3218_v55, %v5488_v46  ;;  %3221 = vrcp.f32 %v5580_v19  ;;  %vm1434_vm5 = vweird.f32 %v3218_v55  ;;  %1998 = vmatpush.msra.mxu3 %v5263_v40  ;;  %1939 = vmatpush.msrb.mxu0 %v5273_v39  ;;  %vm1472_vm14 = vweird.f32 %v5580_v19 }
 0x587   :  { %v1448_v31 = vmul.f32 %v3220_v12, %v5502_v54  ;;  %3223 = vtanh.f32 %v1422_v32  ;;  %vm1453_vm6 = vweird.f32 %v3220_v12  ;;  %1976 = vmatpush.msra.mxu2 %v5251_v28  ;;  %vm1435_vm9 = vmor %vm1433_vm7, %vm1434_vm5  ;;  %1959 = vmatpush.msra.mxu1 %v5278_v42 }
 0x588   :  { %v1430_v59 = vsub.f32 1.0, %v1429_v26  ;;  %vm1454_vm10 = vmor %vm1452_vm8, %vm1453_vm6  ;;  %1999 = vmatpush.msra.mxu3 %v5297_v27  ;;  %1940 = vmatpush.msrb.mxu0 %v5284_v30 }
 0x589   :  { %v1449_v6 = vsub.f32 1.0, %v1448_v31  ;;  %v1456_v31 = vand.u32 2147483647, %v5502_v54  ;;  %1977 = vmatpush.msra.mxu2 %v5257_v34  ;;  %1960 = vmatpush.msra.mxu1 %v5292_v9 }
 0x58a   :  { %v1431_v45 = vmul.f32 %v3218_v55, %v1430_v59  ;;  %2000 = vmatpush.msra.mxu3 %v5311_v53  ;;  %1941 = vmatpush.msrb.mxu0 %v5327_v41 }
 0x58b   :  { %v1450_v26 = vmul.f32 %v3220_v12, %v1449_v6  ;;  %v1440_v6 = vor.u32 1.1754944e-38, %v1439_v21  ;;  %vm1457_vm12 = vcmp.eq.f32.partialorder %v1456_v31, 8.507059e+37  ;;  %1978 = vmatpush.msra.mxu2 %v5268_v38  ;;  %1961 = vmatpush.msra.mxu1 %v5332_v47  ;;  %v7128_v31 = vld [vmem:[#allocation7_spill] sm:$0xff] }
 0x58c   :  { %v5615_v32 = vpop.eup %3221  ;;  %v1432_v56 = vadd.f32 %v3218_v55, %v1431_v45  ;;  %v1459_v45 = vor.u32 1.1754944e-38, %v1458_v43  ;;  %2001 = vmatpush.msra.mxu3 %v5337_v49  ;;  %1942 = vmatpush.msrb.mxu0 %v5349_v2 }
 0x58d   :  { %v1451_v59 = vadd.f32 %v3220_v12, %v1450_v26  ;;  %v1468_v15 = vmul.f32 %v5615_v32, %v5580_v19  ;;  %v3224_v54 = vpop.eup %3223  ;;  %1979 = vmatpush.msra.mxu2 %v5302_v37  ;;  %vm1473_vm13 = vweird.f32 %v5615_v32  ;;  %1962 = vmatpush.msra.mxu1 %v5354_v4 }
 0x58e   :  { %v1436_v46 = vsel %vm1435_vm9, %v3218_v55, %v1432_v56  ;;  %2002 = vmatpush.msra.mxu3 %v5360_v58  ;;  %1943 = vmatpush.msrb.mxu0 %v5373_v0  ;;  %vm1474_vm15 = vmor %vm1472_vm14, %vm1473_vm13 }
 0x58f   :  { %v1441_v40 = vsel %vm1438_vm11, %v1440_v6, %v1436_v46  ;;  %v1455_v21 = vsel %vm1454_vm10, %v3220_v12, %v1451_v59  ;;  %v1469_v26 = vsub.f32 1.0, %v1468_v15  ;;  %1980 = vmatpush.msra.mxu2 %v5316_v7  ;;  %1963 = vmatpush.msra.mxu1 %v5378_v5  ;;  %v7130_v6 = vld [vmem:[#allocation8_spill] sm:$0xff]  ;;  %v7133_v46 = vld [vmem:[#allocation19_spill] sm:$0xff] }
 0x590   :  { %v1460_v20 = vsel %vm1457_vm12, %v1459_v45, %v1455_v21  ;;  %v1483_v39 = vmul.f32 %v3224_v54, %v1441_v40  ;;  %2003 = vmatpush.msra.mxu3 %v5397_v3  ;;  %1944 = vmatpush.msrb.mxu0 %v5387_v60  ;;  %v7131_v59 = vld [vmem:[#allocation12_spill] sm:$0xff]  ;;  %v7132_v45 = vld [vmem:[#allocation11_spill] sm:$0xff] }
 0x591   :  { %v1482_v16 = vmul.f32 %v1460_v20, %v5173_v44  ;;  %v1470_v56 = vmul.f32 %v5615_v32, %v1469_v26  ;;  %v1478_v44 = vand.u32 2147483648, %v5580_v19  ;;  %1981 = vmatpush.msra.mxu2 %v5344_v61  ;;  %v1476_v20 = vand.u32 2147483647, %v5580_v19  ;;  %1964 = vmatpush.msra.mxu1 %v5392_v10  ;;  %v7134_v54 = vld [vmem:[#allocation16_spill] sm:$0xff] }
 0x592   :  { %2004 = vmatpush.msra.mxu3 %v5413_v8  ;;  %1945 = vmatpush.msrb.mxu0 %v5403_v57  ;;  %v7135_v21 = vld [vmem:[#allocation20_spill] sm:$0xff]  ;;  %v7136_v26 = vmov 0.0  }
 0x593   :  { %v1484_v15 = vadd.f32 %v1483_v39, %v1482_v16  ;;  %v1471_v40 = vadd.f32 %v5615_v32, %v1470_v56  ;;  %1982 = vmatpush.msra.mxu2 %v5368_v11  ;;  %v1479_v43 = vor.u32 1.1754944e-38, %v1478_v44  ;;  %vm1477_vm0 = vcmp.eq.f32.partialorder %v1476_v20, 8.507059e+37  ;;  %1965 = vmatpush.msra.mxu1 %v5408_v63  ;;  %v7137_v16 = vld [vmem:[#allocation15_spill] sm:$0xff]  ;;  %v7138_v56 = vld [vmem:[#allocation22_spill] sm:$0xff]  ;;  %v7141_v44 = vld [vmem:[#allocation24_spill] sm:$0xff] }
 0x594   :  { %2005 = vmatpush.msra.mxu3 %v5422_v48  ;;  %1946 = vmatpush.msrb.mxu0 %v5428_v22  ;;  %v7142_v20 = vld [vmem:[#allocation21_spill] sm:$0xff] }
 0x595   :  { %3225 = vtanh.f32 %v1484_v15  ;;  %v1475_v39 = vsel %vm1474_vm15, %v5615_v32, %v1471_v40  ;;  %1983 = vmatpush.msra.mxu2 %v5438_v23  ;;  %1966 = vmatpush.msra.mxu1 %v5433_v52  ;;  %v7129_v32 = vld [vmem:[#allocation9_spill] sm:$0xff]  ;;  %v7140_v40 = vld [vmem:[#allocation18_spill] sm:$0xff] }
 0x596   :  { %v1480_v19 = vsel %vm1477_vm0, %v1479_v43, %v1475_v39  ;;  %2006 = vmatpush.msra.mxu3 %v5445_v25  ;;  %1947 = vmatpush.msrb.mxu0 %v5457_v51  ;;  %v7139_v15 = vld [vmem:[#allocation17_spill] sm:$0xff]  ;;  %v7144_v43 = vld [vmem:[#allocation2_spill] sm:$0xff] }
 0x597   :  { %1984 = vmatpush.msra.mxu2 %v5450_v1  ;;  %1967 = vmatpush.msra.mxu1 %v5462_v29  ;;  %v7143_v39 = vld [vmem:[#allocation37_spill] sm:$0xff] }
 0x598   :  { %2007 = vmatpush.msra.mxu3 %v7128_v31  ;;  %1948 = vmatpush.msrb.mxu0 %v7130_v6 }
 0x599   :  { %1985 = vmatpush.msra.mxu2 %v5474_v17  ;;  %1968 = vmatpush.msra.mxu1 %v7131_v59 }
 0x59a   :  { %2008 = vmatpush.msra.mxu3 %v7132_v45  ;;  %1949 = vmatpush.msrb.mxu0 %v7133_v46 }
 0x59b   :  { %v3226_v12 = vpop.eup %3225  ;;  %1986 = vmatpush.msra.mxu2 %v5495_v50  ;;  %1969 = vmatpush.msra.mxu1 %v7134_v54 }
 0x59c   :  { %v1486_v55 = vmul.f32 %v3226_v12, %v1480_v19  ;;  %2009 = vmatpush.msra.mxu3 %v7135_v21  ;;  %1950 = vmatpush.msrb.mxu0 %v7137_v16  ;;  %v7145_v12 = vld [vmem:[#allocation10_spill] sm:$0xff]  ;;  %v7146_v19 = vld [vmem:[#allocation3_spill] sm:$0xff] }
 0x59d   :  { %1987 = vmatpush.msra.mxu2 %v7129_v32  ;;  %1970 = vmatpush.msra.mxu1 %v7138_v56 }
 0x59e   :  { %1662 = vmatmul.f32.gmra.mxu0 %v1486_v55  ;;  %1703 = vmatmul.f32.gmra.mxu1 %v1486_v55 }
 0x59f   :  { %1744 = vmatmul.f32.gmra.mxu2 %v1486_v55  ;;  %1785 = vmatmul.f32.gmra.mxu3 %v1486_v55  ;;  %v7147_v55 = vld [vmem:[#allocation36_spill] sm:$0xff] }
 0x5a0   :  { %1988 = vmatpush.msra.mxu2 %v5547_v24  ;;  %2010 = vmatpush.msra.mxu3 %v7139_v15 }
 0x5a1   :  { %1951 = vmatpush.msrb.mxu0 %v7140_v40  ;;  %1971 = vmatpush.msra.mxu1 %v7141_v44 }
 0x5a2   :  { %1989 = vmatpush.msra.mxu2 %v5568_v36  ;;  %2011 = vmatpush.msra.mxu3 %v7142_v20 }
 0x5a4   :  { %1990 = vmatpush.msra.mxu2 %v5589_v13 }
 0x5a6   :  { %1805 = vmatmul.f32.vlgmr.msra.gmra.mxu0 %v7136_v26  ;;  %1825 = vmatmul.f32.vlgmr.msrb.gmra.mxu1 %v7136_v26 }
 0x5a7   :  { %1845 = vmatmul.f32.vlgmr.msrb.gmra.mxu2 %v7136_v26  ;;  %1865 = vmatmul.f32.vlgmr.msrb.gmra.mxu3 %v7136_v26  ;;  %v7148_v26 = vld [vmem:[#allocation39_spill] sm:$0xff] }
 0x5a8   :  { %1991 = vmatpush.msra.mxu2 %v5599_v62  ;;  %2083 = vmatpush.msra.mxu0 %v7143_v39 }
 0x5a9   :  { %2103 = vmatpush.msrb.mxu1 %v5196_v14  ;;  %2143 = vmatpush.msrb.mxu3 %v5213_v18 }
 0x5aa   :  { %2123 = vmatpush.msrb.mxu2 %v5251_v28  ;;  %2084 = vmatpush.msra.mxu0 %v5201_v35 }
 0x5ab   :  { %2104 = vmatpush.msrb.mxu1 %v7144_v43  ;;  %2144 = vmatpush.msrb.mxu3 %v7145_v12 }
 0x5ac   :  { %2124 = vmatpush.msrb.mxu2 %v5257_v34  ;;  %2085 = vmatpush.msra.mxu0 %v5219_v33 }
 0x5ad   :  { %2105 = vmatpush.msrb.mxu1 %v7146_v19  ;;  %2145 = vmatpush.msrb.mxu3 %v7147_v55 }
 0x5ae   :  { %2125 = vmatpush.msrb.mxu2 %v5268_v38  ;;  %2086 = vmatpush.msra.mxu0 %v7148_v26 }
 0x5af   :  { %2106 = vmatpush.msrb.mxu1 %v5278_v42  ;;  %2146 = vmatpush.msrb.mxu3 %v5297_v27 }
 0x5b0   :  { %2126 = vmatpush.msrb.mxu2 %v5302_v37  ;;  %2087 = vmatpush.msra.mxu0 %v5284_v30 }
 0x5b1   :  { %2107 = vmatpush.msrb.mxu1 %v5292_v9  ;;  %2147 = vmatpush.msrb.mxu3 %v5311_v53 }
 0x5b2   :  { %2127 = vmatpush.msrb.mxu2 %v5316_v7  ;;  %2088 = vmatpush.msra.mxu0 %v5327_v41 }
 0x5b3   :  { %2108 = vmatpush.msrb.mxu1 %v5332_v47  ;;  %2148 = vmatpush.msrb.mxu3 %v5337_v49 }
 0x5b4   :  { %2128 = vmatpush.msrb.mxu2 %v5344_v61  ;;  %2089 = vmatpush.msra.mxu0 %v5349_v2 }
 0x5b5   :  { %2109 = vmatpush.msrb.mxu1 %v5354_v4  ;;  %2149 = vmatpush.msrb.mxu3 %v5360_v58 }
 0x5b6   :  { %2129 = vmatpush.msrb.mxu2 %v5368_v11  ;;  %2090 = vmatpush.msra.mxu0 %v5373_v0 }
 0x5b7   :  { %2110 = vmatpush.msrb.mxu1 %v5378_v5  ;;  %2150 = vmatpush.msrb.mxu3 %v5397_v3 }
 0x5b8   :  { %2130 = vmatpush.msrb.mxu2 %v5438_v23  ;;  %2091 = vmatpush.msra.mxu0 %v5387_v60 }
 0x5b9   :  { %2111 = vmatpush.msrb.mxu1 %v5392_v10  ;;  %2151 = vmatpush.msrb.mxu3 %v5413_v8 }
 0x5ba   :  { %2131 = vmatpush.msrb.mxu2 %v5450_v1  ;;  %2092 = vmatpush.msra.mxu0 %v5403_v57 }
 0x5bb   :  { %2112 = vmatpush.msrb.mxu1 %v5408_v63  ;;  %2152 = vmatpush.msrb.mxu3 %v5422_v48 }
 0x5bc   :  { %2132 = vmatpush.msrb.mxu2 %v5474_v17  ;;  %2093 = vmatpush.msra.mxu0 %v5428_v22 }
 0x5bd   :  { %2113 = vmatpush.msrb.mxu1 %v5433_v52  ;;  %2153 = vmatpush.msrb.mxu3 %v5445_v25 }
 0x5be   :  { %2133 = vmatpush.msrb.mxu2 %v5495_v50  ;;  %2094 = vmatpush.msra.mxu0 %v5457_v51 }
 0x5bf   :  { %2114 = vmatpush.msrb.mxu1 %v5462_v29  ;;  %2154 = vmatpush.msrb.mxu3 %v7128_v31 }
 0x5c0   :  { %2134 = vmatpush.msrb.mxu2 %v7129_v32  ;;  %2095 = vmatpush.msra.mxu0 %v7130_v6 }
 0x5c1   :  { %2115 = vmatpush.msrb.mxu1 %v7131_v59  ;;  %2155 = vmatpush.msrb.mxu3 %v7132_v45 }
 0x5c2   :  { %2135 = vmatpush.msrb.mxu2 %v5547_v24  ;;  %2096 = vmatpush.msra.mxu0 %v7133_v46  ;;  %v1765_v46 = vpop.f32.mrf.mxu3 }
 0x5c3   :  { %2116 = vmatpush.msrb.mxu1 %v7134_v54  ;;  %2156 = vmatpush.msrb.mxu3 %v7135_v21  ;;  %v1642_v54 = vpop.f32.mrf.mxu0 }
 0x5c4   :  { %2136 = vmatpush.msrb.mxu2 %v5568_v36  ;;  %2097 = vmatpush.msra.mxu0 %v7137_v16  ;;  %v1683_v36 = vpop.f32.mrf.mxu1 }
 0x5c5   :  { %2117 = vmatpush.msrb.mxu1 %v7138_v56  ;;  %2157 = vmatpush.msrb.mxu3 %v7139_v15  ;;  %v1724_v56 = vpop.f32.mrf.mxu2 }
 0x5c6   :  { %2137 = vmatpush.msrb.mxu2 %v5589_v13  ;;  %2098 = vmatpush.msra.mxu0 %v7140_v40 }
 0x5c7   :  { %2118 = vmatpush.msrb.mxu1 %v7141_v44  ;;  %2158 = vmatpush.msrb.mxu3 %v7142_v20 }
 0x5c8   :  { %2138 = vmatpush.msrb.mxu2 %v5599_v62 }
 0x5ca   :  { %v5759_v45 = vpop.f32.mrf.mxu3 }
 0x5cb   :  { %v5755_v21 = vpop.f32.mrf.mxu0  ;;  %7151 = vst [vmem:[#allocation34_spill] sm:$0xff] %v5759_v45 }
 0x5cc   :  { %7149 = vst [vmem:[#allocation30_spill] sm:$0xff] %v5755_v21  ;;  %v5757_v16 = vpop.f32.mrf.mxu1 }
 0x5cd   :  { %7150 = vst [vmem:[#allocation31_spill] sm:$0xff] %v5757_v16  ;;  %v5765_v40 = vpop.f32.mrf.mxu2 }
 0x5ce   :  { %7154 = vst [vmem:[#allocation35_spill] sm:$0xff] %v5765_v40 }
 0x5d2   :  { %v5767_v44 = vpop.f32.mrf.mxu3 }
 0x5d3   :  { %v5761_v13 = vpop.f32.mrf.mxu0  ;;  %7155 = vst [vmem:[#allocation47_spill] sm:$0xff] %v5767_v44 }
 0x5d4   :  { %7152 = vst [vmem:[#allocation33_spill] sm:$0xff] %v5761_v13  ;;  %v5763_v15 = vpop.f32.mrf.mxu1 }
 0x5d5   :  { %7153 = vst [vmem:[#allocation32_spill] sm:$0xff] %v5763_v15  ;;  %v5773_v24 = vpop.f32.mrf.mxu2 }
 0x5d6   :  { %7158 = vst [vmem:[#allocation46_spill] sm:$0xff] %v5773_v24 }
 0x5da   :  { %v5775_v21 = vpop.f32.mrf.mxu3 }
 0x5db   :  { %v5769_v62 = vpop.f32.mrf.mxu0  ;;  %7159 = vst [vmem:[#allocation56_spill] sm:$0xff] %v5775_v21 }
 0x5dc   :  { %7156 = vst [vmem:[#allocation27_spill] sm:$0xff] %v5769_v62  ;;  %v5771_v20 = vpop.f32.mrf.mxu1 }
 0x5dd   :  { %7157 = vst [vmem:[#allocation54_spill] sm:$0xff] %v5771_v20  ;;  %v5781_v45 = vpop.f32.mrf.mxu2 }
 0x5de   :  { %7162 = vst [vmem:[#allocation48_spill] sm:$0xff] %v5781_v45 }
 0x5e2   :  { %v5783_v13 = vpop.f32.mrf.mxu3 }
 0x5e3   :  { %v5777_v16 = vpop.f32.mrf.mxu0  ;;  %7163 = vst [vmem:[#allocation28_spill] sm:$0xff] %v5783_v13  ;;  %v1615_v13 = vld [vmem:[%s6610_s6] sm:$0xf] }
 0x5e4   :  { %7160 = vst [vmem:[#allocation49_spill] sm:$0xff] %v5777_v16  ;;  %v5779_v59 = vpop.f32.mrf.mxu1  ;;  %v5818_v32 = vperm.slane %v1615_v13, 3 }
 0x5e5   :  { %7161 = vst [vmem:[#allocation58_spill] sm:$0xff] %v5779_v59  ;;  %v5789_v44 = vpop.f32.mrf.mxu2 }
 0x5e6   :  { %7166 = vst [vmem:[#allocation53_spill] sm:$0xff] %v5789_v44  ;;  %v5810_v44 = vperm.slane %v1615_v13, 1  ;;  %v1766_v29 = vadd.f32 %v1765_v46, %v5818_v32 }
 0x5e7   :  { %7178 = vst [vmem:[#allocation3_spill] sm:$0xff] %v5818_v32 }
 0x5e8   :  { %7175 = vst [vmem:[#allocation37_spill] sm:$0xff] %v5810_v44 }
 0x5ea   :  { %v5791_v62 = vpop.f32.mrf.mxu3 }
 0x5eb   :  { %v5785_v15 = vpop.f32.mrf.mxu0  ;;  %7167 = vst [vmem:[#allocation59_spill] sm:$0xff] %v5791_v62 }
 0x5ec   :  { %7164 = vst [vmem:[#allocation50_spill] sm:$0xff] %v5785_v15  ;;  %v5787_v40 = vpop.f32.mrf.mxu1 }
 0x5ed   :  { %7165 = vst [vmem:[#allocation51_spill] sm:$0xff] %v5787_v40  ;;  %v5797_v21 = vpop.f32.mrf.mxu2  ;;  %v5808_v40 = vperm.slane %v1615_v13, 0 }
 0x5ee   :  { %7170 = vst [vmem:[#allocation38_spill] sm:$0xff] %v5797_v21 }
 0x5ef   :  { %7174 = vst [vmem:[#allocation57_spill] sm:$0xff] %v5808_v40 }
 0x5f2   :  { %v5799_v16 = vpop.f32.mrf.mxu3 }
 0x5f3   :  { %v5793_v20 = vpop.f32.mrf.mxu0  ;;  %7171 = vst [vmem:[#allocation29_spill] sm:$0xff] %v5799_v16 }
 0x5f4   :  { %7168 = vst [vmem:[#allocation4_spill] sm:$0xff] %v5793_v20  ;;  %v5795_v24 = vpop.f32.mrf.mxu1  ;;  %v1643_v20 = vadd.f32 %v1642_v54, %v5808_v40 }
 0x5f5   :  { %7169 = vst [vmem:[#allocation5_spill] sm:$0xff] %v5795_v24  ;;  %v1684_v24 = vadd.f32 %v1683_v36, %v5810_v44  ;;  %v5814_v62 = vpop.f32.mrf.mxu2 }
 0x5f6   :  { %7176 = vst [vmem:[#allocation2_spill] sm:$0xff] %v5814_v62 }
 0x61b   :  { %v5804_v59 = vpop.f32.mrf.mxu0  ;;  %v5806_v15 = vpop.f32.mrf.mxu1 }
 0x61c   :  { %7172 = vst [vmem:[#allocation52_spill] sm:$0xff] %v5804_v59 }
 0x61d   :  { %7173 = vst [vmem:[#allocation55_spill] sm:$0xff] %v5806_v15 }
 0x622   :  { %v5816_v21 = vpop.f32.mrf.mxu3  ;;  %v5821_v51 = vpop.f32.mrf.mxu2 }
 0x623   :  { %7177 = vst [vmem:[#allocation10_spill] sm:$0xff] %v5816_v21  ;;  %v1806_v16 = vpop.f32.mrf.mxu0  ;;  %v1826_v45 = vpop.f32.mrf.mxu1 }
 0x624   :  { %v1869_v6 = vadd.f32 %v1806_v16, %v1643_v20  ;;  %v1870_v31 = vadd.f32 %v1826_v45, %v1684_v24  ;;  %7179 = vst [vmem:[#allocation36_spill] sm:$0xff] %v5821_v51  ;;  %v5823_v16 = vperm.slane %v1615_v13, 2 }
 0x626   :  { %v3067_v59 = vmul.f32 -1.442695, %v1869_v6  ;;  %v3068_v15 = vmul.f32 -1.442695, %v1870_v31  ;;  %7180 = vst [vmem:[#allocation39_spill] sm:$0xff] %v5823_v16  ;;  %v1725_v6 = vadd.f32 %v1724_v56, %v5823_v16 }
 0x628   :  { %3227 = vpow2.f32 %v3067_v59 }
 0x629   :  { %3229 = vpow2.f32 %v3068_v15 }
 0x62a   :  { %v1866_v54 = vpop.f32.mrf.mxu3  ;;  %v1846_v24 = vpop.f32.mrf.mxu2 }
 0x62b   :  { %v1872_v36 = vadd.f32 %v1866_v54, %v1766_v29  ;;  %v1871_v46 = vadd.f32 %v1846_v24, %v1725_v6 }
 0x62d   :  { %v3069_v44 = vmul.f32 -1.442695, %v1872_v36 }
 0x62e   :  { %v3228_v62 = vpop.eup %3227 }
 0x62f   :  { %v3230_v40 = vpop.eup %3229  ;;  %v1876_v21 = vadd.f32 1.0, %v3228_v62  ;;  %3231 = vpow2.f32 %v3069_v44 }
 0x630   :  { %v1895_v25 = vadd.f32 1.0, %v3230_v40 }
 0x631   :  { %3233 = vrcp.f32 %v1876_v21  ;;  %v1888_v62 = vand.u32 2147483648, %v1876_v21  ;;  %v1886_v44 = vand.u32 2147483647, %v1876_v21  ;;  %vm1882_vm3 = vweird.f32 %v1876_v21 }
 0x632   :  { %3235 = vrcp.f32 %v1895_v25  ;;  %v1907_v40 = vand.u32 2147483648, %v1895_v25  ;;  %v1905_v32 = vand.u32 2147483647, %v1895_v25  ;;  %vm1901_vm4 = vweird.f32 %v1895_v25 }
 0x633   :  { %v1889_v24 = vor.u32 1.1754944e-38, %v1888_v62  ;;  %vm1887_vm6 = vcmp.eq.f32.partialorder %v1886_v44, 8.507059e+37 }
 0x634   :  { %v1908_v16 = vor.u32 1.1754944e-38, %v1907_v40  ;;  %vm1906_vm8 = vcmp.eq.f32.partialorder %v1905_v32, 8.507059e+37 }
 0x635   :  { %v3232_v31 = vpop.eup %3231 }
 0x636   :  { %v1915_v59 = vadd.f32 1.0, %v3232_v31 }
 0x637   :  { %v3234_v45 = vpop.eup %3233 }
 0x638   :  { %v3236_v15 = vpop.eup %3235  ;;  %v1878_v20 = vmul.f32 %v3234_v45, %v1876_v21  ;;  %3237 = vrcp.f32 %v1915_v59  ;;  %vm1883_vm1 = vweird.f32 %v3234_v45  ;;  %vm1921_vm10 = vweird.f32 %v1915_v59 }
 0x639   :  { %v1897_v29 = vmul.f32 %v3236_v15, %v1895_v25  ;;  %3239 = vtanh.f32 %v1871_v46  ;;  %vm1902_vm2 = vweird.f32 %v3236_v15  ;;  %vm1884_vm5 = vmor %vm1882_vm3, %vm1883_vm1  ;;  %v1925_v21 = vand.u32 2147483647, %v1915_v59 }
 0x63a   :  { %v1879_v54 = vsub.f32 1.0, %v1878_v20  ;;  %vm1903_vm7 = vmor %vm1901_vm4, %vm1902_vm2 }
 0x63b   :  { %v1898_v36 = vsub.f32 1.0, %v1897_v29  ;;  %vm1926_vm12 = vcmp.eq.f32.partialorder %v1925_v21, 8.507059e+37 }
 0x63c   :  { %v1880_v13 = vmul.f32 %v3234_v45, %v1879_v54 }
 0x63d   :  { %v1899_v51 = vmul.f32 %v3236_v15, %v1898_v36 }
 0x63e   :  { %v3238_v50 = vpop.eup %3237  ;;  %v1881_v56 = vadd.f32 %v3234_v45, %v1880_v13 }
 0x63f   :  { %v1900_v31 = vadd.f32 %v3236_v15, %v1899_v51  ;;  %v1917_v6 = vmul.f32 %v3238_v50, %v1915_v59  ;;  %v3240_v46 = vpop.eup %3239  ;;  %vm1922_vm9 = vweird.f32 %v3238_v50  ;;  %v1927_v51 = vand.u32 2147483648, %v1915_v59 }
 0x640   :  { %v1885_v20 = vsel %vm1884_vm5, %v3234_v45, %v1881_v56  ;;  %vm1923_vm11 = vmor %vm1921_vm10, %vm1922_vm9 }
 0x641   :  { %v1890_v29 = vsel %vm1887_vm6, %v1889_v24, %v1885_v20  ;;  %v1904_v54 = vsel %vm1903_vm7, %v3236_v15, %v1900_v31  ;;  %v1918_v52 = vsub.f32 1.0, %v1917_v6  ;;  %v1928_v62 = vor.u32 1.1754944e-38, %v1927_v51  ;;  %v7213_v20 = vld [vmem:[#allocation39_spill] sm:$0xff] }
 0x642   :  { %v1909_v36 = vsel %vm1906_vm8, %v1908_v16, %v1904_v54  ;;  %v1932_v22 = vmul.f32 %v3240_v46, %v1890_v29  ;;  %v7214_v46 = vld [vmem:[#allocation35_spill] sm:$0xff] }
 0x643   :  { %v1931_v48 = vmul.f32 0.0, %v1909_v36  ;;  %v1919_v17 = vmul.f32 %v3238_v50, %v1918_v52  ;;  %v1728_v29 = vadd.f32 %v7214_v46, %v7213_v20  ;;  %v6022_v46 = vld [vmem:[%s6609_s5 + $0x178] sm:$0xff] }
 0x645   :  { %v5826_v13 = vadd.f32 %v1932_v22, %v1931_v48  ;;  %v1920_v25 = vadd.f32 %v3238_v50, %v1919_v17  ;;  %v7210_v48 = vld [vmem:[#allocation31_spill] sm:$0xff] }
 0x647   :  { %3241 = vtanh.f32 %v5826_v13  ;;  %v1924_v45 = vsel %vm1923_vm11, %v3238_v50, %v1920_v25 }
 0x648   :  { %v1929_v32 = vsel %vm1926_vm12, %v1928_v62, %v1924_v45 }
 0x64d   :  { %v3242_v15 = vpop.eup %3241 }
 0x64e   :  { %v1935_v40 = vmul.f32 %v3242_v15, %v1929_v32 }
 0x650   :  { %1952 = vmatmul.f32.vlgmr.msrb.gmra.mxu0 %v1935_v40  ;;  %1972 = vmatmul.f32.vlgmr.msra.gmra.mxu1 %v1935_v40 }
 0x651   :  { %1992 = vmatmul.f32.vlgmr.msra.gmra.mxu2 %v1935_v40  ;;  %2012 = vmatmul.f32.vlgmr.msra.gmra.mxu3 %v1935_v40 }
 0x652   :  { %2230 = vmatpush.msrb.mxu0 %v7143_v39  ;;  %2250 = vmatpush.msra.mxu1 %v5196_v14  ;;  %v7181_v14 = vld [vmem:[#allocation14_spill] sm:$0xff] }
 0x653   :  { %2270 = vmatpush.msra.mxu2 %v5251_v28  ;;  %2290 = vmatpush.msra.mxu3 %v5213_v18  ;;  %v7183_v18 = vld [vmem:[#allocation41_spill] sm:$0xff]  ;;  %v7185_v28 = vld [vmem:[#allocation6_spill] sm:$0xff] }
 0x654   :  { %2231 = vmatpush.msrb.mxu0 %v5201_v35  ;;  %2251 = vmatpush.msra.mxu1 %v7144_v43  ;;  %v7182_v35 = vld [vmem:[#allocation42_spill] sm:$0xff]  ;;  %v7211_v43 = vld [vmem:[#allocation3_spill] sm:$0xff] }
 0x655   :  { %2271 = vmatpush.msra.mxu2 %v5257_v34  ;;  %2291 = vmatpush.msra.mxu3 %v7145_v12  ;;  %v7186_v34 = vld [vmem:[#allocation43_spill] sm:$0xff]  ;;  %v7212_v12 = vld [vmem:[#allocation34_spill] sm:$0xff] }
 0x656   :  { %2232 = vmatpush.msrb.mxu0 %v5219_v33  ;;  %2252 = vmatpush.msra.mxu1 %v7146_v19  ;;  %v7184_v33 = vld [vmem:[#allocation40_spill] sm:$0xff]  ;;  %v1769_v19 = vadd.f32 %v7212_v12, %v7211_v43  ;;  %v5956_v12 = vld [vmem:[%s6609_s5 + $0x1a0] sm:$0xff] }
 0x657   :  { %2272 = vmatpush.msra.mxu2 %v5268_v38  ;;  %2292 = vmatpush.msra.mxu3 %v7147_v55  ;;  %v7187_v38 = vld [vmem:[#allocation45_spill] sm:$0xff] }
 0x658   :  { %2233 = vmatpush.msrb.mxu0 %v7148_v26  ;;  %2253 = vmatpush.msra.mxu1 %v5278_v42  ;;  %v7188_v42 = vld [vmem:[#allocation44_spill] sm:$0xff] }
 0x659   :  { %2273 = vmatpush.msra.mxu2 %v5302_v37  ;;  %2293 = vmatpush.msra.mxu3 %v5297_v27  ;;  %v7191_v27 = vld [vmem:[#allocation8_spill] sm:$0xff] }
 0x65a   :  { %2234 = vmatpush.msrb.mxu0 %v5284_v30  ;;  %2254 = vmatpush.msra.mxu1 %v5292_v9  ;;  %v7189_v30 = vld [vmem:[#allocation9_spill] sm:$0xff]  ;;  %v7190_v9 = vld [vmem:[#allocation7_spill] sm:$0xff]  ;;  %v7192_v37 = vld [vmem:[#allocation12_spill] sm:$0xff] }
 0x65b   :  { %2274 = vmatpush.msra.mxu2 %v5316_v7  ;;  %2294 = vmatpush.msra.mxu3 %v5311_v53  ;;  %v7193_v53 = vld [vmem:[#allocation13_spill] sm:$0xff]  ;;  %v7194_v7 = vld [vmem:[#allocation11_spill] sm:$0xff] }
 0x65c   :  { %2235 = vmatpush.msrb.mxu0 %v5327_v41  ;;  %2255 = vmatpush.msra.mxu1 %v5332_v47  ;;  %v7195_v41 = vld [vmem:[#allocation19_spill] sm:$0xff]  ;;  %v7196_v47 = vld [vmem:[#allocation16_spill] sm:$0xff] }
 0x65d   :  { %2275 = vmatpush.msra.mxu2 %v5344_v61  ;;  %2295 = vmatpush.msra.mxu3 %v5337_v49  ;;  %v7197_v49 = vld [vmem:[#allocation23_spill] sm:$0xff]  ;;  %v7198_v61 = vld [vmem:[#allocation20_spill] sm:$0xff] }
 0x65e   :  { %2236 = vmatpush.msrb.mxu0 %v5349_v2  ;;  %2256 = vmatpush.msra.mxu1 %v5354_v4  ;;  %v7199_v2 = vld [vmem:[#allocation15_spill] sm:$0xff]  ;;  %v7200_v4 = vld [vmem:[#allocation22_spill] sm:$0xff] }
 0x65f   :  { %2276 = vmatpush.msra.mxu2 %v5368_v11  ;;  %2296 = vmatpush.msra.mxu3 %v5360_v58  ;;  %v7201_v58 = vld [vmem:[#allocation26_spill] sm:$0xff]  ;;  %v7202_v11 = vld [vmem:[#allocation17_spill] sm:$0xff] }
 0x660   :  { %2237 = vmatpush.msrb.mxu0 %v5373_v0  ;;  %2257 = vmatpush.msra.mxu1 %v5378_v5  ;;  %v7203_v0 = vld [vmem:[#allocation18_spill] sm:$0xff]  ;;  %v7204_v5 = vld [vmem:[#allocation24_spill] sm:$0xff] }
 0x661   :  { %2277 = vmatpush.msra.mxu2 %v5438_v23  ;;  %2297 = vmatpush.msra.mxu3 %v5397_v3  ;;  %v7207_v3 = vld [vmem:[#allocation57_spill] sm:$0xff] }
 0x662   :  { %2238 = vmatpush.msrb.mxu0 %v5387_v60  ;;  %2258 = vmatpush.msra.mxu1 %v5392_v10  ;;  %v7205_v60 = vld [vmem:[#allocation25_spill] sm:$0xff] }
 0x663   :  { %2278 = vmatpush.msra.mxu2 %v5450_v1  ;;  %2298 = vmatpush.msra.mxu3 %v5413_v8  ;;  %v7206_v10 = vld [vmem:[#allocation21_spill] sm:$0xff] }
 0x664   :  { %2239 = vmatpush.msrb.mxu0 %v5403_v57  ;;  %2259 = vmatpush.msra.mxu1 %v5408_v63  ;;  %v7208_v57 = vld [vmem:[#allocation30_spill] sm:$0xff]  ;;  %v7209_v8 = vld [vmem:[#allocation37_spill] sm:$0xff] }
 0x665   :  { %2279 = vmatpush.msra.mxu2 %v7181_v14  ;;  %2299 = vmatpush.msra.mxu3 %v7182_v35  ;;  %v1646_v63 = vadd.f32 %v7208_v57, %v7207_v3  ;;  %v1687_v22 = vadd.f32 %v7210_v48, %v7209_v8 }
 0x666   :  { %2240 = vmatpush.msrb.mxu0 %v7183_v18  ;;  %2260 = vmatpush.msra.mxu1 %v7184_v33 }
 0x667   :  { %2280 = vmatpush.msra.mxu2 %v7185_v28  ;;  %2300 = vmatpush.msra.mxu3 %v7186_v34 }
 0x668   :  { %2241 = vmatpush.msrb.mxu0 %v7187_v38  ;;  %2261 = vmatpush.msra.mxu1 %v7188_v42 }
 0x669   :  { %2281 = vmatpush.msra.mxu2 %v7189_v30  ;;  %2301 = vmatpush.msra.mxu3 %v7190_v9 }
 0x66a   :  { %2242 = vmatpush.msrb.mxu0 %v7191_v27  ;;  %2262 = vmatpush.msra.mxu1 %v7192_v37 }
 0x66b   :  { %2282 = vmatpush.msra.mxu2 %v7193_v53  ;;  %2302 = vmatpush.msra.mxu3 %v7194_v7 }
 0x66c   :  { %2243 = vmatpush.msrb.mxu0 %v7195_v41  ;;  %2263 = vmatpush.msra.mxu1 %v7196_v47 }
 0x66d   :  { %2283 = vmatpush.msra.mxu2 %v7197_v49  ;;  %2303 = vmatpush.msra.mxu3 %v7198_v61 }
 0x66e   :  { %2244 = vmatpush.msrb.mxu0 %v7199_v2  ;;  %2264 = vmatpush.msra.mxu1 %v7200_v4 }
 0x66f   :  { %2284 = vmatpush.msra.mxu2 %v7201_v58  ;;  %2304 = vmatpush.msra.mxu3 %v7202_v11 }
 0x670   :  { %2245 = vmatpush.msrb.mxu0 %v7203_v0  ;;  %2265 = vmatpush.msra.mxu1 %v7204_v5 }
 0x671   :  { %2285 = vmatpush.msra.mxu2 %v7205_v60  ;;  %2305 = vmatpush.msra.mxu3 %v7206_v10 }
 0x6cd   :  { %v1953_v52 = vpop.f32.mrf.mxu0  ;;  %v1973_v23 = vpop.f32.mrf.mxu1 }
 0x6ce   :  { %v2016_v1 = vadd.f32 %v1953_v52, %v1646_v63  ;;  %v2017_v17 = vadd.f32 %v1973_v23, %v1687_v22  ;;  %v5914_v22 = vld [vmem:[%s6609_s5 + $0x1e8] sm:$0xff]  ;;  %v5920_v52 = vld [vmem:[%s6609_s5 + $0x1f0] sm:$0xff]  ;;  %v5926_v23 = vld [vmem:[%s6609_s5 + $0x1f8] sm:$0xff] }
 0x6d0   :  { %v3070_v50 = vmul.f32 -1.442695, %v2016_v1  ;;  %v3071_v39 = vmul.f32 -1.442695, %v2017_v17  ;;  %v5932_v1 = vld [vmem:[%s6609_s5 + $0x1c0] sm:$0xff]  ;;  %v5938_v17 = vld [vmem:[%s6609_s5 + $0x1c8] sm:$0xff] }
 0x6d2   :  { %3243 = vpow2.f32 %v3070_v50  ;;  %v5944_v50 = vld [vmem:[%s6609_s5 + $0x1d0] sm:$0xff] }
 0x6d3   :  { %3245 = vpow2.f32 %v3071_v39  ;;  %v5950_v39 = vld [vmem:[%s6609_s5 + $0x1d8] sm:$0xff] }
 0x6d4   :  { %v2013_v55 = vpop.f32.mrf.mxu3  ;;  %v1993_v31 = vpop.f32.mrf.mxu2 }
 0x6d5   :  { %v2019_v26 = vadd.f32 %v2013_v55, %v1769_v19  ;;  %v2018_v25 = vadd.f32 %v1993_v31, %v1728_v29  ;;  %v5962_v19 = vld [vmem:[%s6609_s5 + $0x1a8] sm:$0xff]  ;;  %v5968_v55 = vld [vmem:[%s6609_s5 + $0x1b0] sm:$0xff]  ;;  %v6028_v29 = vld [vmem:[%s6609_s5 + $0x140] sm:$0xff] }
 0x6d6   :  { %v6010_v31 = vld [vmem:[%s6609_s5 + $0x168] sm:$0xff] }
 0x6d7   :  { %v3072_v16 = vmul.f32 -1.442695, %v2019_v26  ;;  %v5974_v26 = vld [vmem:[%s6609_s5 + $0x1b8] sm:$0xff] }
 0x6d8   :  { %v3244_v59 = vpop.eup %3243 }
 0x6d9   :  { %v3246_v44 = vpop.eup %3245  ;;  %v2023_v56 = vadd.f32 1.0, %v3244_v59  ;;  %3247 = vpow2.f32 %v3072_v16  ;;  %v5980_v16 = vld [vmem:[%s6609_s5 + $0x180] sm:$0xff]  ;;  %v5986_v59 = vld [vmem:[%s6609_s5 + $0x188] sm:$0xff] }
 0x6da   :  { %v2042_v24 = vadd.f32 1.0, %v3246_v44  ;;  %v5992_v44 = vld [vmem:[%s6609_s5 + $0x190] sm:$0xff] }
 0x6db   :  { %3249 = vrcp.f32 %v2023_v56  ;;  %v2035_v32 = vand.u32 2147483648, %v2023_v56  ;;  %v2033_v35 = vand.u32 2147483647, %v2023_v56  ;;  %vm2029_vm15 = vweird.f32 %v2023_v56 }
 0x6dc   :  { %3251 = vrcp.f32 %v2042_v24  ;;  %v2054_v40 = vand.u32 2147483648, %v2042_v24  ;;  %v2052_v33 = vand.u32 2147483647, %v2042_v24  ;;  %vm2048_vm0 = vweird.f32 %v2042_v24 }
 0x6dd   :  { %v2036_v38 = vor.u32 1.1754944e-38, %v2035_v32  ;;  %vm2034_vm3 = vcmp.eq.f32.partialorder %v2033_v35, 8.507059e+37  ;;  %v6082_v32 = vld [vmem:[%s6609_s5 + $0x108] sm:$0xff]  ;;  %v6100_v35 = vld [vmem:[%s6609_s5 + $0xe0] sm:$0xff] }
 0x6de   :  { %v2055_v9 = vor.u32 1.1754944e-38, %v2054_v40  ;;  %vm2053_vm4 = vcmp.eq.f32.partialorder %v2052_v33, 8.507059e+37  ;;  %v6088_v40 = vld [vmem:[%s6609_s5 + $0x110] sm:$0xff] }
 0x6df   :  { %v3248_v6 = vpop.eup %3247  ;;  %v6112_v33 = vld [vmem:[%s6609_s5 + $0xf0] sm:$0xff] }
 0x6e0   :  { %v2062_v54 = vadd.f32 1.0, %v3248_v6  ;;  %v6016_v6 = vld [vmem:[%s6609_s5 + $0x170] sm:$0xff] }
 0x6e1   :  { %v3250_v36 = vpop.eup %3249 }
 0x6e2   :  { %v3252_v51 = vpop.eup %3251  ;;  %v2025_v21 = vmul.f32 %v3250_v36, %v2023_v56  ;;  %3253 = vrcp.f32 %v2062_v54  ;;  %vm2030_vm13 = vweird.f32 %v3250_v36  ;;  %v2074_v11 = vand.u32 2147483648, %v2062_v54  ;;  %v5998_v56 = vld [vmem:[%s6609_s5 + $0x198] sm:$0xff] }
 0x6e3   :  { %v2044_v45 = vmul.f32 %v3252_v51, %v2042_v24  ;;  %3255 = vtanh.f32 %v2018_v25  ;;  %vm2049_vm14 = vweird.f32 %v3252_v51  ;;  %vm2031_vm1 = vmor %vm2029_vm15, %vm2030_vm13  ;;  %vm2068_vm6 = vweird.f32 %v2062_v54  ;;  %v6004_v24 = vld [vmem:[%s6609_s5 + $0x160] sm:$0xff]  ;;  %v6046_v25 = vld [vmem:[%s6609_s5 + $0x158] sm:$0xff] }
 0x6e4   :  { %v2026_v62 = vsub.f32 1.0, %v2025_v21  ;;  %vm2050_vm2 = vmor %vm2048_vm0, %vm2049_vm14  ;;  %v2072_v0 = vand.u32 2147483647, %v2062_v54  ;;  %v2075_v10 = vor.u32 1.1754944e-38, %v2074_v11  ;;  %v6058_v21 = vld [vmem:[%s6609_s5 + $0x128] sm:$0xff]  ;;  %v6214_v11 = vld [vmem:[%s6609_s5 + $0x78] sm:$0xff] }
 0x6e5   :  { %v2045_v15 = vsub.f32 1.0, %v2044_v45  ;;  %v6064_v45 = vld [vmem:[%s6609_s5 + $0x130] sm:$0xff]  ;;  %7228 = vst [vmem:[#allocation11_spill] sm:$0xff] %v6214_v11 }
 0x6e6   :  { %v2027_v14 = vmul.f32 %v3250_v36, %v2026_v62  ;;  %vm2073_vm8 = vcmp.eq.f32.partialorder %v2072_v0, 8.507059e+37  ;;  %v6070_v62 = vld [vmem:[%s6609_s5 + $0x138] sm:$0xff]  ;;  %v6220_v0 = vld [vmem:[%s6609_s5 + $0x40] sm:$0xff] }
 0x6e7   :  { %v2046_v18 = vmul.f32 %v3252_v51, %v2045_v15  ;;  %v6076_v15 = vld [vmem:[%s6609_s5 + $0x100] sm:$0xff]  ;;  %7229 = vst [vmem:[#allocation19_spill] sm:$0xff] %v6220_v0 }
 0x6e8   :  { %v3254_v28 = vpop.eup %3253  ;;  %v2028_v34 = vadd.f32 %v3250_v36, %v2027_v14  ;;  %v6094_v14 = vld [vmem:[%s6609_s5 + $0x118] sm:$0xff] }
 0x6e9   :  { %v2047_v42 = vadd.f32 %v3252_v51, %v2046_v18  ;;  %v2064_v30 = vmul.f32 %v3254_v28, %v2062_v54  ;;  %v3256_v37 = vpop.eup %3255  ;;  %vm2069_vm5 = vweird.f32 %v3254_v28  ;;  %v6034_v54 = vld [vmem:[%s6609_s5 + $0x148] sm:$0xff] }
 0x6ea   :  { %v2032_v27 = vsel %vm2031_vm1, %v3250_v36, %v2028_v34  ;;  %vm2070_vm7 = vmor %vm2068_vm6, %vm2069_vm5  ;;  %v6040_v36 = vld [vmem:[%s6609_s5 + $0x150] sm:$0xff]  ;;  %v6106_v18 = vld [vmem:[%s6609_s5 + $0xe8] sm:$0xff] }
 0x6eb   :  { %v2037_v53 = vsel %vm2034_vm3, %v2036_v38, %v2032_v27  ;;  %v2051_v7 = vsel %vm2050_vm2, %v3252_v51, %v2047_v42  ;;  %v2065_v41 = vsub.f32 1.0, %v2064_v30  ;;  %v6052_v51 = vld [vmem:[%s6609_s5 + $0x120] sm:$0xff]  ;;  %v6130_v38 = vld [vmem:[%s6609_s5 + $0xc8] sm:$0xff]  ;;  %v6136_v42 = vld [vmem:[%s6609_s5 + $0xd0] sm:$0xff] }
 0x6ec   :  { %v2056_v47 = vsel %vm2053_vm4, %v2055_v9, %v2051_v7  ;;  %v2079_v49 = vmul.f32 %v3256_v37, %v2037_v53  ;;  %v6124_v34 = vld [vmem:[%s6609_s5 + $0xc0] sm:$0xff]  ;;  %7215 = vst [vmem:[#allocation14_spill] sm:$0xff] %v6136_v42  ;;  %v6142_v30 = vld [vmem:[%s6609_s5 + $0xd8] sm:$0xff]  ;;  %v6154_v27 = vld [vmem:[%s6609_s5 + $0xa8] sm:$0xff] }
 0x6ed   :  { %v2078_v61 = vmul.f32 %v2056_v47, %v5826_v13  ;;  %v2066_v2 = vmul.f32 %v3254_v28, %v2065_v41  ;;  %v5908_v13 = vld [vmem:[%s6609_s5 + $0x1e0] sm:$0xff]  ;;  %7216 = vst [vmem:[#allocation42_spill] sm:$0xff] %v6142_v30  ;;  %v6160_v37 = vld [vmem:[%s6609_s5 + $0xb0] sm:$0xff]  ;;  %v6166_v53 = vld [vmem:[%s6609_s5 + $0xb8] sm:$0xff] }
 0x6ee   :  { %v6148_v9 = vld [vmem:[%s6609_s5 + $0xa0] sm:$0xff]  ;;  %7218 = vst [vmem:[#allocation40_spill] sm:$0xff] %v6154_v27  ;;  %v6178_v41 = vld [vmem:[%s6609_s5 + $0x88] sm:$0xff]  ;;  %v6184_v47 = vld [vmem:[%s6609_s5 + $0x90] sm:$0xff] }
 0x6ef   :  { %v5902_v4 = vadd.f32 %v2079_v49, %v2078_v61  ;;  %v2067_v58 = vadd.f32 %v3254_v28, %v2066_v2  ;;  %7217 = vst [vmem:[#allocation41_spill] sm:$0xff] %v6148_v9  ;;  %v6172_v7 = vld [vmem:[%s6609_s5 + $0x80] sm:$0xff]  ;;  %v6190_v49 = vld [vmem:[%s6609_s5 + $0x98] sm:$0xff]  ;;  %v6202_v2 = vld [vmem:[%s6609_s5 + $0x68] sm:$0xff] }
 0x6f0   :  { %7219 = vst [vmem:[#allocation6_spill] sm:$0xff] %v6160_v37  ;;  %v6196_v61 = vld [vmem:[%s6609_s5 + $0x60] sm:$0xff] }
 0x6f1   :  { %3257 = vtanh.f32 %v5902_v4  ;;  %v2071_v5 = vsel %vm2070_vm7, %v3254_v28, %v2067_v58  ;;  %v6118_v28 = vld [vmem:[%s6609_s5 + $0xf8] sm:$0xff]  ;;  %7220 = vst [vmem:[#allocation43_spill] sm:$0xff] %v6166_v53  ;;  %v6208_v58 = vld [vmem:[%s6609_s5 + $0x70] sm:$0xff] }
 0x6f2   :  { %v2076_v63 = vsel %vm2073_vm8, %v2075_v10, %v2071_v5  ;;  %7221 = vst [vmem:[#allocation45_spill] sm:$0xff] %v6172_v7  ;;  %v6226_v5 = vld [vmem:[%s6609_s5 + $0x48] sm:$0xff]  ;;  %v6232_v10 = vld [vmem:[%s6609_s5 + $0x50] sm:$0xff] }
 0x6f3   :  { %7222 = vst [vmem:[#allocation44_spill] sm:$0xff] %v6178_v41 }
 0x6f4   :  { %7223 = vst [vmem:[#allocation9_spill] sm:$0xff] %v6184_v47 }
 0x6f5   :  { %7224 = vst [vmem:[#allocation7_spill] sm:$0xff] %v6190_v49 }
 0x6f6   :  { %7225 = vst [vmem:[#allocation8_spill] sm:$0xff] %v6196_v61 }
 0x6f7   :  { %v3258_v57 = vpop.eup %3257  ;;  %7226 = vst [vmem:[#allocation12_spill] sm:$0xff] %v6202_v2 }
 0x6f8   :  { %v2082_v48 = vmul.f32 %v3258_v57, %v2076_v63  ;;  %7227 = vst [vmem:[#allocation13_spill] sm:$0xff] %v6208_v58  ;;  %v6238_v57 = vld [vmem:[%s6609_s5 + $0x58] sm:$0xff]  ;;  %v6244_v63 = vld [vmem:[%s6609_s5 + $0x20] sm:$0xff] }
 0x6f9   :  { %7230 = vst [vmem:[#allocation16_spill] sm:$0xff] %v6226_v5 }
 0x6fa   :  { %2099 = vmatmul.f32.vlgmr.msra.gmra.mxu0 %v2082_v48  ;;  %2119 = vmatmul.f32.vlgmr.msrb.gmra.mxu1 %v2082_v48  ;;  %7231 = vst [vmem:[#allocation23_spill] sm:$0xff] %v6232_v10 }
 0x6fb   :  { %2139 = vmatmul.f32.vlgmr.msrb.gmra.mxu2 %v2082_v48  ;;  %2159 = vmatmul.f32.vlgmr.msrb.gmra.mxu3 %v2082_v48  ;;  %7232 = vst [vmem:[#allocation20_spill] sm:$0xff] %v6238_v57  ;;  %v6250_v48 = vld [vmem:[%s6609_s5 + $0x28] sm:$0xff] }
 0x6fc   :  { %2377 = vmatpush.msra.mxu0 %v5908_v13  ;;  %2397 = vmatpush.msrb.mxu1 %v5914_v22  ;;  %7233 = vst [vmem:[#allocation15_spill] sm:$0xff] %v6244_v63 }
 0x6fd   :  { %2417 = vmatpush.msrb.mxu2 %v5920_v52  ;;  %2437 = vmatpush.msrb.mxu3 %v5926_v23  ;;  %7234 = vst [vmem:[#allocation22_spill] sm:$0xff] %v6250_v48 }
 0x6fe   :  { %2378 = vmatpush.msra.mxu0 %v5932_v1  ;;  %2398 = vmatpush.msrb.mxu1 %v5938_v17 }
 0x6ff   :  { %2418 = vmatpush.msrb.mxu2 %v5944_v50  ;;  %2438 = vmatpush.msrb.mxu3 %v5950_v39 }
 0x700   :  { %2379 = vmatpush.msra.mxu0 %v5956_v12  ;;  %2399 = vmatpush.msrb.mxu1 %v5962_v19 }
 0x701   :  { %2419 = vmatpush.msrb.mxu2 %v5968_v55  ;;  %2439 = vmatpush.msrb.mxu3 %v5974_v26 }
 0x702   :  { %2380 = vmatpush.msra.mxu0 %v5980_v16  ;;  %2400 = vmatpush.msrb.mxu1 %v5986_v59 }
 0x703   :  { %2420 = vmatpush.msrb.mxu2 %v5992_v44  ;;  %2440 = vmatpush.msrb.mxu3 %v5998_v56 }
 0x704   :  { %2381 = vmatpush.msra.mxu0 %v6004_v24  ;;  %2401 = vmatpush.msrb.mxu1 %v6010_v31 }
 0x705   :  { %2421 = vmatpush.msrb.mxu2 %v6016_v6  ;;  %2441 = vmatpush.msrb.mxu3 %v6022_v46 }
 0x706   :  { %2382 = vmatpush.msra.mxu0 %v6028_v29  ;;  %2402 = vmatpush.msrb.mxu1 %v6034_v54 }
 0x707   :  { %2422 = vmatpush.msrb.mxu2 %v6040_v36  ;;  %2442 = vmatpush.msrb.mxu3 %v6046_v25 }
 0x708   :  { %2383 = vmatpush.msra.mxu0 %v6052_v51  ;;  %2403 = vmatpush.msrb.mxu1 %v6058_v21 }
 0x709   :  { %2423 = vmatpush.msrb.mxu2 %v6064_v45  ;;  %2443 = vmatpush.msrb.mxu3 %v6070_v62 }
 0x70a   :  { %2384 = vmatpush.msra.mxu0 %v6076_v15  ;;  %2404 = vmatpush.msrb.mxu1 %v6082_v32 }
 0x70b   :  { %2424 = vmatpush.msrb.mxu2 %v6088_v40  ;;  %2444 = vmatpush.msrb.mxu3 %v6094_v14 }
 0x70c   :  { %2385 = vmatpush.msra.mxu0 %v6100_v35  ;;  %2405 = vmatpush.msrb.mxu1 %v6106_v18 }
 0x70d   :  { %2425 = vmatpush.msrb.mxu2 %v6112_v33  ;;  %2445 = vmatpush.msrb.mxu3 %v6118_v28 }
 0x70e   :  { %2386 = vmatpush.msra.mxu0 %v6124_v34  ;;  %2406 = vmatpush.msrb.mxu1 %v6130_v38 }
 0x70f   :  { %2426 = vmatpush.msrb.mxu2 %v6136_v42  ;;  %2446 = vmatpush.msrb.mxu3 %v6142_v30 }
 0x710   :  { %2387 = vmatpush.msra.mxu0 %v6148_v9  ;;  %2407 = vmatpush.msrb.mxu1 %v6154_v27 }
 0x711   :  { %2427 = vmatpush.msrb.mxu2 %v6160_v37  ;;  %2447 = vmatpush.msrb.mxu3 %v6166_v53 }
 0x712   :  { %2388 = vmatpush.msra.mxu0 %v6172_v7  ;;  %2408 = vmatpush.msrb.mxu1 %v6178_v41 }
 0x713   :  { %2428 = vmatpush.msrb.mxu2 %v6184_v47  ;;  %2448 = vmatpush.msrb.mxu3 %v6190_v49 }
 0x714   :  { %2389 = vmatpush.msra.mxu0 %v6196_v61  ;;  %2409 = vmatpush.msrb.mxu1 %v6202_v2 }
 0x715   :  { %2429 = vmatpush.msrb.mxu2 %v6208_v58  ;;  %2449 = vmatpush.msrb.mxu3 %v6214_v11 }
 0x716   :  { %2390 = vmatpush.msra.mxu0 %v6220_v0  ;;  %2410 = vmatpush.msrb.mxu1 %v6226_v5 }
 0x717   :  { %2430 = vmatpush.msrb.mxu2 %v6232_v10  ;;  %2450 = vmatpush.msrb.mxu3 %v6238_v57  ;;  %v6256_v10 = vld [vmem:[%s6609_s5 + $0x30] sm:$0xff]  ;;  %v6262_v57 = vld [vmem:[%s6609_s5 + $0x38] sm:$0xff] }
 0x718   :  { %2391 = vmatpush.msra.mxu0 %v6244_v63  ;;  %2411 = vmatpush.msrb.mxu1 %v6250_v48  ;;  %7235 = vst [vmem:[#allocation26_spill] sm:$0xff] %v6256_v10  ;;  %v6268_v63 = vld [vmem:[%s6609_s5] sm:$0xff]  ;;  %v6274_v48 = vld [vmem:[%s6609_s5 + $0x8] sm:$0xff] }
 0x719   :  { %2431 = vmatpush.msrb.mxu2 %v6256_v10  ;;  %7236 = vst [vmem:[#allocation17_spill] sm:$0xff] %v6262_v57  ;;  %2451 = vmatpush.msrb.mxu3 %v6262_v57  ;;  %v6281_v57 = vld [vmem:[%s6609_s5 + $0x18] sm:$0xff] }
 0x71a   :  { %7237 = vst [vmem:[#allocation18_spill] sm:$0xff] %v6268_v63  ;;  %2392 = vmatpush.msra.mxu0 %v6268_v63  ;;  %2412 = vmatpush.msrb.mxu1 %v6274_v48  ;;  %v7240_v10 = vld [vmem:[#allocation33_spill] sm:$0xff]  ;;  %v7241_v63 = vld [vmem:[#allocation32_spill] sm:$0xff] }
 0x71b   :  { %7238 = vst [vmem:[#allocation24_spill] sm:$0xff] %v6274_v48  ;;  %2432 = vmatpush.msrb.mxu2 %v7205_v60  ;;  %2452 = vmatpush.msrb.mxu3 %v6281_v57  ;;  %v1649_v5 = vadd.f32 %v7240_v10, %v7207_v3  ;;  %v1690_v0 = vadd.f32 %v7241_v63, %v7209_v8  ;;  %v7242_v60 = vld [vmem:[#allocation47_spill] sm:$0xff] }
 0x71c   :  { %7239 = vst [vmem:[#allocation25_spill] sm:$0xff] %v6281_v57  ;;  %v1772_v47 = vadd.f32 %v7242_v60, %v7211_v43 }
 0x777   :  { %v2100_v11 = vpop.f32.mrf.mxu0  ;;  %v2120_v58 = vpop.f32.mrf.mxu1 }
 0x778   :  { %v2163_v2 = vadd.f32 %v2100_v11, %v1649_v5  ;;  %v2164_v61 = vadd.f32 %v2120_v58, %v1690_v0 }
 0x77a   :  { %v3073_v48 = vmul.f32 -1.442695, %v2163_v2  ;;  %v3074_v49 = vmul.f32 -1.442695, %v2164_v61  ;;  %v7243_v2 = vld [vmem:[#allocation46_spill] sm:$0xff] }
 0x77b   :  { %v1731_v61 = vadd.f32 %v7243_v2, %v7213_v20 }
 0x77c   :  { %3259 = vpow2.f32 %v3073_v48 }
 0x77d   :  { %3261 = vpow2.f32 %v3074_v49 }
 0x77e   :  { %v2160_v41 = vpop.f32.mrf.mxu3  ;;  %v2140_v63 = vpop.f32.mrf.mxu2 }
 0x77f   :  { %v2166_v7 = vadd.f32 %v2160_v41, %v1772_v47  ;;  %v2165_v5 = vadd.f32 %v2140_v63, %v1731_v61 }
 0x781   :  { %v3075_v57 = vmul.f32 -1.442695, %v2166_v7 }
 0x782   :  { %v3260_v53 = vpop.eup %3259 }
 0x783   :  { %v3262_v37 = vpop.eup %3261  ;;  %v2170_v10 = vadd.f32 1.0, %v3260_v53  ;;  %3263 = vpow2.f32 %v3075_v57 }
 0x784   :  { %v2189_v3 = vadd.f32 1.0, %v3262_v37 }
 0x785   :  { %3265 = vrcp.f32 %v2170_v10  ;;  %v2182_v60 = vand.u32 2147483648, %v2170_v10  ;;  %v2180_v57 = vand.u32 2147483647, %v2170_v10  ;;  %vm2176_vm11 = vweird.f32 %v2170_v10 }
 0x786   :  { %3267 = vrcp.f32 %v2189_v3  ;;  %v2201_v53 = vand.u32 2147483648, %v2189_v3  ;;  %v2199_v8 = vand.u32 2147483647, %v2189_v3  ;;  %vm2195_vm12 = vweird.f32 %v2189_v3 }
 0x787   :  { %v2183_v63 = vor.u32 1.1754944e-38, %v2182_v60  ;;  %vm2181_vm15 = vcmp.eq.f32.partialorder %v2180_v57, 8.507059e+37 }
 0x788   :  { %vm2200_vm0 = vcmp.eq.f32.partialorder %v2199_v8, 8.507059e+37 }
 0x789   :  { %v3264_v11 = vpop.eup %3263 }
 0x78a   :  { %v2209_v58 = vadd.f32 1.0, %v3264_v11 }
 0x78b   :  { %v3266_v0 = vpop.eup %3265 }
 0x78c   :  { %v3268_v48 = vpop.eup %3267  ;;  %v2172_v49 = vmul.f32 %v3266_v0, %v2170_v10  ;;  %3269 = vrcp.f32 %v2209_v58  ;;  %vm2177_vm9 = vweird.f32 %v3266_v0  ;;  %vm2215_vm2 = vweird.f32 %v2209_v58 }
 0x78d   :  { %v2191_v41 = vmul.f32 %v3268_v48, %v2189_v3  ;;  %3271 = vtanh.f32 %v2165_v5  ;;  %vm2196_vm10 = vweird.f32 %v3268_v48  ;;  %vm2178_vm13 = vmor %vm2176_vm11, %vm2177_vm9 }
 0x78e   :  { %v2173_v7 = vsub.f32 1.0, %v2172_v49  ;;  %vm2197_vm14 = vmor %vm2195_vm12, %vm2196_vm10  ;;  %v2202_v49 = vor.u32 1.1754944e-38, %v2201_v53 }
 0x78f   :  { %v2192_v47 = vsub.f32 1.0, %v2191_v41 }
 0x790   :  { %v2174_v37 = vmul.f32 %v3266_v0, %v2173_v7 }
 0x791   :  { %v2193_v43 = vmul.f32 %v3268_v48, %v2192_v47 }
 0x792   :  { %v3270_v27 = vpop.eup %3269  ;;  %v2175_v2 = vadd.f32 %v3266_v0, %v2174_v37 }
 0x793   :  { %v2194_v11 = vadd.f32 %v3268_v48, %v2193_v43  ;;  %v2211_v61 = vmul.f32 %v3270_v27, %v2209_v58  ;;  %v3272_v5 = vpop.eup %3271  ;;  %vm2216_vm1 = vweird.f32 %v3270_v27  ;;  %v2221_v43 = vand.u32 2147483648, %v2209_v58 }
 0x794   :  { %v2179_v41 = vsel %vm2178_vm13, %v3266_v0, %v2175_v2  ;;  %v2219_v0 = vand.u32 2147483647, %v2209_v58  ;;  %vm2217_vm3 = vmor %vm2215_vm2, %vm2216_vm1  ;;  %v7250_v58 = vld [vmem:[#allocation45_spill] sm:$0xff]  ;;  %v7251_v2 = vld [vmem:[#allocation44_spill] sm:$0xff] }
 0x795   :  { %v2184_v20 = vsel %vm2181_vm15, %v2183_v63, %v2179_v41  ;;  %v2198_v7 = vsel %vm2197_vm14, %v3268_v48, %v2194_v11  ;;  %v2212_v9 = vsub.f32 1.0, %v2211_v61  ;;  %v2222_v53 = vor.u32 1.1754944e-38, %v2221_v43  ;;  %v7252_v63 = vld [vmem:[#allocation9_spill] sm:$0xff]  ;;  %v7253_v11 = vld [vmem:[#allocation7_spill] sm:$0xff]  ;;  %v7254_v61 = vld [vmem:[#allocation8_spill] sm:$0xff] }
 0x796   :  { %v2203_v47 = vsel %vm2200_vm0, %v2202_v49, %v2198_v7  ;;  %v2226_v30 = vmul.f32 %v3272_v5, %v2184_v20  ;;  %vm2220_vm4 = vcmp.eq.f32.partialorder %v2219_v0, 8.507059e+37  ;;  %v7244_v20 = vld [vmem:[#allocation14_spill] sm:$0xff]  ;;  %v7255_v49 = vld [vmem:[#allocation12_spill] sm:$0xff]  ;;  %v7256_v41 = vld [vmem:[#allocation13_spill] sm:$0xff] }
 0x797   :  { %v2225_v42 = vmul.f32 %v2203_v47, %v5902_v4  ;;  %v2213_v37 = vmul.f32 %v3270_v27, %v2212_v9  ;;  %v7245_v4 = vld [vmem:[#allocation42_spill] sm:$0xff]  ;;  %v7257_v5 = vld [vmem:[#allocation11_spill] sm:$0xff]  ;;  %v7259_v47 = vld [vmem:[#allocation16_spill] sm:$0xff] }
 0x798   :  { %v7248_v9 = vld [vmem:[#allocation6_spill] sm:$0xff]  ;;  %v7258_v7 = vld [vmem:[#allocation19_spill] sm:$0xff] }
 0x799   :  { %v6293_v10 = vadd.f32 %v2226_v30, %v2225_v42  ;;  %v2214_v3 = vadd.f32 %v3270_v27, %v2213_v37  ;;  %v7246_v42 = vld [vmem:[#allocation41_spill] sm:$0xff]  ;;  %v7247_v30 = vld [vmem:[#allocation40_spill] sm:$0xff]  ;;  %v7260_v37 = vld [vmem:[#allocation23_spill] sm:$0xff] }
 0x79a   :  { %v7262_v43 = vld [vmem:[#allocation15_spill] sm:$0xff]  ;;  %v7263_v0 = vld [vmem:[#allocation22_spill] sm:$0xff] }
 0x79b   :  { %3273 = vtanh.f32 %v6293_v10  ;;  %v2218_v60 = vsel %vm2217_vm3, %v3270_v27, %v2214_v3  ;;  %v7249_v27 = vld [vmem:[#allocation43_spill] sm:$0xff]  ;;  %v7261_v3 = vld [vmem:[#allocation20_spill] sm:$0xff] }
 0x79c   :  { %v2223_v48 = vsel %vm2220_vm4, %v2222_v53, %v2218_v60  ;;  %v7264_v60 = vld [vmem:[#allocation26_spill] sm:$0xff]  ;;  %v7265_v53 = vld [vmem:[#allocation17_spill] sm:$0xff] }
 0x7a1   :  { %v3274_v8 = vpop.eup %3273 }
 0x7a2   :  { %v2229_v57 = vmul.f32 %v3274_v8, %v2223_v48  ;;  %v7266_v8 = vld [vmem:[#allocation18_spill] sm:$0xff]  ;;  %v7267_v48 = vld [vmem:[#allocation24_spill] sm:$0xff] }
 0x7a4   :  { %2246 = vmatmul.f32.vlgmr.msrb.gmra.mxu0 %v2229_v57  ;;  %2266 = vmatmul.f32.vlgmr.msra.gmra.mxu1 %v2229_v57 }
 0x7a5   :  { %2286 = vmatmul.f32.vlgmr.msra.gmra.mxu2 %v2229_v57  ;;  %2306 = vmatmul.f32.vlgmr.msra.gmra.mxu3 %v2229_v57  ;;  %v6361_v57 = vld [vmem:[%s6609_s5 + $0x10] sm:$0xff] }
 0x7a6   :  { %2524 = vmatpush.msrb.mxu0 %v5908_v13  ;;  %2544 = vmatpush.msra.mxu1 %v5914_v22  ;;  %7268 = vst [vmem:[#allocation21_spill] sm:$0xff] %v6361_v57 }
 0x7a7   :  { %2564 = vmatpush.msra.mxu2 %v5920_v52  ;;  %2584 = vmatpush.msra.mxu3 %v5926_v23 }
 0x7a8   :  { %2525 = vmatpush.msrb.mxu0 %v5932_v1  ;;  %2545 = vmatpush.msra.mxu1 %v5938_v17 }
 0x7a9   :  { %2565 = vmatpush.msra.mxu2 %v5944_v50  ;;  %2585 = vmatpush.msra.mxu3 %v5950_v39 }
 0x7aa   :  { %2526 = vmatpush.msrb.mxu0 %v5956_v12  ;;  %2546 = vmatpush.msra.mxu1 %v5962_v19 }
 0x7ab   :  { %2566 = vmatpush.msra.mxu2 %v5968_v55  ;;  %2586 = vmatpush.msra.mxu3 %v5974_v26 }
 0x7ac   :  { %2527 = vmatpush.msrb.mxu0 %v5980_v16  ;;  %2547 = vmatpush.msra.mxu1 %v5986_v59 }
 0x7ad   :  { %2567 = vmatpush.msra.mxu2 %v5992_v44  ;;  %2587 = vmatpush.msra.mxu3 %v5998_v56 }
 0x7ae   :  { %2528 = vmatpush.msrb.mxu0 %v6004_v24  ;;  %2548 = vmatpush.msra.mxu1 %v6010_v31 }
 0x7af   :  { %2568 = vmatpush.msra.mxu2 %v6016_v6  ;;  %2588 = vmatpush.msra.mxu3 %v6022_v46 }
 0x7b0   :  { %2529 = vmatpush.msrb.mxu0 %v6028_v29  ;;  %2549 = vmatpush.msra.mxu1 %v6034_v54 }
 0x7b1   :  { %2569 = vmatpush.msra.mxu2 %v6040_v36  ;;  %2589 = vmatpush.msra.mxu3 %v6046_v25 }
 0x7b2   :  { %2530 = vmatpush.msrb.mxu0 %v6052_v51  ;;  %2550 = vmatpush.msra.mxu1 %v6058_v21 }
 0x7b3   :  { %2570 = vmatpush.msra.mxu2 %v6064_v45  ;;  %2590 = vmatpush.msra.mxu3 %v6070_v62 }
 0x7b4   :  { %2531 = vmatpush.msrb.mxu0 %v6076_v15  ;;  %2551 = vmatpush.msra.mxu1 %v6082_v32 }
 0x7b5   :  { %2571 = vmatpush.msra.mxu2 %v6088_v40  ;;  %2591 = vmatpush.msra.mxu3 %v6094_v14 }
 0x7b6   :  { %2532 = vmatpush.msrb.mxu0 %v6100_v35  ;;  %2552 = vmatpush.msra.mxu1 %v6106_v18 }
 0x7b7   :  { %2572 = vmatpush.msra.mxu2 %v6112_v33  ;;  %2592 = vmatpush.msra.mxu3 %v6118_v28 }
 0x7b8   :  { %2533 = vmatpush.msrb.mxu0 %v6124_v34  ;;  %2553 = vmatpush.msra.mxu1 %v6130_v38 }
 0x7b9   :  { %2573 = vmatpush.msra.mxu2 %v7244_v20  ;;  %2593 = vmatpush.msra.mxu3 %v7245_v4 }
 0x7ba   :  { %2534 = vmatpush.msrb.mxu0 %v7246_v42  ;;  %2554 = vmatpush.msra.mxu1 %v7247_v30 }
 0x7bb   :  { %2574 = vmatpush.msra.mxu2 %v7248_v9  ;;  %2594 = vmatpush.msra.mxu3 %v7249_v27 }
 0x7bc   :  { %2535 = vmatpush.msrb.mxu0 %v7250_v58  ;;  %2555 = vmatpush.msra.mxu1 %v7251_v2 }
 0x7bd   :  { %2575 = vmatpush.msra.mxu2 %v7252_v63  ;;  %2595 = vmatpush.msra.mxu3 %v7253_v11  ;;  %v7275_v11 = vld [vmem:[#allocation56_spill] sm:$0xff] }
 0x7be   :  { %2536 = vmatpush.msrb.mxu0 %v7254_v61  ;;  %2556 = vmatpush.msra.mxu1 %v7255_v49  ;;  %v7274_v61 = vld [vmem:[#allocation3_spill] sm:$0xff] }
 0x7bf   :  { %2576 = vmatpush.msra.mxu2 %v7256_v41  ;;  %2596 = vmatpush.msra.mxu3 %v7257_v5  ;;  %v1775_v63 = vadd.f32 %v7275_v11, %v7274_v61 }
 0x7c0   :  { %2537 = vmatpush.msrb.mxu0 %v7258_v7  ;;  %2557 = vmatpush.msra.mxu1 %v7259_v47  ;;  %v7272_v47 = vld [vmem:[#allocation37_spill] sm:$0xff] }
 0x7c1   :  { %2577 = vmatpush.msra.mxu2 %v7260_v37  ;;  %2597 = vmatpush.msra.mxu3 %v7261_v3  ;;  %v7269_v3 = vld [vmem:[#allocation25_spill] sm:$0xff]  ;;  %v7271_v37 = vld [vmem:[#allocation27_spill] sm:$0xff] }
 0x7c2   :  { %2538 = vmatpush.msrb.mxu0 %v7262_v43  ;;  %2558 = vmatpush.msra.mxu1 %v7263_v0  ;;  %v7270_v43 = vld [vmem:[#allocation57_spill] sm:$0xff] }
 0x7c3   :  { %2578 = vmatpush.msra.mxu2 %v7264_v60  ;;  %2598 = vmatpush.msra.mxu3 %v7265_v53  ;;  %v1652_v0 = vadd.f32 %v7271_v37, %v7270_v43  ;;  %v7273_v60 = vld [vmem:[#allocation54_spill] sm:$0xff] }
 0x7c4   :  { %2539 = vmatpush.msrb.mxu0 %v7266_v8  ;;  %2559 = vmatpush.msra.mxu1 %v7267_v48  ;;  %v1693_v7 = vadd.f32 %v7273_v60, %v7272_v47 }
 0x7c5   :  { %2579 = vmatpush.msra.mxu2 %v6361_v57  ;;  %2599 = vmatpush.msra.mxu3 %v7269_v3 }
 0x821   :  { %v2247_v53 = vpop.f32.mrf.mxu0  ;;  %v2267_v5 = vpop.f32.mrf.mxu1 }
 0x822   :  { %v2310_v8 = vadd.f32 %v2247_v53, %v1652_v0  ;;  %v2311_v41 = vadd.f32 %v2267_v5, %v1693_v7  ;;  %v7276_v5 = vld [vmem:[#allocation39_spill] sm:$0xff]  ;;  %v7277_v7 = vld [vmem:[#allocation48_spill] sm:$0xff] }
 0x824   :  { %v3076_v48 = vmul.f32 -1.442695, %v2310_v8  ;;  %v3077_v49 = vmul.f32 -1.442695, %v2311_v41  ;;  %v1734_v41 = vadd.f32 %v7277_v7, %v7276_v5 }
 0x826   :  { %3275 = vpow2.f32 %v3076_v48 }
 0x827   :  { %3277 = vpow2.f32 %v3077_v49 }
 0x828   :  { %v2307_v57 = vpop.f32.mrf.mxu3  ;;  %v2287_v60 = vpop.f32.mrf.mxu2 }
 0x829   :  { %v2313_v2 = vadd.f32 %v2307_v57, %v1775_v63  ;;  %v2312_v48 = vadd.f32 %v2287_v60, %v1734_v41 }
 0x82b   :  { %v3078_v3 = vmul.f32 -1.442695, %v2313_v2 }
 0x82c   :  { %v3276_v58 = vpop.eup %3275 }
 0x82d   :  { %v3278_v27 = vpop.eup %3277  ;;  %v2317_v37 = vadd.f32 1.0, %v3276_v58  ;;  %3279 = vpow2.f32 %v3078_v3 }
 0x82e   :  { %v2336_v43 = vadd.f32 1.0, %v3278_v27 }
 0x82f   :  { %3281 = vrcp.f32 %v2317_v37  ;;  %v2329_v61 = vand.u32 2147483648, %v2317_v37  ;;  %v2327_v3 = vand.u32 2147483647, %v2317_v37  ;;  %vm2323_vm7 = vweird.f32 %v2317_v37 }
 0x830   :  { %3283 = vrcp.f32 %v2336_v43  ;;  %v2348_v58 = vand.u32 2147483648, %v2336_v43  ;;  %v2346_v9 = vand.u32 2147483647, %v2336_v43  ;;  %vm2342_vm8 = vweird.f32 %v2336_v43 }
 0x831   :  { %v2330_v60 = vor.u32 1.1754944e-38, %v2329_v61  ;;  %vm2328_vm11 = vcmp.eq.f32.partialorder %v2327_v3, 8.507059e+37 }
 0x832   :  { %vm2347_vm12 = vcmp.eq.f32.partialorder %v2346_v9, 8.507059e+37 }
 0x833   :  { %v3280_v0 = vpop.eup %3279 }
 0x834   :  { %v2356_v53 = vadd.f32 1.0, %v3280_v0 }
 0x835   :  { %v3282_v8 = vpop.eup %3281 }
 0x836   :  { %v3284_v11 = vpop.eup %3283  ;;  %v2319_v49 = vmul.f32 %v3282_v8, %v2317_v37  ;;  %3285 = vrcp.f32 %v2356_v53  ;;  %vm2324_vm5 = vweird.f32 %v3282_v8  ;;  %vm2362_vm14 = vweird.f32 %v2356_v53 }
 0x837   :  { %v2338_v63 = vmul.f32 %v3284_v11, %v2336_v43  ;;  %3287 = vtanh.f32 %v2312_v48  ;;  %vm2343_vm6 = vweird.f32 %v3284_v11  ;;  %vm2325_vm9 = vmor %vm2323_vm7, %vm2324_vm5  ;;  %v2366_v43 = vand.u32 2147483647, %v2356_v53 }
 0x838   :  { %v2320_v2 = vsub.f32 1.0, %v2319_v49  ;;  %vm2344_vm10 = vmor %vm2342_vm8, %vm2343_vm6  ;;  %v2349_v49 = vor.u32 1.1754944e-38, %v2348_v58 }
 0x839   :  { %v2339_v57 = vsub.f32 1.0, %v2338_v63  ;;  %vm2367_vm0 = vcmp.eq.f32.partialorder %v2366_v43, 8.507059e+37  ;;  %v7297_v43 = vld [vmem:[#allocation22_spill] sm:$0xff] }
 0x83a   :  { %v2321_v27 = vmul.f32 %v3282_v8, %v2320_v2 }
 0x83b   :  { %v2340_v47 = vmul.f32 %v3284_v11, %v2339_v57 }
 0x83c   :  { %v3286_v30 = vpop.eup %3285  ;;  %v2322_v7 = vadd.f32 %v3282_v8, %v2321_v27 }
 0x83d   :  { %v2341_v0 = vadd.f32 %v3284_v11, %v2340_v47  ;;  %v2358_v41 = vmul.f32 %v3286_v30, %v2356_v53  ;;  %v3288_v48 = vpop.eup %3287  ;;  %vm2363_vm13 = vweird.f32 %v3286_v30  ;;  %v2368_v47 = vand.u32 2147483648, %v2356_v53  ;;  %v7284_v53 = vld [vmem:[#allocation45_spill] sm:$0xff] }
 0x83e   :  { %v2326_v63 = vsel %vm2325_vm9, %v3282_v8, %v2322_v7  ;;  %vm2364_vm15 = vmor %vm2362_vm14, %vm2363_vm13  ;;  %v7285_v7 = vld [vmem:[#allocation44_spill] sm:$0xff] }
 0x83f   :  { %v2331_v5 = vsel %vm2328_vm11, %v2330_v60, %v2326_v63  ;;  %v2345_v2 = vsel %vm2344_vm10, %v3284_v11, %v2341_v0  ;;  %v2359_v42 = vsub.f32 1.0, %v2358_v41  ;;  %v2369_v58 = vor.u32 1.1754944e-38, %v2368_v47  ;;  %v7286_v60 = vld [vmem:[#allocation9_spill] sm:$0xff]  ;;  %v7287_v0 = vld [vmem:[#allocation7_spill] sm:$0xff]  ;;  %v7288_v41 = vld [vmem:[#allocation8_spill] sm:$0xff] }
 0x840   :  { %v2350_v57 = vsel %vm2347_vm12, %v2349_v49, %v2345_v2  ;;  %v2373_v4 = vmul.f32 %v3288_v48, %v2331_v5  ;;  %v7283_v5 = vld [vmem:[#allocation43_spill] sm:$0xff]  ;;  %v7289_v49 = vld [vmem:[#allocation12_spill] sm:$0xff]  ;;  %v7290_v63 = vld [vmem:[#allocation13_spill] sm:$0xff] }
 0x841   :  { %v2372_v20 = vmul.f32 %v2350_v57, %v6293_v10  ;;  %v2360_v27 = vmul.f32 %v3286_v30, %v2359_v42  ;;  %v7278_v10 = vld [vmem:[#allocation14_spill] sm:$0xff]  ;;  %v7281_v42 = vld [vmem:[#allocation40_spill] sm:$0xff]  ;;  %v7291_v48 = vld [vmem:[#allocation11_spill] sm:$0xff] }
 0x842   :  { %v7292_v2 = vld [vmem:[#allocation19_spill] sm:$0xff]  ;;  %v7293_v57 = vld [vmem:[#allocation16_spill] sm:$0xff] }
 0x843   :  { %v6374_v37 = vadd.f32 %v2373_v4, %v2372_v20  ;;  %v2361_v61 = vadd.f32 %v3286_v30, %v2360_v27  ;;  %v7279_v20 = vld [vmem:[#allocation42_spill] sm:$0xff]  ;;  %v7280_v4 = vld [vmem:[#allocation41_spill] sm:$0xff]  ;;  %v7294_v27 = vld [vmem:[#allocation23_spill] sm:$0xff] }
 0x844   :  { %v7296_v47 = vld [vmem:[#allocation15_spill] sm:$0xff] }
 0x845   :  { %3289 = vtanh.f32 %v6374_v37  ;;  %v2365_v8 = vsel %vm2364_vm15, %v3286_v30, %v2361_v61  ;;  %v7282_v30 = vld [vmem:[#allocation6_spill] sm:$0xff]  ;;  %v7295_v61 = vld [vmem:[#allocation20_spill] sm:$0xff] }
 0x846   :  { %v2370_v11 = vsel %vm2367_vm0, %v2369_v58, %v2365_v8  ;;  %v7298_v8 = vld [vmem:[#allocation26_spill] sm:$0xff]  ;;  %v7299_v58 = vld [vmem:[#allocation17_spill] sm:$0xff] }
 0x84b   :  { %v3290_v9 = vpop.eup %3289 }
 0x84c   :  { %v2376_v3 = vmul.f32 %v3290_v9, %v2370_v11  ;;  %v7300_v9 = vld [vmem:[#allocation18_spill] sm:$0xff]  ;;  %v7301_v11 = vld [vmem:[#allocation24_spill] sm:$0xff] }
 0x84e   :  { %2393 = vmatmul.f32.vlgmr.msra.gmra.mxu0 %v2376_v3  ;;  %2413 = vmatmul.f32.vlgmr.msrb.gmra.mxu1 %v2376_v3 }
 0x84f   :  { %2433 = vmatmul.f32.vlgmr.msrb.gmra.mxu2 %v2376_v3  ;;  %2453 = vmatmul.f32.vlgmr.msrb.gmra.mxu3 %v2376_v3  ;;  %v7302_v3 = vld [vmem:[#allocation21_spill] sm:$0xff] }
 0x850   :  { %2671 = vmatpush.msra.mxu0 %v5908_v13  ;;  %2691 = vmatpush.msrb.mxu1 %v5914_v22 }
 0x851   :  { %2711 = vmatpush.msrb.mxu2 %v5920_v52  ;;  %2731 = vmatpush.msrb.mxu3 %v5926_v23 }
 0x852   :  { %2672 = vmatpush.msra.mxu0 %v5932_v1  ;;  %2692 = vmatpush.msrb.mxu1 %v5938_v17 }
 0x853   :  { %2712 = vmatpush.msrb.mxu2 %v5944_v50  ;;  %2732 = vmatpush.msrb.mxu3 %v5950_v39 }
 0x854   :  { %2673 = vmatpush.msra.mxu0 %v5956_v12  ;;  %2693 = vmatpush.msrb.mxu1 %v5962_v19 }
 0x855   :  { %2713 = vmatpush.msrb.mxu2 %v5968_v55  ;;  %2733 = vmatpush.msrb.mxu3 %v5974_v26 }
 0x856   :  { %2674 = vmatpush.msra.mxu0 %v5980_v16  ;;  %2694 = vmatpush.msrb.mxu1 %v5986_v59 }
 0x857   :  { %2714 = vmatpush.msrb.mxu2 %v5992_v44  ;;  %2734 = vmatpush.msrb.mxu3 %v5998_v56 }
 0x858   :  { %2675 = vmatpush.msra.mxu0 %v6004_v24  ;;  %2695 = vmatpush.msrb.mxu1 %v6010_v31 }
 0x859   :  { %2715 = vmatpush.msrb.mxu2 %v6016_v6  ;;  %2735 = vmatpush.msrb.mxu3 %v6022_v46 }
 0x85a   :  { %2676 = vmatpush.msra.mxu0 %v6028_v29  ;;  %2696 = vmatpush.msrb.mxu1 %v6034_v54 }
 0x85b   :  { %2716 = vmatpush.msrb.mxu2 %v6040_v36  ;;  %2736 = vmatpush.msrb.mxu3 %v6046_v25 }
 0x85c   :  { %2677 = vmatpush.msra.mxu0 %v6052_v51  ;;  %2697 = vmatpush.msrb.mxu1 %v6058_v21 }
 0x85d   :  { %2717 = vmatpush.msrb.mxu2 %v6064_v45  ;;  %2737 = vmatpush.msrb.mxu3 %v6070_v62 }
 0x85e   :  { %2678 = vmatpush.msra.mxu0 %v6076_v15  ;;  %2698 = vmatpush.msrb.mxu1 %v6082_v32 }
 0x85f   :  { %2718 = vmatpush.msrb.mxu2 %v6088_v40  ;;  %2738 = vmatpush.msrb.mxu3 %v6094_v14 }
 0x860   :  { %2679 = vmatpush.msra.mxu0 %v6100_v35  ;;  %2699 = vmatpush.msrb.mxu1 %v6106_v18 }
 0x861   :  { %2719 = vmatpush.msrb.mxu2 %v6112_v33  ;;  %2739 = vmatpush.msrb.mxu3 %v6118_v28 }
 0x862   :  { %2680 = vmatpush.msra.mxu0 %v6124_v34  ;;  %2700 = vmatpush.msrb.mxu1 %v6130_v38 }
 0x863   :  { %2720 = vmatpush.msrb.mxu2 %v7278_v10  ;;  %2740 = vmatpush.msrb.mxu3 %v7279_v20 }
 0x864   :  { %2681 = vmatpush.msra.mxu0 %v7280_v4  ;;  %2701 = vmatpush.msrb.mxu1 %v7281_v42 }
 0x865   :  { %2721 = vmatpush.msrb.mxu2 %v7282_v30  ;;  %2741 = vmatpush.msrb.mxu3 %v7283_v5 }
 0x866   :  { %2682 = vmatpush.msra.mxu0 %v7284_v53  ;;  %2702 = vmatpush.msrb.mxu1 %v7285_v7 }
 0x867   :  { %2722 = vmatpush.msrb.mxu2 %v7286_v60  ;;  %2742 = vmatpush.msrb.mxu3 %v7287_v0  ;;  %v7309_v60 = vld [vmem:[#allocation28_spill] sm:$0xff] }
 0x868   :  { %2683 = vmatpush.msra.mxu0 %v7288_v41  ;;  %2703 = vmatpush.msrb.mxu1 %v7289_v49 }
 0x869   :  { %2723 = vmatpush.msrb.mxu2 %v7290_v63  ;;  %2743 = vmatpush.msrb.mxu3 %v7291_v48  ;;  %v7307_v63 = vld [vmem:[#allocation58_spill] sm:$0xff] }
 0x86a   :  { %2684 = vmatpush.msra.mxu0 %v7292_v2  ;;  %2704 = vmatpush.msrb.mxu1 %v7293_v57  ;;  %v7303_v2 = vld [vmem:[#allocation25_spill] sm:$0xff] }
 0x86b   :  { %2724 = vmatpush.msrb.mxu2 %v7294_v27  ;;  %2744 = vmatpush.msrb.mxu3 %v7295_v61  ;;  %v7304_v57 = vld [vmem:[#allocation57_spill] sm:$0xff] }
 0x86c   :  { %2685 = vmatpush.msra.mxu0 %v7296_v47  ;;  %2705 = vmatpush.msrb.mxu1 %v7297_v43  ;;  %v7305_v27 = vld [vmem:[#allocation49_spill] sm:$0xff] }
 0x86d   :  { %2725 = vmatpush.msrb.mxu2 %v7298_v8  ;;  %2745 = vmatpush.msrb.mxu3 %v7299_v58  ;;  %v1655_v48 = vadd.f32 %v7305_v27, %v7304_v57  ;;  %v7306_v61 = vld [vmem:[#allocation37_spill] sm:$0xff] }
 0x86e   :  { %2686 = vmatpush.msra.mxu0 %v7300_v9  ;;  %2706 = vmatpush.msrb.mxu1 %v7301_v11  ;;  %v1696_v47 = vadd.f32 %v7307_v63, %v7306_v61  ;;  %v7308_v9 = vld [vmem:[#allocation3_spill] sm:$0xff] }
 0x86f   :  { %2726 = vmatpush.msrb.mxu2 %v7302_v3  ;;  %2746 = vmatpush.msrb.mxu3 %v7303_v2  ;;  %v1778_v11 = vadd.f32 %v7309_v60, %v7308_v9 }
 0x8cb   :  { %v2394_v49 = vpop.f32.mrf.mxu0  ;;  %v2414_v43 = vpop.f32.mrf.mxu1 }
 0x8cc   :  { %v2457_v41 = vadd.f32 %v2394_v49, %v1655_v48  ;;  %v2458_v8 = vadd.f32 %v2414_v43, %v1696_v47  ;;  %v7310_v48 = vld [vmem:[#allocation39_spill] sm:$0xff] }
 0x8ce   :  { %v3079_v0 = vmul.f32 -1.442695, %v2457_v41  ;;  %v3080_v58 = vmul.f32 -1.442695, %v2458_v8  ;;  %v7311_v41 = vld [vmem:[#allocation53_spill] sm:$0xff] }
 0x8cf   :  { %v1737_v47 = vadd.f32 %v7311_v41, %v7310_v48 }
 0x8d0   :  { %3291 = vpow2.f32 %v3079_v0 }
 0x8d1   :  { %3293 = vpow2.f32 %v3080_v58 }
 0x8d2   :  { %v2454_v3 = vpop.f32.mrf.mxu3  ;;  %v2434_v63 = vpop.f32.mrf.mxu2 }
 0x8d3   :  { %v2460_v7 = vadd.f32 %v2454_v3, %v1778_v11  ;;  %v2459_v8 = vadd.f32 %v2434_v63, %v1737_v47 }
 0x8d5   :  { %v3081_v2 = vmul.f32 -1.442695, %v2460_v7 }
 0x8d6   :  { %v3292_v53 = vpop.eup %3291 }
 0x8d7   :  { %v3294_v5 = vpop.eup %3293  ;;  %v2464_v27 = vadd.f32 1.0, %v3292_v53  ;;  %3295 = vpow2.f32 %v3081_v2 }
 0x8d8   :  { %v2483_v57 = vadd.f32 1.0, %v3294_v5 }
 0x8d9   :  { %3297 = vrcp.f32 %v2464_v27  ;;  %v2476_v9 = vand.u32 2147483648, %v2464_v27  ;;  %v2474_v2 = vand.u32 2147483647, %v2464_v27  ;;  %vm2470_vm3 = vweird.f32 %v2464_v27 }
 0x8da   :  { %3299 = vrcp.f32 %v2483_v57  ;;  %v2495_v53 = vand.u32 2147483648, %v2483_v57  ;;  %v2493_v30 = vand.u32 2147483647, %v2483_v57  ;;  %vm2489_vm4 = vweird.f32 %v2483_v57 }
 0x8db   :  { %v2477_v63 = vor.u32 1.1754944e-38, %v2476_v9  ;;  %vm2475_vm7 = vcmp.eq.f32.partialorder %v2474_v2, 8.507059e+37 }
 0x8dc   :  { %vm2494_vm8 = vcmp.eq.f32.partialorder %v2493_v30, 8.507059e+37 }
 0x8dd   :  { %v3296_v49 = vpop.eup %3295 }
 0x8de   :  { %v2503_v0 = vadd.f32 1.0, %v3296_v49 }
 0x8df   :  { %v3298_v43 = vpop.eup %3297 }
 0x8e0   :  { %v3300_v60 = vpop.eup %3299  ;;  %v2466_v58 = vmul.f32 %v3298_v43, %v2464_v27  ;;  %3301 = vrcp.f32 %v2503_v0  ;;  %vm2471_vm1 = vweird.f32 %v3298_v43  ;;  %vm2509_vm10 = vweird.f32 %v2503_v0 }
 0x8e1   :  { %v2485_v11 = vmul.f32 %v3300_v60, %v2483_v57  ;;  %3303 = vtanh.f32 %v2459_v8  ;;  %vm2490_vm2 = vweird.f32 %v3300_v60  ;;  %vm2472_vm5 = vmor %vm2470_vm3, %vm2471_vm1  ;;  %v2513_v9 = vand.u32 2147483647, %v2503_v0 }
 0x8e2   :  { %v2467_v7 = vsub.f32 1.0, %v2466_v58  ;;  %vm2491_vm6 = vmor %vm2489_vm4, %vm2490_vm2  ;;  %v2496_v58 = vor.u32 1.1754944e-38, %v2495_v53 }
 0x8e3   :  { %v2486_v3 = vsub.f32 1.0, %v2485_v11  ;;  %vm2514_vm12 = vcmp.eq.f32.partialorder %v2513_v9, 8.507059e+37 }
 0x8e4   :  { %v2468_v5 = vmul.f32 %v3298_v43, %v2467_v7 }
 0x8e5   :  { %v2487_v61 = vmul.f32 %v3300_v60, %v2486_v3 }
 0x8e6   :  { %v3302_v42 = vpop.eup %3301  ;;  %v2469_v41 = vadd.f32 %v3298_v43, %v2468_v5 }
 0x8e7   :  { %v2488_v49 = vadd.f32 %v3300_v60, %v2487_v61  ;;  %v2505_v47 = vmul.f32 %v3302_v42, %v2503_v0  ;;  %v3304_v8 = vpop.eup %3303  ;;  %vm2510_vm9 = vweird.f32 %v3302_v42  ;;  %v2515_v61 = vand.u32 2147483648, %v2503_v0 }
 0x8e8   :  { %v2473_v11 = vsel %vm2472_vm5, %v3298_v43, %v2469_v41  ;;  %vm2511_vm11 = vmor %vm2509_vm10, %vm2510_vm9 }
 0x8e9   :  { %v2478_v48 = vsel %vm2475_vm7, %v2477_v63, %v2473_v11  ;;  %v2492_v7 = vsel %vm2491_vm6, %v3300_v60, %v2488_v49  ;;  %v2506_v4 = vsub.f32 1.0, %v2505_v47  ;;  %v2516_v53 = vor.u32 1.1754944e-38, %v2515_v61  ;;  %v7344_v11 = vld [vmem:[#allocation39_spill] sm:$0xff] }
 0x8ea   :  { %v2497_v3 = vsel %vm2494_vm8, %v2496_v58, %v2492_v7  ;;  %v2520_v20 = vmul.f32 %v3304_v8, %v2478_v48  ;;  %v7345_v8 = vld [vmem:[#allocation38_spill] sm:$0xff] }
 0x8eb   :  { %v2519_v10 = vmul.f32 %v2497_v3, %v6374_v37  ;;  %v2507_v5 = vmul.f32 %v3302_v42, %v2506_v4  ;;  %v7342_v37 = vld [vmem:[#allocation3_spill] sm:$0xff]  ;;  %v1740_v7 = vadd.f32 %v7345_v8, %v7344_v11 }
 0x8ed   :  { %v6450_v27 = vadd.f32 %v2520_v20, %v2519_v10  ;;  %v2508_v57 = vadd.f32 %v3302_v42, %v2507_v5  ;;  %v7343_v10 = vld [vmem:[#allocation59_spill] sm:$0xff] }
 0x8ee   :  { %v1781_v20 = vadd.f32 %v7343_v10, %v7342_v37 }
 0x8ef   :  { %3305 = vtanh.f32 %v6450_v27  ;;  %v2512_v43 = vsel %vm2511_vm11, %v3302_v42, %v2508_v57 }
 0x8f0   :  { %v2517_v60 = vsel %vm2514_vm12, %v2516_v53, %v2512_v43 }
 0x8f5   :  { %v3306_v30 = vpop.eup %3305 }
 0x8f6   :  { %v2523_v2 = vmul.f32 %v3306_v30, %v2517_v60 }
 0x8f8   :  { %2540 = vmatmul.f32.vlgmr.msrb.gmra.mxu0 %v2523_v2  ;;  %2560 = vmatmul.f32.vlgmr.msra.gmra.mxu1 %v2523_v2 }
 0x8f9   :  { %2580 = vmatmul.f32.vlgmr.msra.gmra.mxu2 %v2523_v2  ;;  %2600 = vmatmul.f32.vlgmr.msra.gmra.mxu3 %v2523_v2 }
 0x8fa   :  { %2818 = vmatpush.msrb.mxu0 %v5908_v13  ;;  %2838 = vmatpush.msra.mxu1 %v5914_v22  ;;  %v7312_v13 = vld [vmem:[#allocation14_spill] sm:$0xff] }
 0x8fb   :  { %2858 = vmatpush.msra.mxu2 %v5920_v52  ;;  %2878 = vmatpush.msra.mxu3 %v5926_v23  ;;  %v7313_v22 = vld [vmem:[#allocation42_spill] sm:$0xff]  ;;  %v7314_v52 = vld [vmem:[#allocation41_spill] sm:$0xff]  ;;  %v7315_v23 = vld [vmem:[#allocation40_spill] sm:$0xff] }
 0x8fc   :  { %2819 = vmatpush.msrb.mxu0 %v5932_v1  ;;  %2839 = vmatpush.msra.mxu1 %v5938_v17  ;;  %v7316_v1 = vld [vmem:[#allocation6_spill] sm:$0xff]  ;;  %v7317_v17 = vld [vmem:[#allocation43_spill] sm:$0xff] }
 0x8fd   :  { %2859 = vmatpush.msra.mxu2 %v5944_v50  ;;  %2879 = vmatpush.msra.mxu3 %v5950_v39  ;;  %v7318_v50 = vld [vmem:[#allocation45_spill] sm:$0xff]  ;;  %v7319_v39 = vld [vmem:[#allocation44_spill] sm:$0xff] }
 0x8fe   :  { %2820 = vmatpush.msrb.mxu0 %v5956_v12  ;;  %2840 = vmatpush.msra.mxu1 %v5962_v19  ;;  %v7320_v12 = vld [vmem:[#allocation9_spill] sm:$0xff]  ;;  %v7321_v19 = vld [vmem:[#allocation7_spill] sm:$0xff] }
 0x8ff   :  { %2860 = vmatpush.msra.mxu2 %v5968_v55  ;;  %2880 = vmatpush.msra.mxu3 %v5974_v26  ;;  %v7322_v55 = vld [vmem:[#allocation8_spill] sm:$0xff] }
 0x900   :  { %2821 = vmatpush.msrb.mxu0 %v5980_v16  ;;  %2841 = vmatpush.msra.mxu1 %v5986_v59  ;;  %v7323_v26 = vld [vmem:[#allocation12_spill] sm:$0xff]  ;;  %v7324_v16 = vld [vmem:[#allocation13_spill] sm:$0xff]  ;;  %v7325_v59 = vld [vmem:[#allocation11_spill] sm:$0xff] }
 0x901   :  { %2861 = vmatpush.msra.mxu2 %v5992_v44  ;;  %2881 = vmatpush.msra.mxu3 %v5998_v56  ;;  %v7326_v44 = vld [vmem:[#allocation19_spill] sm:$0xff]  ;;  %v7327_v56 = vld [vmem:[#allocation16_spill] sm:$0xff] }
 0x902   :  { %2822 = vmatpush.msrb.mxu0 %v6004_v24  ;;  %2842 = vmatpush.msra.mxu1 %v6010_v31  ;;  %v7328_v24 = vld [vmem:[#allocation23_spill] sm:$0xff]  ;;  %v7329_v31 = vld [vmem:[#allocation20_spill] sm:$0xff] }
 0x903   :  { %2862 = vmatpush.msra.mxu2 %v6016_v6  ;;  %2882 = vmatpush.msra.mxu3 %v6022_v46  ;;  %v7330_v6 = vld [vmem:[#allocation15_spill] sm:$0xff]  ;;  %v7331_v46 = vld [vmem:[#allocation22_spill] sm:$0xff] }
 0x904   :  { %2823 = vmatpush.msrb.mxu0 %v6028_v29  ;;  %2843 = vmatpush.msra.mxu1 %v6034_v54  ;;  %v7332_v29 = vld [vmem:[#allocation26_spill] sm:$0xff]  ;;  %v7333_v54 = vld [vmem:[#allocation17_spill] sm:$0xff] }
 0x905   :  { %2863 = vmatpush.msra.mxu2 %v6040_v36  ;;  %2883 = vmatpush.msra.mxu3 %v6046_v25  ;;  %v7334_v36 = vld [vmem:[#allocation18_spill] sm:$0xff]  ;;  %v7335_v25 = vld [vmem:[#allocation24_spill] sm:$0xff] }
 0x906   :  { %2824 = vmatpush.msrb.mxu0 %v6052_v51  ;;  %2844 = vmatpush.msra.mxu1 %v6058_v21  ;;  %v7336_v51 = vld [vmem:[#allocation21_spill] sm:$0xff] }
 0x907   :  { %2864 = vmatpush.msra.mxu2 %v6064_v45  ;;  %2884 = vmatpush.msra.mxu3 %v6070_v62  ;;  %v7337_v21 = vld [vmem:[#allocation25_spill] sm:$0xff]  ;;  %v7339_v62 = vld [vmem:[#allocation50_spill] sm:$0xff] }
 0x908   :  { %2825 = vmatpush.msrb.mxu0 %v6076_v15  ;;  %2845 = vmatpush.msra.mxu1 %v6082_v32  ;;  %v7338_v45 = vld [vmem:[#allocation57_spill] sm:$0xff] }
 0x909   :  { %2865 = vmatpush.msra.mxu2 %v6088_v40  ;;  %2885 = vmatpush.msra.mxu3 %v6094_v14  ;;  %v1658_v15 = vadd.f32 %v7339_v62, %v7338_v45  ;;  %v7340_v32 = vld [vmem:[#allocation37_spill] sm:$0xff]  ;;  %v7341_v40 = vld [vmem:[#allocation51_spill] sm:$0xff] }
 0x90a   :  { %2826 = vmatpush.msrb.mxu0 %v6100_v35  ;;  %2846 = vmatpush.msra.mxu1 %v6106_v18  ;;  %v1699_v14 = vadd.f32 %v7341_v40, %v7340_v32 }
 0x90b   :  { %2866 = vmatpush.msra.mxu2 %v6112_v33  ;;  %2886 = vmatpush.msra.mxu3 %v6118_v28 }
 0x90c   :  { %2827 = vmatpush.msrb.mxu0 %v6124_v34  ;;  %2847 = vmatpush.msra.mxu1 %v6130_v38 }
 0x90d   :  { %2867 = vmatpush.msra.mxu2 %v7312_v13  ;;  %2887 = vmatpush.msra.mxu3 %v7313_v22 }
 0x90e   :  { %2828 = vmatpush.msrb.mxu0 %v7314_v52  ;;  %2848 = vmatpush.msra.mxu1 %v7315_v23 }
 0x90f   :  { %2868 = vmatpush.msra.mxu2 %v7316_v1  ;;  %2888 = vmatpush.msra.mxu3 %v7317_v17 }
 0x910   :  { %2829 = vmatpush.msrb.mxu0 %v7318_v50  ;;  %2849 = vmatpush.msra.mxu1 %v7319_v39 }
 0x911   :  { %2869 = vmatpush.msra.mxu2 %v7320_v12  ;;  %2889 = vmatpush.msra.mxu3 %v7321_v19 }
 0x912   :  { %2830 = vmatpush.msrb.mxu0 %v7322_v55  ;;  %2850 = vmatpush.msra.mxu1 %v7323_v26 }
 0x913   :  { %2870 = vmatpush.msra.mxu2 %v7324_v16  ;;  %2890 = vmatpush.msra.mxu3 %v7325_v59 }
 0x914   :  { %2831 = vmatpush.msrb.mxu0 %v7326_v44  ;;  %2851 = vmatpush.msra.mxu1 %v7327_v56 }
 0x915   :  { %2871 = vmatpush.msra.mxu2 %v7328_v24  ;;  %2891 = vmatpush.msra.mxu3 %v7329_v31 }
 0x916   :  { %2832 = vmatpush.msrb.mxu0 %v7330_v6  ;;  %2852 = vmatpush.msra.mxu1 %v7331_v46 }
 0x917   :  { %2872 = vmatpush.msra.mxu2 %v7332_v29  ;;  %2892 = vmatpush.msra.mxu3 %v7333_v54 }
 0x918   :  { %2833 = vmatpush.msrb.mxu0 %v7334_v36  ;;  %2853 = vmatpush.msra.mxu1 %v7335_v25 }
 0x919   :  { %2873 = vmatpush.msra.mxu2 %v7336_v51  ;;  %2893 = vmatpush.msra.mxu3 %v7337_v21 }
 0x975   :  { %v2541_v35 = vpop.f32.mrf.mxu0  ;;  %v2561_v18 = vpop.f32.mrf.mxu1 }
 0x976   :  { %v2604_v33 = vadd.f32 %v2541_v35, %v1658_v15  ;;  %v2605_v28 = vadd.f32 %v2561_v18, %v1699_v14  ;;  %v7347_v14 = vld [vmem:[#allocation5_spill] sm:$0xff] }
 0x977   :  { %v1702_v35 = vadd.f32 %v7347_v14, %v7340_v32  ;;  %v2979_v14 = vld [vmem:[%s6612_s7 + $0x70] sm:$0xff] }
 0x978   :  { %v3082_v34 = vmul.f32 -1.442695, %v2604_v33  ;;  %v3083_v38 = vmul.f32 -1.442695, %v2605_v28 }
 0x97a   :  { %3307 = vpow2.f32 %v3082_v34 }
 0x97b   :  { %3309 = vpow2.f32 %v3083_v38 }
 0x97c   :  { %v2601_v4 = vpop.f32.mrf.mxu3  ;;  %v2581_v47 = vpop.f32.mrf.mxu2 }
 0x97d   :  { %v2607_v42 = vadd.f32 %v2601_v4, %v1781_v20  ;;  %v2606_v57 = vadd.f32 %v2581_v47, %v1740_v7  ;;  %v7348_v20 = vld [vmem:[#allocation29_spill] sm:$0xff]  ;;  %v7349_v7 = vld [vmem:[#allocation2_spill] sm:$0xff] }
 0x97e   :  { %v1784_v4 = vadd.f32 %v7348_v20, %v7342_v37  ;;  %v7350_v20 = vld [vmem:[#allocation52_spill] sm:$0xff] }
 0x97f   :  { %v3084_v48 = vmul.f32 -1.442695, %v2607_v42 }
 0x980   :  { %v3308_v0 = vpop.eup %3307 }
 0x981   :  { %v3310_v41 = vpop.eup %3309  ;;  %v2611_v63 = vadd.f32 1.0, %v3308_v0  ;;  %3311 = vpow2.f32 %v3084_v48 }
 0x982   :  { %v2630_v49 = vadd.f32 1.0, %v3310_v41 }
 0x983   :  { %3313 = vrcp.f32 %v2611_v63  ;;  %v2623_v60 = vand.u32 2147483648, %v2611_v63  ;;  %v2621_v22 = vand.u32 2147483647, %v2611_v63  ;;  %vm2617_vm15 = vweird.f32 %v2611_v63 }
 0x984   :  { %3315 = vrcp.f32 %v2630_v49  ;;  %v2642_v2 = vand.u32 2147483648, %v2630_v49  ;;  %v2640_v23 = vand.u32 2147483647, %v2630_v49  ;;  %vm2636_vm0 = vweird.f32 %v2630_v49 }
 0x985   :  { %v2624_v50 = vor.u32 1.1754944e-38, %v2623_v60  ;;  %vm2622_vm3 = vcmp.eq.f32.partialorder %v2621_v22, 8.507059e+37 }
 0x986   :  { %v2643_v19 = vor.u32 1.1754944e-38, %v2642_v2  ;;  %vm2641_vm4 = vcmp.eq.f32.partialorder %v2640_v23, 8.507059e+37 }
 0x987   :  { %v3312_v58 = vpop.eup %3311 }
 0x988   :  { %v2650_v3 = vadd.f32 1.0, %v3312_v58 }
 0x989   :  { %v3314_v5 = vpop.eup %3313 }
 0x98a   :  { %v3316_v61 = vpop.eup %3315  ;;  %v2613_v9 = vmul.f32 %v3314_v5, %v2611_v63  ;;  %3317 = vrcp.f32 %v2650_v3  ;;  %vm2618_vm13 = vweird.f32 %v3314_v5  ;;  %v2662_v54 = vand.u32 2147483648, %v2650_v3 }
 0x98b   :  { %v2632_v43 = vmul.f32 %v3316_v61, %v2630_v49  ;;  %3319 = vtanh.f32 %v2606_v57  ;;  %vm2637_vm14 = vweird.f32 %v3316_v61  ;;  %vm2619_vm1 = vmor %vm2617_vm15, %vm2618_vm13  ;;  %vm2656_vm6 = vweird.f32 %v2650_v3 }
 0x98c   :  { %v2614_v53 = vsub.f32 1.0, %v2613_v9  ;;  %vm2638_vm2 = vmor %vm2636_vm0, %vm2637_vm14  ;;  %v2660_v36 = vand.u32 2147483647, %v2650_v3  ;;  %v2663_v51 = vor.u32 1.1754944e-38, %v2662_v54 }
 0x98d   :  { %v2633_v30 = vsub.f32 1.0, %v2632_v43 }
 0x98e   :  { %v2615_v13 = vmul.f32 %v3314_v5, %v2614_v53  ;;  %vm2661_vm8 = vcmp.eq.f32.partialorder %v2660_v36, 8.507059e+37 }
 0x98f   :  { %v2634_v52 = vmul.f32 %v3316_v61, %v2633_v30 }
 0x990   :  { %v3318_v1 = vpop.eup %3317  ;;  %v2616_v17 = vadd.f32 %v3314_v5, %v2615_v13 }
 0x991   :  { %v2635_v39 = vadd.f32 %v3316_v61, %v2634_v52  ;;  %v2652_v12 = vmul.f32 %v3318_v1, %v2650_v3  ;;  %v3320_v26 = vpop.eup %3319  ;;  %vm2657_vm5 = vweird.f32 %v3318_v1  ;;  %v1743_v3 = vadd.f32 %v7349_v7, %v7344_v11 }
 0x992   :  { %v2620_v55 = vsel %vm2619_vm1, %v3314_v5, %v2616_v17  ;;  %vm2658_vm7 = vmor %vm2656_vm6, %vm2657_vm5 }
 0x993   :  { %v2625_v16 = vsel %vm2622_vm3, %v2624_v50, %v2620_v55  ;;  %v2639_v59 = vsel %vm2638_vm2, %v3316_v61, %v2635_v39  ;;  %v2653_v44 = vsub.f32 1.0, %v2652_v12 }
 0x994   :  { %v2644_v56 = vsel %vm2641_vm4, %v2643_v19, %v2639_v59  ;;  %v2667_v24 = vmul.f32 %v3320_v26, %v2625_v16 }
 0x995   :  { %v2666_v31 = vmul.f32 %v2644_v56, %v6450_v27  ;;  %v2654_v6 = vmul.f32 %v3318_v1, %v2653_v44  ;;  %v7346_v27 = vld [vmem:[#allocation4_spill] sm:$0xff] }
 0x996   :  { %v1661_v40 = vadd.f32 %v7346_v27, %v7338_v45 }
 0x997   :  { %v6526_v46 = vadd.f32 %v2667_v24, %v2666_v31  ;;  %v2655_v29 = vadd.f32 %v3318_v1, %v2654_v6 }
 0x999   :  { %3321 = vtanh.f32 %v6526_v46  ;;  %v2659_v25 = vsel %vm2658_vm7, %v3318_v1, %v2655_v29 }
 0x99a   :  { %v2664_v62 = vsel %vm2661_vm8, %v2663_v51, %v2659_v25 }
 0x99f   :  { %v3322_v21 = vpop.eup %3321 }
 0x9a0   :  { %v2670_v15 = vmul.f32 %v3322_v21, %v2664_v62 }
 0x9a2   :  { %2687 = vmatmul.f32.vlgmr.msra.gmra.mxu0 %v2670_v15  ;;  %2707 = vmatmul.f32.vlgmr.msrb.gmra.mxu1 %v2670_v15 }
 0x9a3   :  { %2727 = vmatmul.f32.vlgmr.msrb.gmra.mxu2 %v2670_v15  ;;  %2747 = vmatmul.f32.vlgmr.msrb.gmra.mxu3 %v2670_v15 }
 0xa1f   :  { %v2688_v18 = vpop.f32.mrf.mxu0  ;;  %v2708_v33 = vpop.f32.mrf.mxu1 }
 0xa20   :  { %v2751_v28 = vadd.f32 %v2688_v18, %v1661_v40  ;;  %v2752_v34 = vadd.f32 %v2708_v33, %v1702_v35  ;;  %v2978_v35 = vld [vmem:[%s6612_s7 + $0x68] sm:$0xff]  ;;  %v2977_v18 = vld [vmem:[%s6612_s7 + $0x60] sm:$0xff]  ;;  %v2976_v33 = vld [vmem:[%s6612_s7 + $0x58] sm:$0xff] }
 0xa22   :  { %v3085_v38 = vmul.f32 -1.442695, %v2751_v28  ;;  %v3086_v10 = vmul.f32 -1.442695, %v2752_v34  ;;  %v2975_v28 = vld [vmem:[%s6612_s7 + $0x50] sm:$0xff]  ;;  %v2974_v34 = vld [vmem:[%s6612_s7 + $0x48] sm:$0xff] }
 0xa24   :  { %3323 = vpow2.f32 %v3085_v38  ;;  %v2973_v38 = vld [vmem:[%s6612_s7 + $0x40] sm:$0xff] }
 0xa25   :  { %3325 = vpow2.f32 %v3086_v10  ;;  %v2972_v10 = vld [vmem:[%s6612_s7 + $0x38] sm:$0xff] }
 0xa26   :  { %v2748_v42 = vpop.f32.mrf.mxu3  ;;  %v2728_v58 = vpop.f32.mrf.mxu2 }
 0xa27   :  { %v2754_v48 = vadd.f32 %v2748_v42, %v1784_v4  ;;  %v2753_v61 = vadd.f32 %v2728_v58, %v1743_v3  ;;  %v1664_v4 = vadd.f32 %v7350_v20, %v7338_v45  ;;  %v7351_v42 = vld [vmem:[#allocation55_spill] sm:$0xff]  ;;  %v2969_v45 = vld [vmem:[%s6612_s7 + $0x20] sm:$0xff] }
 0xa28   :  { %v2970_v58 = vld [vmem:[%s6612_s7 + $0x28] sm:$0xff]  ;;  %v7352_v3 = vld [vmem:[#allocation10_spill] sm:$0xff] }
 0xa29   :  { %v3087_v0 = vmul.f32 -1.442695, %v2754_v48  ;;  %v1705_v48 = vadd.f32 %v7351_v42, %v7340_v32  ;;  %v2968_v32 = vld [vmem:[%s6612_s7 + $0x18] sm:$0xff] }
 0xa2a   :  { %v3324_v41 = vpop.eup %3323 }
 0xa2b   :  { %v3326_v63 = vpop.eup %3325  ;;  %v2758_v49 = vadd.f32 1.0, %v3324_v41  ;;  %3327 = vpow2.f32 %v3087_v0 }
 0xa2c   :  { %v2777_v47 = vadd.f32 1.0, %v3326_v63  ;;  %v2971_v63 = vld [vmem:[%s6612_s7 + $0x30] sm:$0xff] }
 0xa2d   :  { %3329 = vrcp.f32 %v2758_v49  ;;  %v2770_v2 = vand.u32 2147483648, %v2758_v49  ;;  %v2768_v52 = vand.u32 2147483647, %v2758_v49  ;;  %vm2764_vm11 = vweird.f32 %v2758_v49 }
 0xa2e   :  { %3331 = vrcp.f32 %v2777_v47  ;;  %v2789_v13 = vand.u32 2147483648, %v2777_v47  ;;  %v2787_v1 = vand.u32 2147483647, %v2777_v47  ;;  %vm2783_vm12 = vweird.f32 %v2777_v47 }
 0xa2f   :  { %v2771_v39 = vor.u32 1.1754944e-38, %v2770_v2  ;;  %vm2769_vm15 = vcmp.eq.f32.partialorder %v2768_v52, 8.507059e+37 }
 0xa30   :  { %v2790_v55 = vor.u32 1.1754944e-38, %v2789_v13  ;;  %vm2788_vm0 = vcmp.eq.f32.partialorder %v2787_v1, 8.507059e+37 }
 0xa31   :  { %v3328_v8 = vpop.eup %3327 }
 0xa32   :  { %v2797_v5 = vadd.f32 1.0, %v3328_v8 }
 0xa33   :  { %v3330_v57 = vpop.eup %3329 }
 0xa34   :  { %v3332_v9 = vpop.eup %3331  ;;  %v2760_v43 = vmul.f32 %v3330_v57, %v2758_v49  ;;  %3333 = vrcp.f32 %v2797_v5  ;;  %vm2765_vm9 = vweird.f32 %v3330_v57  ;;  %v2809_v25 = vand.u32 2147483648, %v2797_v5 }
 0xa35   :  { %v2779_v53 = vmul.f32 %v3332_v9, %v2777_v47  ;;  %3335 = vtanh.f32 %v2753_v61  ;;  %vm2784_vm10 = vweird.f32 %v3332_v9  ;;  %vm2766_vm13 = vmor %vm2764_vm11, %vm2765_vm9  ;;  %vm2803_vm2 = vweird.f32 %v2797_v5 }
 0xa36   :  { %v2761_v30 = vsub.f32 1.0, %v2760_v43  ;;  %vm2785_vm14 = vmor %vm2783_vm12, %vm2784_vm10  ;;  %v2807_v51 = vand.u32 2147483647, %v2797_v5  ;;  %v2810_v62 = vor.u32 1.1754944e-38, %v2809_v25  ;;  %v2966_v43 = vld [vmem:[%s6612_s7 + $0x8] sm:$0xff] }
 0xa37   :  { %v2780_v60 = vsub.f32 1.0, %v2779_v53 }
 0xa38   :  { %v2762_v22 = vmul.f32 %v3330_v57, %v2761_v30  ;;  %vm2808_vm4 = vcmp.eq.f32.partialorder %v2807_v51, 8.507059e+37  ;;  %v2965_v30 = vld [vmem:[%s6612_s7] sm:$0xff] }
 0xa39   :  { %v2781_v23 = vmul.f32 %v3332_v9, %v2780_v60 }
 0xa3a   :  { %v3334_v17 = vpop.eup %3333  ;;  %v2763_v50 = vadd.f32 %v3330_v57, %v2762_v22 }
 0xa3b   :  { %v2782_v12 = vadd.f32 %v3332_v9, %v2781_v23  ;;  %v2799_v19 = vmul.f32 %v3334_v17, %v2797_v5  ;;  %v3336_v16 = vpop.eup %3335  ;;  %vm2804_vm1 = vweird.f32 %v3334_v17  ;;  %v1787_v5 = vadd.f32 %v7352_v3, %v7342_v37  ;;  %v7353_v23 = vld [vmem:[#allocation36_spill] sm:$0xff] }
 0xa3c   :  { %v2767_v26 = vsel %vm2766_vm13, %v3330_v57, %v2763_v50  ;;  %vm2805_vm3 = vmor %vm2803_vm2, %vm2804_vm1  ;;  %v2967_v57 = vld [vmem:[%s6612_s7 + $0x10] sm:$0xff]  ;;  %v1746_v1 = vadd.f32 %v7353_v23, %v7344_v11  ;;  %vm3005_vm1 = vcmask 31744  }
 0xa3d   :  { %v2772_v59 = vsel %vm2769_vm15, %v2771_v39, %v2767_v26  ;;  %v2786_v44 = vsel %vm2785_vm14, %v3332_v9, %v2782_v12  ;;  %v2800_v56 = vsub.f32 1.0, %v2799_v19 }
 0xa3e   :  { %v2791_v24 = vsel %vm2788_vm0, %v2790_v55, %v2786_v44  ;;  %v2814_v31 = vmul.f32 %v3336_v16, %v2772_v59 }
 0xa3f   :  { %v2813_v6 = vmul.f32 %v2791_v24, %v6526_v46  ;;  %v2801_v29 = vmul.f32 %v3334_v17, %v2800_v56  ;;  %v2980_v46 = vld [vmem:[%s6612_s7 + $0x78] sm:$0xff] }
 0xa40   :  { %2985 = vmatpush.msra.mxu0 %v2980_v46 }
 0xa41   :  { %v6538_v54 = vadd.f32 %v2814_v31, %v2813_v6  ;;  %v2802_v36 = vadd.f32 %v3334_v17, %v2801_v29 }
 0xa42   :  { %2986 = vmatpush.msra.mxu0 %v2979_v14 }
 0xa43   :  { %3337 = vtanh.f32 %v6538_v54  ;;  %v2806_v21 = vsel %vm2805_vm3, %v3334_v17, %v2802_v36 }
 0xa44   :  { %v2811_v27 = vsel %vm2808_vm4, %v2810_v62, %v2806_v21  ;;  %2987 = vmatpush.msra.mxu0 %v2978_v35 }
 0xa46   :  { %2988 = vmatpush.msra.mxu0 %v2977_v18 }
 0xa48   :  { %2989 = vmatpush.msra.mxu0 %v2976_v33 }
 0xa49   :  { %v3338_v15 = vpop.eup %3337 }
 0xa4a   :  { %v2817_v40 = vmul.f32 %v3338_v15, %v2811_v27  ;;  %2990 = vmatpush.msra.mxu0 %v2975_v28 }
 0xa4c   :  { %2834 = vmatmul.f32.vlgmr.msrb.gmra.mxu0 %v2817_v40  ;;  %2854 = vmatmul.f32.vlgmr.msra.gmra.mxu1 %v2817_v40 }
 0xa4d   :  { %2874 = vmatmul.f32.vlgmr.msra.gmra.mxu2 %v2817_v40  ;;  %2894 = vmatmul.f32.vlgmr.msra.gmra.mxu3 %v2817_v40 }
 0xa4e   :  { %2991 = vmatpush.msra.mxu0 %v2974_v34 }
 0xa50   :  { %2992 = vmatpush.msra.mxu0 %v2973_v38 }
 0xa52   :  { %2993 = vmatpush.msra.mxu0 %v2972_v10 }
 0xa54   :  { %2994 = vmatpush.msra.mxu0 %v2971_v63 }
 0xa56   :  { %2995 = vmatpush.msra.mxu0 %v2970_v58 }
 0xa58   :  { %2996 = vmatpush.msra.mxu0 %v2969_v45 }
 0xa5a   :  { %2997 = vmatpush.msra.mxu0 %v2968_v32 }
 0xa5c   :  { %2998 = vmatpush.msra.mxu0 %v2967_v57 }
 0xa5e   :  { %2999 = vmatpush.msra.mxu0 %v2966_v43 }
 0xa60   :  { %3000 = vmatpush.msra.mxu0 %v2965_v30 }
 0xac9   :  { %v2835_v0 = vpop.f32.mrf.mxu0  ;;  %v2855_v41 = vpop.f32.mrf.mxu1 }
 0xaca   :  { %v2898_v49 = vadd.f32 %v2835_v0, %v1664_v4  ;;  %v2899_v47 = vadd.f32 %v2855_v41, %v1705_v48 }
 0xacc   :  { %v3088_v8 = vmul.f32 -1.442695, %v2898_v49  ;;  %v3089_v7 = vmul.f32 -1.442695, %v2899_v47 }
 0xace   :  { %3339 = vpow2.f32 %v3088_v8 }
 0xacf   :  { %3341 = vpow2.f32 %v3089_v7 }
 0xad0   :  { %v2895_v61 = vpop.f32.mrf.mxu3  ;;  %v2875_v22 = vpop.f32.mrf.mxu2 }
 0xad1   :  { %v2901_v9 = vadd.f32 %v2895_v61, %v1787_v5  ;;  %v2900_v39 = vadd.f32 %v2875_v22, %v1746_v1 }
 0xad3   :  { %v3090_v53 = vmul.f32 -1.442695, %v2901_v9 }
 0xad4   :  { %v3340_v60 = vpop.eup %3339 }
 0xad5   :  { %v3342_v37 = vpop.eup %3341  ;;  %v2905_v2 = vadd.f32 1.0, %v3340_v60  ;;  %3343 = vpow2.f32 %v3090_v53 }
 0xad6   :  { %v2924_v13 = vadd.f32 1.0, %v3342_v37 }
 0xad7   :  { %3345 = vrcp.f32 %v2905_v2  ;;  %v2917_v59 = vand.u32 2147483648, %v2905_v2  ;;  %v2915_v24 = vand.u32 2147483647, %v2905_v2  ;;  %vm2911_vm7 = vweird.f32 %v2905_v2 }
 0xad8   :  { %3347 = vrcp.f32 %v2924_v13  ;;  %v2936_v44 = vand.u32 2147483648, %v2924_v13  ;;  %v2934_v6 = vand.u32 2147483647, %v2924_v13  ;;  %vm2930_vm8 = vweird.f32 %v2924_v13 }
 0xad9   :  { %v2918_v36 = vor.u32 1.1754944e-38, %v2917_v59  ;;  %vm2916_vm11 = vcmp.eq.f32.partialorder %v2915_v24, 8.507059e+37 }
 0xada   :  { %v2937_v21 = vor.u32 1.1754944e-38, %v2936_v44  ;;  %vm2935_vm12 = vcmp.eq.f32.partialorder %v2934_v6, 8.507059e+37 }
 0xadb   :  { %v3344_v52 = vpop.eup %3343 }
 0xadc   :  { %v2944_v17 = vadd.f32 1.0, %v3344_v52 }
 0xadd   :  { %v3346_v50 = vpop.eup %3345 }
 0xade   :  { %v3348_v12 = vpop.eup %3347  ;;  %v2907_v19 = vmul.f32 %v3346_v50, %v2905_v2  ;;  %3349 = vrcp.f32 %v2944_v17  ;;  %vm2912_vm5 = vweird.f32 %v3346_v50  ;;  %v2956_v38 = vand.u32 2147483648, %v2944_v17 }
 0xadf   :  { %v2926_v55 = vmul.f32 %v3348_v12, %v2924_v13  ;;  %3351 = vtanh.f32 %v2900_v39  ;;  %vm2931_vm6 = vweird.f32 %v3348_v12  ;;  %vm2913_vm9 = vmor %vm2911_vm7, %vm2912_vm5  ;;  %vm2950_vm14 = vweird.f32 %v2944_v17 }
 0xae0   :  { %v2908_v26 = vsub.f32 1.0, %v2907_v19  ;;  %vm2932_vm10 = vmor %vm2930_vm8, %vm2931_vm6  ;;  %v2954_v10 = vand.u32 2147483647, %v2944_v17  ;;  %v2957_v4 = vor.u32 1.1754944e-38, %v2956_v38 }
 0xae1   :  { %v2927_v16 = vsub.f32 1.0, %v2926_v55 }
 0xae2   :  { %v2909_v56 = vmul.f32 %v3346_v50, %v2908_v26  ;;  %vm2955_vm0 = vcmp.eq.f32.partialorder %v2954_v10, 8.507059e+37 }
 0xae3   :  { %v2928_v31 = vmul.f32 %v3348_v12, %v2927_v16 }
 0xae4   :  { %v3350_v29 = vpop.eup %3349  ;;  %v2910_v11 = vadd.f32 %v3346_v50, %v2909_v56 }
 0xae5   :  { %v2929_v25 = vadd.f32 %v3348_v12, %v2928_v31  ;;  %v2946_v51 = vmul.f32 %v3350_v29, %v2944_v17  ;;  %v3352_v15 = vpop.eup %3351  ;;  %vm2951_vm13 = vweird.f32 %v3350_v29 }
 0xae6   :  { %v2914_v62 = vsel %vm2913_vm9, %v3346_v50, %v2910_v11  ;;  %vm2952_vm15 = vmor %vm2950_vm14, %vm2951_vm13 }
 0xae7   :  { %v2919_v27 = vsel %vm2916_vm11, %v2918_v36, %v2914_v62  ;;  %v2933_v40 = vsel %vm2932_vm10, %v3348_v12, %v2929_v25  ;;  %v2947_v46 = vsub.f32 1.0, %v2946_v51 }
 0xae8   :  { %v2938_v14 = vsel %vm2935_vm12, %v2937_v21, %v2933_v40  ;;  %v2961_v35 = vmul.f32 %v3352_v15, %v2919_v27 }
 0xae9   :  { %v2960_v18 = vmul.f32 %v2938_v14, %v6538_v54  ;;  %v2948_v33 = vmul.f32 %v3350_v29, %v2947_v46  ;;  %v3098_v54 = vld [vmem:[%s6611_s8] ss:$0 sm:$0xff] }
 0xaeb   :  { %v2962_v28 = vadd.f32 %v2961_v35, %v2960_v18  ;;  %v2949_v34 = vadd.f32 %v3350_v29, %v2948_v33 }
 0xaed   :  { %3353 = vtanh.f32 %v2962_v28  ;;  %v2953_v20 = vsel %vm2952_vm15, %v3350_v29, %v2949_v34 }
 0xaee   :  { %v2958_v48 = vsel %vm2955_vm0, %v2957_v4, %v2953_v20 }
 0xaf3   :  { %v3354_v42 = vpop.eup %3353 }
 0xaf4   :  { %v2964_v0 = vmul.f32 %v3354_v42, %v2958_v48 }
 0xaf6   :  { %3001 = vmatmul.f32.vlgmr.msra.gmra.mxu0 %v2964_v0 }
 0xb73   :  { %v3002_v41 = vpop.f32.mrf.mxu0 }
 0xb74   :  { %v3003_v63 = vadd.f32 %v3098_v54, %v3002_v41 }
 0xb76   :  { %3006 = vst.msk [vmem:[%s6613_s9] sm:$0xff] %vm3005_vm1, %v3003_v63 }

</bundles_post_ra>
